<compile_context>
chip_gen: v7x
topology: tpu7x:2x2x1
jax: 0.10.0
libtpu: 0.0.40
codegen_flags: <defaults>
</compile_context>

<pallas_src>
import functools

import jax
import jax.numpy as jnp
from jax.experimental import pallas as pl
from jax.experimental.pallas import tpu as pltpu

C_IN, C1, C2 = 3, 8, 16  # module channel sizes: conv1 3->8, conv2 8->16


# ----------------------------------------------------------------------------
# Fused kernel: one grid step == one batch element, everything stays in VMEM.
# ----------------------------------------------------------------------------
def _conv2layers_kernel(x_ref, w1_ref, b1_ref, w2_ref, b2_ref, wd_ref, bd_ref,
                        o_ref,
                        pad1_ref, act1_ref, pad2_ref, act2_ref,
                        *, h, w, n_classes):
    f32 = jnp.float32
    bf16 = jnp.bfloat16
    h2, w2 = h // 2, w // 2
    h4, w4 = h // 4, w // 4

    # ---------------- conv1: 3x3 'same', C_IN -> C1, ReLU ----------------
    # Zero-padded input lives in a VMEM scratch; im2col is done in-kernel by
    # slicing the 9 taps and accumulating (patch @ w_tap) on the MXU.
    pad1_ref[...] = jnp.zeros_like(pad1_ref)
    pad1_ref[1:h + 1, 1:w + 1, :] = x_ref[0]

    acc1 = jnp.zeros((h * w, C1), f32)
    for kh in range(3):
        for kw in range(3):
            patch = pad1_ref[kh:kh + h, kw:kw + w, :].reshape(h * w, C_IN)
            acc1 = acc1 + jnp.dot(patch.astype(bf16), w1_ref[kh * 3 + kw],
                                  preferred_element_type=f32)
    a1 = jnp.maximum(acc1 + b1_ref[...], 0.0)            # (h*w, C1), f32
    act1_ref[...] = a1.reshape(h, w, C1)

    # ---------------- maxpool 2x2 (stride 2) ----------------
    # W-pool via stride-2 sublane reads from the scratch ref; H-pool via a
    # leading-dim-only reshape + elementwise max (layout-safe ops only).
    we = jnp.maximum(act1_ref[:, pl.ds(0, w2, stride=2), :],
                     act1_ref[:, pl.ds(1, w2, stride=2), :])     # (h, w2, C1)
    we = we.reshape(h2, 2, w2, C1)
    p1 = jnp.maximum(we[:, 0], we[:, 1])                         # (h2, w2, C1)

    # ---------------- conv2: 3x3 'same', C1 -> C2, ReLU ----------------
    pad2_ref[...] = jnp.zeros_like(pad2_ref)
    pad2_ref[1:h2 + 1, 1:w2 + 1, :] = p1

    acc2 = jnp.zeros((h2 * w2, C2), f32)
    for kh in range(3):
        for kw in range(3):
            patch = pad2_ref[kh:kh + h2, kw:kw + w2, :].reshape(h2 * w2, C1)
            acc2 = acc2 + jnp.dot(patch.astype(bf16), w2_ref[kh * 3 + kw],
                                  preferred_element_type=f32)
    a2 = jnp.maximum(acc2 + b2_ref[...], 0.0)            # (h2*w2, C2), f32
    act2_ref[...] = a2.reshape(h2, w2, C2)

    # ---------------- maxpool 2x2 (stride 2) ----------------
    we2 = jnp.maximum(act2_ref[:, pl.ds(0, w4, stride=2), :],
                      act2_ref[:, pl.ds(1, w4, stride=2), :])    # (h2, w4, C2)
    we2 = we2.reshape(h4, 2, w4, C2)
    p2 = jnp.maximum(we2[:, 0], we2[:, 1])                       # (h4, w4, C2)

    # ---------------- flatten + dense + softmax ----------------
    # dense(flatten(x)) == sum over spatial positions of per-position matmuls,
    # so no in-kernel flatten/relayout is needed. wd is pre-permuted in the
    # wrapper to (h4*w4, C2, n_classes), matching torch's CHW flatten order.
    logits = bd_ref[...].astype(f32)                             # (1, n_classes)
    for p in range(h4 * w4):
        hh, ww = p // w4, p % w4
        vec = p2[hh:hh + 1, ww, :].astype(bf16)                  # (1, C2)
        logits = logits + jnp.dot(vec, wd_ref[p],
                                  preferred_element_type=f32)

    m = jnp.max(logits, axis=-1, keepdims=True)
    e = jnp.exp(logits - m)
    probs = e / jnp.sum(e, axis=-1, keepdims=True)
    o_ref[...] = probs.reshape(1, 1, n_classes)


# ----------------------------------------------------------------------------
# Wrapper: layout conversion + single pallas_call.
# ----------------------------------------------------------------------------
def conv2layers_forward(params, x_nchw):
    x = jnp.transpose(x_nchw, (0, 2, 3, 1)).astype(jnp.float32)  # NCHW -> NHWC
    n, h, w, _ = x.shape
    assert h % 4 == 0 and w % 4 == 0
    h4, w4 = h // 4, w // 4
    n_classes = params["dense_b"].shape[0]

    # PyTorch layouts -> kernel layouts.
    w1 = jnp.transpose(params["conv1_w"], (2, 3, 1, 0)).reshape(9, C_IN, C1)
    w2 = jnp.transpose(params["conv2_w"], (2, 3, 1, 0)).reshape(9, C1, C2)
    b1 = params["conv1_b"].reshape(1, C1).astype(jnp.float32)
    b2 = params["conv2_b"].reshape(1, C2).astype(jnp.float32)
    # torch.flatten(start_dim=1) on NCHW orders features as (c, h, w); permute
    # the dense weight so the kernel's (h, w, c) traversal is equivalent.
    wd = params["dense_w"].reshape(n_classes, C2, h4, w4)
    wd = jnp.transpose(wd, (2, 3, 1, 0)).reshape(h4 * w4, C2, n_classes)
    bd = params["dense_b"].reshape(1, n_classes).astype(jnp.float32)

    # bf16 weights for the MXU; accumulation stays f32.
    w1 = w1.astype(jnp.bfloat16)
    w2 = w2.astype(jnp.bfloat16)
    wd = wd.astype(jnp.bfloat16)

    kernel = functools.partial(_conv2layers_kernel, h=h, w=w,
                               n_classes=n_classes)
    out = pl.pallas_call(
        kernel,
        out_shape=jax.ShapeDtypeStruct((n, 1, n_classes), jnp.float32),
        grid=(n,),
        in_specs=[
            pl.BlockSpec((1, h, w, C_IN), lambda b: (b, 0, 0, 0)),   # image
            pl.BlockSpec((9, C_IN, C1), lambda b: (0, 0, 0)),        # conv1 w
            pl.BlockSpec((1, C1), lambda b: (0, 0)),                 # conv1 b
            pl.BlockSpec((9, C1, C2), lambda b: (0, 0, 0)),          # conv2 w
            pl.BlockSpec((1, C2), lambda b: (0, 0)),                 # conv2 b
            pl.BlockSpec((h4 * w4, C2, n_classes), lambda b: (0, 0, 0)),
            pl.BlockSpec((1, n_classes), lambda b: (0, 0)),          # dense b
        ],
        out_specs=pl.BlockSpec((1, 1, n_classes), lambda b: (b, 0, 0)),
        scratch_shapes=[
            pltpu.VMEM((h + 2, w + 2, C_IN), jnp.float32),   # padded input
            pltpu.VMEM((h, w, C1), jnp.float32),             # conv1 activation
            pltpu.VMEM((h // 2 + 2, w // 2 + 2, C1), jnp.float32),  # padded p1
            pltpu.VMEM((h // 2, w // 2, C2), jnp.float32),   # conv2 activation
        ],
        compiler_params=pltpu.CompilerParams(
            dimension_semantics=("parallel",)),   # batch across TCs on v7x
    )(x, w1, b1, w2, b2, wd, bd)
    return out.reshape(n, n_classes)


# ----------------------------------------------------------------------------
# Parameters (deterministic, PyTorch-style uniform init, torch layouts).
# ----------------------------------------------------------------------------
def init_params(key, n_classes, image_size):
    h, w = image_size
    in_features = (h // 4) * (w // 4) * C2
    ks = jax.random.split(key, 6)

    def u(k, shape, fan_in):
        bound = 1.0 / jnp.sqrt(float(fan_in))
        return jax.random.uniform(k, shape, jnp.float32, -bound, bound)

    return {
        "conv1_w": u(ks[0], (C1, C_IN, 3, 3), C_IN * 9),
        "conv1_b": u(ks[1], (C1,), C_IN * 9),
        "conv2_w": u(ks[2], (C2, C1, 3, 3), C1 * 9),
        "conv2_b": u(ks[3], (C2,), C1 * 9),
        "dense_w": u(ks[4], (n_classes, in_features), in_features),
        "dense_b": u(ks[5], (n_classes,), in_features),
    }


# Pure-JAX reference (mirrors the PyTorch module), for validation only.
def _reference_forward(params, x_nchw):
    y = jax.lax.conv_general_dilated(
        x_nchw, params["conv1_w"], (1, 1), "SAME",
        dimension_numbers=("NCHW", "OIHW", "NCHW"))
    y = jax.nn.relu(y + params["conv1_b"][None, :, None, None])
    y = jax.lax.reduce_window(y, -jnp.inf, jax.lax.max,
                              (1, 1, 2, 2), (1, 1, 2, 2), "VALID")
    y = jax.lax.conv_general_dilated(
        y, params["conv2_w"], (1, 1), "SAME",
        dimension_numbers=("NCHW", "OIHW", "NCHW"))
    y = jax.nn.relu(y + params["conv2_b"][None, :, None, None])
    y = jax.lax.reduce_window(y, -jnp.inf, jax.lax.max,
                              (1, 1, 2, 2), (1, 1, 2, 2), "VALID")
    y = y.reshape(y.shape[0], -1)                       # torch CHW flatten
    y = y @ params["dense_w"].T + params["dense_b"]
    return jax.nn.softmax(y, axis=1)


# ----------------------------------------------------------------------------
if __name__ == "__main__":
    key = jax.random.PRNGKey(0)
    k_param, k_x = jax.random.split(key)

    N_CLASSES = 4
    IMAGE_SIZE = (16, 16)
    params = init_params(k_param, N_CLASSES, IMAGE_SIZE)

    # batch=2, 3 input channels, 16x16 spatial (consistent with the module)
    x = jax.random.normal(k_x, (2, 3, *IMAGE_SIZE), dtype=jnp.float32)

    fwd = jax.jit(functools.partial(conv2layers_forward, params))
    out = fwd(x)
    jax.block_until_ready(out)

    assert out.shape == (2, N_CLASSES), out.shape
    assert bool(jnp.all(jnp.isfinite(out)))
    # Softmax rows sum to 1.
    assert bool(jnp.allclose(out.sum(axis=1), 1.0, atol=1e-5))
    # Matches the plain-JAX reference (loose tol: bf16 MXU operands).
    ref = _reference_forward(params, x)
    assert bool(jnp.allclose(out, ref, atol=5e-2)), \
        float(jnp.max(jnp.abs(out - ref)))

    print("KERNEL_OK")
</pallas_src>

<mosaic_0001>
module attributes {stable_mosaic.version = 11 : i64} {
  func.func @_conv2layers_kernel(%arg0: i32, %arg1: memref<1x16x16x3xf32, #tpu.memory_space<vmem>>, %arg2: memref<9x3x8xbf16, #tpu.memory_space<vmem>>, %arg3: memref<1x8xf32, #tpu.memory_space<vmem>>, %arg4: memref<9x8x16xbf16, #tpu.memory_space<vmem>>, %arg5: memref<1x16xf32, #tpu.memory_space<vmem>>, %arg6: memref<16x16x4xbf16, #tpu.memory_space<vmem>>, %arg7: memref<1x4xf32, #tpu.memory_space<vmem>>, %arg8: memref<1x1x4xf32, #tpu.memory_space<vmem>>, %arg9: memref<18x18x3xf32, #tpu.memory_space<vmem>>, %arg10: memref<16x16x8xf32, #tpu.memory_space<vmem>>, %arg11: memref<10x10x8xf32, #tpu.memory_space<vmem>>, %arg12: memref<8x8x16xf32, #tpu.memory_space<vmem>>) attributes {dimension_semantics = [#tpu.dimension_semantics<parallel>], iteration_bounds = array<i64: 2>, scalar_prefetch = 0 : i64, scratch_operands = 4 : i64, tpu.core_type = #tpu.core_type<tc>, window_params = [{transform_indices = @transform_0, window_bounds = array<i64: 1, 16, 16, 3>}, {pipeline_mode = #tpu.pipeline_mode<synchronous>, transform_indices = @transform_1, window_bounds = array<i64: 9, 3, 8>}, {pipeline_mode = #tpu.pipeline_mode<synchronous>, transform_indices = @transform_2, window_bounds = array<i64: 1, 8>}, {pipeline_mode = #tpu.pipeline_mode<synchronous>, transform_indices = @transform_3, window_bounds = array<i64: 9, 8, 16>}, {pipeline_mode = #tpu.pipeline_mode<synchronous>, transform_indices = @transform_4, window_bounds = array<i64: 1, 16>}, {pipeline_mode = #tpu.pipeline_mode<synchronous>, transform_indices = @transform_5, window_bounds = array<i64: 16, 16, 4>}, {pipeline_mode = #tpu.pipeline_mode<synchronous>, transform_indices = @transform_6, window_bounds = array<i64: 1, 4>}, {transform_indices = @transform_7, window_bounds = array<i64: 1, 1, 4>}]} {
    %cst = arith.constant 0.000000e+00 : f32
    %0 = vector.broadcast %cst : f32 to vector<18x18x3xf32>
    %c0 = arith.constant 0 : index
    %c0_0 = arith.constant 0 : index
    %c0_1 = arith.constant 0 : index
    %1 = vector.load %arg9[%c0, %c0_0, %c0_1] : memref<18x18x3xf32, #tpu.memory_space<vmem>>, vector<18x18x3xf32>
    tpu.vector_store %arg9[%c0, %c0_0, %c0_1], %0 {strides = array<i32>} : memref<18x18x3xf32, #tpu.memory_space<vmem>>, vector<18x18x3xf32>,
    %c0_2 = arith.constant 0 : index
    %c0_3 = arith.constant 0 : index
    %c0_4 = arith.constant 0 : index
    %c0_5 = arith.constant 0 : index
    %2 = vector.load %arg1[%c0_2, %c0_3, %c0_4, %c0_5] : memref<1x16x16x3xf32, #tpu.memory_space<vmem>>, vector<1x16x16x3xf32>
    %3 = vector.shape_cast %2 : vector<1x16x16x3xf32> to vector<16x16x3xf32>
    %c1 = arith.constant 1 : index
    %c1_6 = arith.constant 1 : index
    %c0_7 = arith.constant 0 : index
    %4 = vector.load %arg9[%c1, %c1_6, %c0_7] : memref<18x18x3xf32, #tpu.memory_space<vmem>>, vector<16x16x3xf32>
    tpu.vector_store %arg9[%c1, %c1_6, %c0_7], %3 {strides = array<i32>} : memref<18x18x3xf32, #tpu.memory_space<vmem>>, vector<16x16x3xf32>,
    %cst_8 = arith.constant 0.000000e+00 : f32
    %5 = vector.broadcast %cst_8 : f32 to vector<256x8xf32>
    %c0_9 = arith.constant 0 : index
    %c0_10 = arith.constant 0 : index
    %c0_11 = arith.constant 0 : index
    %6 = vector.load %arg9[%c0_9, %c0_10, %c0_11] : memref<18x18x3xf32, #tpu.memory_space<vmem>>, vector<16x16x3xf32>
    %7 = vector.shape_cast %6 : vector<16x16x3xf32> to vector<256x3xf32>
    %8 = arith.truncf %7 : vector<256x3xf32> to vector<256x3xbf16>
    %c0_12 = arith.constant 0 : index
    %c0_13 = arith.constant 0 : index
    %c0_14 = arith.constant 0 : index
    %9 = vector.load %arg2[%c0_12, %c0_13, %c0_14] : memref<9x3x8xbf16, #tpu.memory_space<vmem>>, vector<1x3x8xbf16>
    %10 = vector.shape_cast %9 : vector<1x3x8xbf16> to vector<3x8xbf16>
    %cst_15 = arith.constant dense<0.000000e+00> : vector<256x8xf32>
    %11 = tpu.matmul %8, %10, %cst_15 {dimension_numbers = #tpu.dot_dimension_numbers<[1], [0], [0], [1], [0, 0, 1, 1], [], []>} : vector<256x3xbf16>, vector<3x8xbf16>, vector<256x8xf32> -> vector<256x8xf32>
    %12 = arith.addf %5, %11 : vector<256x8xf32>
    %c0_16 = arith.constant 0 : index
    %c1_17 = arith.constant 1 : index
    %c0_18 = arith.constant 0 : index
    %13 = vector.load %arg9[%c0_16, %c1_17, %c0_18] : memref<18x18x3xf32, #tpu.memory_space<vmem>>, vector<16x16x3xf32>
    %14 = vector.shape_cast %13 : vector<16x16x3xf32> to vector<256x3xf32>
    %15 = arith.truncf %14 : vector<256x3xf32> to vector<256x3xbf16>
    %c1_19 = arith.constant 1 : index
    %c0_20 = arith.constant 0 : index
    %c0_21 = arith.constant 0 : index
    %16 = vector.load %arg2[%c1_19, %c0_20, %c0_21] : memref<9x3x8xbf16, #tpu.memory_space<vmem>>, vector<1x3x8xbf16>
    %17 = vector.shape_cast %16 : vector<1x3x8xbf16> to vector<3x8xbf16>
    %cst_22 = arith.constant dense<0.000000e+00> : vector<256x8xf32>
    %18 = tpu.matmul %15, %17, %cst_22 {dimension_numbers = #tpu.dot_dimension_numbers<[1], [0], [0], [1], [0, 0, 1, 1], [], []>} : vector<256x3xbf16>, vector<3x8xbf16>, vector<256x8xf32> -> vector<256x8xf32>
    %19 = arith.addf %12, %18 : vector<256x8xf32>
    %c0_23 = arith.constant 0 : index
    %c2 = arith.constant 2 : index
    %c0_24 = arith.constant 0 : index
    %20 = vector.load %arg9[%c0_23, %c2, %c0_24] : memref<18x18x3xf32, #tpu.memory_space<vmem>>, vector<16x16x3xf32>
    %21 = vector.shape_cast %20 : vector<16x16x3xf32> to vector<256x3xf32>
    %22 = arith.truncf %21 : vector<256x3xf32> to vector<256x3xbf16>
    %c2_25 = arith.constant 2 : index
    %c0_26 = arith.constant 0 : index
    %c0_27 = arith.constant 0 : index
    %23 = vector.load %arg2[%c2_25, %c0_26, %c0_27] : memref<9x3x8xbf16, #tpu.memory_space<vmem>>, vector<1x3x8xbf16>
    %24 = vector.shape_cast %23 : vector<1x3x8xbf16> to vector<3x8xbf16>
    %cst_28 = arith.constant dense<0.000000e+00> : vector<256x8xf32>
    %25 = tpu.matmul %22, %24, %cst_28 {dimension_numbers = #tpu.dot_dimension_numbers<[1], [0], [0], [1], [0, 0, 1, 1], [], []>} : vector<256x3xbf16>, vector<3x8xbf16>, vector<256x8xf32> -> vector<256x8xf32>
    %26 = arith.addf %19, %25 : vector<256x8xf32>
    %c1_29 = arith.constant 1 : index
    %c0_30 = arith.constant 0 : index
    %c0_31 = arith.constant 0 : index
    %27 = vector.load %arg9[%c1_29, %c0_30, %c0_31] : memref<18x18x3xf32, #tpu.memory_space<vmem>>, vector<16x16x3xf32>
    %28 = vector.shape_cast %27 : vector<16x16x3xf32> to vector<256x3xf32>
    %29 = arith.truncf %28 : vector<256x3xf32> to vector<256x3xbf16>
    %c3 = arith.constant 3 : index
    %c0_32 = arith.constant 0 : index
    %c0_33 = arith.constant 0 : index
    %30 = vector.load %arg2[%c3, %c0_32, %c0_33] : memref<9x3x8xbf16, #tpu.memory_space<vmem>>, vector<1x3x8xbf16>
    %31 = vector.shape_cast %30 : vector<1x3x8xbf16> to vector<3x8xbf16>
    %cst_34 = arith.constant dense<0.000000e+00> : vector<256x8xf32>
    %32 = tpu.matmul %29, %31, %cst_34 {dimension_numbers = #tpu.dot_dimension_numbers<[1], [0], [0], [1], [0, 0, 1, 1], [], []>} : vector<256x3xbf16>, vector<3x8xbf16>, vector<256x8xf32> -> vector<256x8xf32>
    %33 = arith.addf %26, %32 : vector<256x8xf32>
    %c1_35 = arith.constant 1 : index
    %c1_36 = arith.constant 1 : index
    %c0_37 = arith.constant 0 : index
    %34 = vector.load %arg9[%c1_35, %c1_36, %c0_37] : memref<18x18x3xf32, #tpu.memory_space<vmem>>, vector<16x16x3xf32>
    %35 = vector.shape_cast %34 : vector<16x16x3xf32> to vector<256x3xf32>
    %36 = arith.truncf %35 : vector<256x3xf32> to vector<256x3xbf16>
    %c4 = arith.constant 4 : index
    %c0_38 = arith.constant 0 : index
    %c0_39 = arith.constant 0 : index
    %37 = vector.load %arg2[%c4, %c0_38, %c0_39] : memref<9x3x8xbf16, #tpu.memory_space<vmem>>, vector<1x3x8xbf16>
    %38 = vector.shape_cast %37 : vector<1x3x8xbf16> to vector<3x8xbf16>
    %cst_40 = arith.constant dense<0.000000e+00> : vector<256x8xf32>
    %39 = tpu.matmul %36, %38, %cst_40 {dimension_numbers = #tpu.dot_dimension_numbers<[1], [0], [0], [1], [0, 0, 1, 1], [], []>} : vector<256x3xbf16>, vector<3x8xbf16>, vector<256x8xf32> -> vector<256x8xf32>
    %40 = arith.addf %33, %39 : vector<256x8xf32>
    %c1_41 = arith.constant 1 : index
    %c2_42 = arith.constant 2 : index
    %c0_43 = arith.constant 0 : index
    %41 = vector.load %arg9[%c1_41, %c2_42, %c0_43] : memref<18x18x3xf32, #tpu.memory_space<vmem>>, vector<16x16x3xf32>
    %42 = vector.shape_cast %41 : vector<16x16x3xf32> to vector<256x3xf32>
    %43 = arith.truncf %42 : vector<256x3xf32> to vector<256x3xbf16>
    %c5 = arith.constant 5 : index
    %c0_44 = arith.constant 0 : index
    %c0_45 = arith.constant 0 : index
    %44 = vector.load %arg2[%c5, %c0_44, %c0_45] : memref<9x3x8xbf16, #tpu.memory_space<vmem>>, vector<1x3x8xbf16>
    %45 = vector.shape_cast %44 : vector<1x3x8xbf16> to vector<3x8xbf16>
    %cst_46 = arith.constant dense<0.000000e+00> : vector<256x8xf32>
    %46 = tpu.matmul %43, %45, %cst_46 {dimension_numbers = #tpu.dot_dimension_numbers<[1], [0], [0], [1], [0, 0, 1, 1], [], []>} : vector<256x3xbf16>, vector<3x8xbf16>, vector<256x8xf32> -> vector<256x8xf32>
    %47 = arith.addf %40, %46 : vector<256x8xf32>
    %c2_47 = arith.constant 2 : index
    %c0_48 = arith.constant 0 : index
    %c0_49 = arith.constant 0 : index
    %48 = vector.load %arg9[%c2_47, %c0_48, %c0_49] : memref<18x18x3xf32, #tpu.memory_space<vmem>>, vector<16x16x3xf32>
    %49 = vector.shape_cast %48 : vector<16x16x3xf32> to vector<256x3xf32>
    %50 = arith.truncf %49 : vector<256x3xf32> to vector<256x3xbf16>
    %c6 = arith.constant 6 : index
    %c0_50 = arith.constant 0 : index
    %c0_51 = arith.constant 0 : index
    %51 = vector.load %arg2[%c6, %c0_50, %c0_51] : memref<9x3x8xbf16, #tpu.memory_space<vmem>>, vector<1x3x8xbf16>
    %52 = vector.shape_cast %51 : vector<1x3x8xbf16> to vector<3x8xbf16>
    %cst_52 = arith.constant dense<0.000000e+00> : vector<256x8xf32>
    %53 = tpu.matmul %50, %52, %cst_52 {dimension_numbers = #tpu.dot_dimension_numbers<[1], [0], [0], [1], [0, 0, 1, 1], [], []>} : vector<256x3xbf16>, vector<3x8xbf16>, vector<256x8xf32> -> vector<256x8xf32>
    %54 = arith.addf %47, %53 : vector<256x8xf32>
    %c2_53 = arith.constant 2 : index
    %c1_54 = arith.constant 1 : index
    %c0_55 = arith.constant 0 : index
    %55 = vector.load %arg9[%c2_53, %c1_54, %c0_55] : memref<18x18x3xf32, #tpu.memory_space<vmem>>, vector<16x16x3xf32>
    %56 = vector.shape_cast %55 : vector<16x16x3xf32> to vector<256x3xf32>
    %57 = arith.truncf %56 : vector<256x3xf32> to vector<256x3xbf16>
    %c7 = arith.constant 7 : index
    %c0_56 = arith.constant 0 : index
    %c0_57 = arith.constant 0 : index
    %58 = vector.load %arg2[%c7, %c0_56, %c0_57] : memref<9x3x8xbf16, #tpu.memory_space<vmem>>, vector<1x3x8xbf16>
    %59 = vector.shape_cast %58 : vector<1x3x8xbf16> to vector<3x8xbf16>
    %cst_58 = arith.constant dense<0.000000e+00> : vector<256x8xf32>
    %60 = tpu.matmul %57, %59, %cst_58 {dimension_numbers = #tpu.dot_dimension_numbers<[1], [0], [0], [1], [0, 0, 1, 1], [], []>} : vector<256x3xbf16>, vector<3x8xbf16>, vector<256x8xf32> -> vector<256x8xf32>
    %61 = arith.addf %54, %60 : vector<256x8xf32>
    %c2_59 = arith.constant 2 : index
    %c2_60 = arith.constant 2 : index
    %c0_61 = arith.constant 0 : index
    %62 = vector.load %arg9[%c2_59, %c2_60, %c0_61] : memref<18x18x3xf32, #tpu.memory_space<vmem>>, vector<16x16x3xf32>
    %63 = vector.shape_cast %62 : vector<16x16x3xf32> to vector<256x3xf32>
    %64 = arith.truncf %63 : vector<256x3xf32> to vector<256x3xbf16>
    %c8 = arith.constant 8 : index
    %c0_62 = arith.constant 0 : index
    %c0_63 = arith.constant 0 : index
    %65 = vector.load %arg2[%c8, %c0_62, %c0_63] : memref<9x3x8xbf16, #tpu.memory_space<vmem>>, vector<1x3x8xbf16>
    %66 = vector.shape_cast %65 : vector<1x3x8xbf16> to vector<3x8xbf16>
    %cst_64 = arith.constant dense<0.000000e+00> : vector<256x8xf32>
    %67 = tpu.matmul %64, %66, %cst_64 {dimension_numbers = #tpu.dot_dimension_numbers<[1], [0], [0], [1], [0, 0, 1, 1], [], []>} : vector<256x3xbf16>, vector<3x8xbf16>, vector<256x8xf32> -> vector<256x8xf32>
    %68 = arith.addf %61, %67 : vector<256x8xf32>
    %c0_65 = arith.constant 0 : index
    %c0_66 = arith.constant 0 : index
    %69 = vector.load %arg3[%c0_65, %c0_66] : memref<1x8xf32, #tpu.memory_space<vmem>>, vector<1x8xf32>
    %70 = vector.broadcast %69 : vector<1x8xf32> to vector<256x8xf32>
    %71 = arith.addf %68, %70 : vector<256x8xf32>
    %cst_67 = arith.constant 0.000000e+00 : f32
    %72 = vector.broadcast %cst_67 : f32 to vector<256x8xf32>
    %73 = arith.maximumf %71, %72 : vector<256x8xf32>
    %74 = vector.shape_cast %73 : vector<256x8xf32> to vector<16x16x8xf32>
    %c0_68 = arith.constant 0 : index
    %c0_69 = arith.constant 0 : index
    %c0_70 = arith.constant 0 : index
    %75 = vector.load %arg10[%c0_68, %c0_69, %c0_70] : memref<16x16x8xf32, #tpu.memory_space<vmem>>, vector<16x16x8xf32>
    tpu.vector_store %arg10[%c0_68, %c0_69, %c0_70], %74 {strides = array<i32>} : memref<16x16x8xf32, #tpu.memory_space<vmem>>, vector<16x16x8xf32>,
    %c0_71 = arith.constant 0 : index
    %c0_72 = arith.constant 0 : index
    %c0_73 = arith.constant 0 : index
    %76 = tpu.strided_load %arg10[%c0_71, %c0_72, %c0_73] {strides = array<i32: 1, 2, 1>} : memref<16x16x8xf32, #tpu.memory_space<vmem>>, vector<16x8x8xf32>
    %c0_74 = arith.constant 0 : index
    %c1_75 = arith.constant 1 : index
    %c0_76 = arith.constant 0 : index
    %77 = tpu.strided_load %arg10[%c0_74, %c1_75, %c0_76] {strides = array<i32: 1, 2, 1>} : memref<16x16x8xf32, #tpu.memory_space<vmem>>, vector<16x8x8xf32>
    %78 = arith.maximumf %76, %77 : vector<16x8x8xf32>
    %79 = vector.shape_cast %78 : vector<16x8x8xf32> to vector<8x2x8x8xf32>
    %80 = vector.extract_strided_slice %79 {offsets = [0, 0, 0, 0], sizes = [8, 1, 8, 8], strides = [1, 1, 1, 1]} : vector<8x2x8x8xf32> to vector<8x1x8x8xf32>
    %81 = vector.shape_cast %80 : vector<8x1x8x8xf32> to vector<8x8x8xf32>
    %82 = vector.extract_strided_slice %79 {offsets = [0, 1, 0, 0], sizes = [8, 1, 8, 8], strides = [1, 1, 1, 1]} : vector<8x2x8x8xf32> to vector<8x1x8x8xf32>
    %83 = vector.shape_cast %82 : vector<8x1x8x8xf32> to vector<8x8x8xf32>
    %84 = arith.maximumf %81, %83 : vector<8x8x8xf32>
    %cst_77 = arith.constant 0.000000e+00 : f32
    %85 = vector.broadcast %cst_77 : f32 to vector<10x10x8xf32>
    %c0_78 = arith.constant 0 : index
    %c0_79 = arith.constant 0 : index
    %c0_80 = arith.constant 0 : index
    %86 = vector.load %arg11[%c0_78, %c0_79, %c0_80] : memref<10x10x8xf32, #tpu.memory_space<vmem>>, vector<10x10x8xf32>
    tpu.vector_store %arg11[%c0_78, %c0_79, %c0_80], %85 {strides = array<i32>} : memref<10x10x8xf32, #tpu.memory_space<vmem>>, vector<10x10x8xf32>,
    %c1_81 = arith.constant 1 : index
    %c1_82 = arith.constant 1 : index
    %c0_83 = arith.constant 0 : index
    %87 = vector.load %arg11[%c1_81, %c1_82, %c0_83] : memref<10x10x8xf32, #tpu.memory_space<vmem>>, vector<8x8x8xf32>
    tpu.vector_store %arg11[%c1_81, %c1_82, %c0_83], %84 {strides = array<i32>} : memref<10x10x8xf32, #tpu.memory_space<vmem>>, vector<8x8x8xf32>,
    %cst_84 = arith.constant 0.000000e+00 : f32
    %88 = vector.broadcast %cst_84 : f32 to vector<64x16xf32>
    %c0_85 = arith.constant 0 : index
    %c0_86 = arith.constant 0 : index
    %c0_87 = arith.constant 0 : index
    %89 = vector.load %arg11[%c0_85, %c0_86, %c0_87] : memref<10x10x8xf32, #tpu.memory_space<vmem>>, vector<8x8x8xf32>
    %90 = vector.shape_cast %89 : vector<8x8x8xf32> to vector<64x8xf32>
    %91 = arith.truncf %90 : vector<64x8xf32> to vector<64x8xbf16>
    %c0_88 = arith.constant 0 : index
    %c0_89 = arith.constant 0 : index
    %c0_90 = arith.constant 0 : index
    %92 = vector.load %arg4[%c0_88, %c0_89, %c0_90] : memref<9x8x16xbf16, #tpu.memory_space<vmem>>, vector<1x8x16xbf16>
    %93 = vector.shape_cast %92 : vector<1x8x16xbf16> to vector<8x16xbf16>
    %cst_91 = arith.constant dense<0.000000e+00> : vector<64x16xf32>
    %94 = tpu.matmul %91, %93, %cst_91 {dimension_numbers = #tpu.dot_dimension_numbers<[1], [0], [0], [1], [0, 0, 1, 1], [], []>} : vector<64x8xbf16>, vector<8x16xbf16>, vector<64x16xf32> -> vector<64x16xf32>
    %95 = arith.addf %88, %94 : vector<64x16xf32>
    %c0_92 = arith.constant 0 : index
    %c1_93 = arith.constant 1 : index
    %c0_94 = arith.constant 0 : index
    %96 = vector.load %arg11[%c0_92, %c1_93, %c0_94] : memref<10x10x8xf32, #tpu.memory_space<vmem>>, vector<8x8x8xf32>
    %97 = vector.shape_cast %96 : vector<8x8x8xf32> to vector<64x8xf32>
    %98 = arith.truncf %97 : vector<64x8xf32> to vector<64x8xbf16>
    %c1_95 = arith.constant 1 : index
    %c0_96 = arith.constant 0 : index
    %c0_97 = arith.constant 0 : index
    %99 = vector.load %arg4[%c1_95, %c0_96, %c0_97] : memref<9x8x16xbf16, #tpu.memory_space<vmem>>, vector<1x8x16xbf16>
    %100 = vector.shape_cast %99 : vector<1x8x16xbf16> to vector<8x16xbf16>
    %cst_98 = arith.constant dense<0.000000e+00> : vector<64x16xf32>
    %101 = tpu.matmul %98, %100, %cst_98 {dimension_numbers = #tpu.dot_dimension_numbers<[1], [0], [0], [1], [0, 0, 1, 1], [], []>} : vector<64x8xbf16>, vector<8x16xbf16>, vector<64x16xf32> -> vector<64x16xf32>
    %102 = arith.addf %95, %101 : vector<64x16xf32>
    %c0_99 = arith.constant 0 : index
    %c2_100 = arith.constant 2 : index
    %c0_101 = arith.constant 0 : index
    %103 = vector.load %arg11[%c0_99, %c2_100, %c0_101] : memref<10x10x8xf32, #tpu.memory_space<vmem>>, vector<8x8x8xf32>
    %104 = vector.shape_cast %103 : vector<8x8x8xf32> to vector<64x8xf32>
    %105 = arith.truncf %104 : vector<64x8xf32> to vector<64x8xbf16>
    %c2_102 = arith.constant 2 : index
    %c0_103 = arith.constant 0 : index
    %c0_104 = arith.constant 0 : index
    %106 = vector.load %arg4[%c2_102, %c0_103, %c0_104] : memref<9x8x16xbf16, #tpu.memory_space<vmem>>, vector<1x8x16xbf16>
    %107 = vector.shape_cast %106 : vector<1x8x16xbf16> to vector<8x16xbf16>
    %cst_105 = arith.constant dense<0.000000e+00> : vector<64x16xf32>
    %108 = tpu.matmul %105, %107, %cst_105 {dimension_numbers = #tpu.dot_dimension_numbers<[1], [0], [0], [1], [0, 0, 1, 1], [], []>} : vector<64x8xbf16>, vector<8x16xbf16>, vector<64x16xf32> -> vector<64x16xf32>
    %109 = arith.addf %102, %108 : vector<64x16xf32>
    %c1_106 = arith.constant 1 : index
    %c0_107 = arith.constant 0 : index
    %c0_108 = arith.constant 0 : index
    %110 = vector.load %arg11[%c1_106, %c0_107, %c0_108] : memref<10x10x8xf32, #tpu.memory_space<vmem>>, vector<8x8x8xf32>
    %111 = vector.shape_cast %110 : vector<8x8x8xf32> to vector<64x8xf32>
    %112 = arith.truncf %111 : vector<64x8xf32> to vector<64x8xbf16>
    %c3_109 = arith.constant 3 : index
    %c0_110 = arith.constant 0 : index
    %c0_111 = arith.constant 0 : index
    %113 = vector.load %arg4[%c3_109, %c0_110, %c0_111] : memref<9x8x16xbf16, #tpu.memory_space<vmem>>, vector<1x8x16xbf16>
    %114 = vector.shape_cast %113 : vector<1x8x16xbf16> to vector<8x16xbf16>
    %cst_112 = arith.constant dense<0.000000e+00> : vector<64x16xf32>
    %115 = tpu.matmul %112, %114, %cst_112 {dimension_numbers = #tpu.dot_dimension_numbers<[1], [0], [0], [1], [0, 0, 1, 1], [], []>} : vector<64x8xbf16>, vector<8x16xbf16>, vector<64x16xf32> -> vector<64x16xf32>
    %116 = arith.addf %109, %115 : vector<64x16xf32>
    %c1_113 = arith.constant 1 : index
    %c1_114 = arith.constant 1 : index
    %c0_115 = arith.constant 0 : index
    %117 = vector.load %arg11[%c1_113, %c1_114, %c0_115] : memref<10x10x8xf32, #tpu.memory_space<vmem>>, vector<8x8x8xf32>
    %118 = vector.shape_cast %117 : vector<8x8x8xf32> to vector<64x8xf32>
    %119 = arith.truncf %118 : vector<64x8xf32> to vector<64x8xbf16>
    %c4_116 = arith.constant 4 : index
    %c0_117 = arith.constant 0 : index
    %c0_118 = arith.constant 0 : index
    %120 = vector.load %arg4[%c4_116, %c0_117, %c0_118] : memref<9x8x16xbf16, #tpu.memory_space<vmem>>, vector<1x8x16xbf16>
    %121 = vector.shape_cast %120 : vector<1x8x16xbf16> to vector<8x16xbf16>
    %cst_119 = arith.constant dense<0.000000e+00> : vector<64x16xf32>
    %122 = tpu.matmul %119, %121, %cst_119 {dimension_numbers = #tpu.dot_dimension_numbers<[1], [0], [0], [1], [0, 0, 1, 1], [], []>} : vector<64x8xbf16>, vector<8x16xbf16>, vector<64x16xf32> -> vector<64x16xf32>
    %123 = arith.addf %116, %122 : vector<64x16xf32>
    %c1_120 = arith.constant 1 : index
    %c2_121 = arith.constant 2 : index
    %c0_122 = arith.constant 0 : index
    %124 = vector.load %arg11[%c1_120, %c2_121, %c0_122] : memref<10x10x8xf32, #tpu.memory_space<vmem>>, vector<8x8x8xf32>
    %125 = vector.shape_cast %124 : vector<8x8x8xf32> to vector<64x8xf32>
    %126 = arith.truncf %125 : vector<64x8xf32> to vector<64x8xbf16>
    %c5_123 = arith.constant 5 : index
    %c0_124 = arith.constant 0 : index
    %c0_125 = arith.constant 0 : index
    %127 = vector.load %arg4[%c5_123, %c0_124, %c0_125] : memref<9x8x16xbf16, #tpu.memory_space<vmem>>, vector<1x8x16xbf16>
    %128 = vector.shape_cast %127 : vector<1x8x16xbf16> to vector<8x16xbf16>
    %cst_126 = arith.constant dense<0.000000e+00> : vector<64x16xf32>
    %129 = tpu.matmul %126, %128, %cst_126 {dimension_numbers = #tpu.dot_dimension_numbers<[1], [0], [0], [1], [0, 0, 1, 1], [], []>} : vector<64x8xbf16>, vector<8x16xbf16>, vector<64x16xf32> -> vector<64x16xf32>
    %130 = arith.addf %123, %129 : vector<64x16xf32>
    %c2_127 = arith.constant 2 : index
    %c0_128 = arith.constant 0 : index
    %c0_129 = arith.constant 0 : index
    %131 = vector.load %arg11[%c2_127, %c0_128, %c0_129] : memref<10x10x8xf32, #tpu.memory_space<vmem>>, vector<8x8x8xf32>
    %132 = vector.shape_cast %131 : vector<8x8x8xf32> to vector<64x8xf32>
    %133 = arith.truncf %132 : vector<64x8xf32> to vector<64x8xbf16>
    %c6_130 = arith.constant 6 : index
    %c0_131 = arith.constant 0 : index
    %c0_132 = arith.constant 0 : index
    %134 = vector.load %arg4[%c6_130, %c0_131, %c0_132] : memref<9x8x16xbf16, #tpu.memory_space<vmem>>, vector<1x8x16xbf16>
    %135 = vector.shape_cast %134 : vector<1x8x16xbf16> to vector<8x16xbf16>
    %cst_133 = arith.constant dense<0.000000e+00> : vector<64x16xf32>
    %136 = tpu.matmul %133, %135, %cst_133 {dimension_numbers = #tpu.dot_dimension_numbers<[1], [0], [0], [1], [0, 0, 1, 1], [], []>} : vector<64x8xbf16>, vector<8x16xbf16>, vector<64x16xf32> -> vector<64x16xf32>
    %137 = arith.addf %130, %136 : vector<64x16xf32>
    %c2_134 = arith.constant 2 : index
    %c1_135 = arith.constant 1 : index
    %c0_136 = arith.constant 0 : index
    %138 = vector.load %arg11[%c2_134, %c1_135, %c0_136] : memref<10x10x8xf32, #tpu.memory_space<vmem>>, vector<8x8x8xf32>
    %139 = vector.shape_cast %138 : vector<8x8x8xf32> to vector<64x8xf32>
    %140 = arith.truncf %139 : vector<64x8xf32> to vector<64x8xbf16>
    %c7_137 = arith.constant 7 : index
    %c0_138 = arith.constant 0 : index
    %c0_139 = arith.constant 0 : index
    %141 = vector.load %arg4[%c7_137, %c0_138, %c0_139] : memref<9x8x16xbf16, #tpu.memory_space<vmem>>, vector<1x8x16xbf16>
    %142 = vector.shape_cast %141 : vector<1x8x16xbf16> to vector<8x16xbf16>
    %cst_140 = arith.constant dense<0.000000e+00> : vector<64x16xf32>
    %143 = tpu.matmul %140, %142, %cst_140 {dimension_numbers = #tpu.dot_dimension_numbers<[1], [0], [0], [1], [0, 0, 1, 1], [], []>} : vector<64x8xbf16>, vector<8x16xbf16>, vector<64x16xf32> -> vector<64x16xf32>
    %144 = arith.addf %137, %143 : vector<64x16xf32>
    %c2_141 = arith.constant 2 : index
    %c2_142 = arith.constant 2 : index
    %c0_143 = arith.constant 0 : index
    %145 = vector.load %arg11[%c2_141, %c2_142, %c0_143] : memref<10x10x8xf32, #tpu.memory_space<vmem>>, vector<8x8x8xf32>
    %146 = vector.shape_cast %145 : vector<8x8x8xf32> to vector<64x8xf32>
    %147 = arith.truncf %146 : vector<64x8xf32> to vector<64x8xbf16>
    %c8_144 = arith.constant 8 : index
    %c0_145 = arith.constant 0 : index
    %c0_146 = arith.constant 0 : index
    %148 = vector.load %arg4[%c8_144, %c0_145, %c0_146] : memref<9x8x16xbf16, #tpu.memory_space<vmem>>, vector<1x8x16xbf16>
    %149 = vector.shape_cast %148 : vector<1x8x16xbf16> to vector<8x16xbf16>
    %cst_147 = arith.constant dense<0.000000e+00> : vector<64x16xf32>
    %150 = tpu.matmul %147, %149, %cst_147 {dimension_numbers = #tpu.dot_dimension_numbers<[1], [0], [0], [1], [0, 0, 1, 1], [], []>} : vector<64x8xbf16>, vector<8x16xbf16>, vector<64x16xf32> -> vector<64x16xf32>
    %151 = arith.addf %144, %150 : vector<64x16xf32>
    %c0_148 = arith.constant 0 : index
    %c0_149 = arith.constant 0 : index
    %152 = vector.load %arg5[%c0_148, %c0_149] : memref<1x16xf32, #tpu.memory_space<vmem>>, vector<1x16xf32>
    %153 = vector.broadcast %152 : vector<1x16xf32> to vector<64x16xf32>
    %154 = arith.addf %151, %153 : vector<64x16xf32>
    %cst_150 = arith.constant 0.000000e+00 : f32
    %155 = vector.broadcast %cst_150 : f32 to vector<64x16xf32>
    %156 = arith.maximumf %154, %155 : vector<64x16xf32>
    %157 = vector.shape_cast %156 : vector<64x16xf32> to vector<8x8x16xf32>
    %c0_151 = arith.constant 0 : index
    %c0_152 = arith.constant 0 : index
    %c0_153 = arith.constant 0 : index
    %158 = vector.load %arg12[%c0_151, %c0_152, %c0_153] : memref<8x8x16xf32, #tpu.memory_space<vmem>>, vector<8x8x16xf32>
    tpu.vector_store %arg12[%c0_151, %c0_152, %c0_153], %157 {strides = array<i32>} : memref<8x8x16xf32, #tpu.memory_space<vmem>>, vector<8x8x16xf32>,
    %c0_154 = arith.constant 0 : index
    %c0_155 = arith.constant 0 : index
    %c0_156 = arith.constant 0 : index
    %159 = tpu.strided_load %arg12[%c0_154, %c0_155, %c0_156] {strides = array<i32: 1, 2, 1>} : memref<8x8x16xf32, #tpu.memory_space<vmem>>, vector<8x4x16xf32>
    %c0_157 = arith.constant 0 : index
    %c1_158 = arith.constant 1 : index
    %c0_159 = arith.constant 0 : index
    %160 = tpu.strided_load %arg12[%c0_157, %c1_158, %c0_159] {strides = array<i32: 1, 2, 1>} : memref<8x8x16xf32, #tpu.memory_space<vmem>>, vector<8x4x16xf32>
    %161 = arith.maximumf %159, %160 : vector<8x4x16xf32>
    %162 = vector.shape_cast %161 : vector<8x4x16xf32> to vector<4x2x4x16xf32>
    %163 = vector.extract_strided_slice %162 {offsets = [0, 0, 0, 0], sizes = [4, 1, 4, 16], strides = [1, 1, 1, 1]} : vector<4x2x4x16xf32> to vector<4x1x4x16xf32>
    %164 = vector.shape_cast %163 : vector<4x1x4x16xf32> to vector<4x4x16xf32>
    %165 = vector.extract_strided_slice %162 {offsets = [0, 1, 0, 0], sizes = [4, 1, 4, 16], strides = [1, 1, 1, 1]} : vector<4x2x4x16xf32> to vector<4x1x4x16xf32>
    %166 = vector.shape_cast %165 : vector<4x1x4x16xf32> to vector<4x4x16xf32>
    %167 = arith.maximumf %164, %166 : vector<4x4x16xf32>
    %c0_160 = arith.constant 0 : index
    %c0_161 = arith.constant 0 : index
    %168 = vector.load %arg7[%c0_160, %c0_161] : memref<1x4xf32, #tpu.memory_space<vmem>>, vector<1x4xf32>
    %169 = vector.extract_strided_slice %167 {offsets = [0, 0, 0], sizes = [1, 1, 16], strides = [1, 1, 1]} : vector<4x4x16xf32> to vector<1x1x16xf32>
    %170 = vector.shape_cast %169 : vector<1x1x16xf32> to vector<1x16xf32>
    %171 = arith.truncf %170 : vector<1x16xf32> to vector<1x16xbf16>
    %c0_162 = arith.constant 0 : index
    %c0_163 = arith.constant 0 : index
    %c0_164 = arith.constant 0 : index
    %172 = vector.load %arg6[%c0_162, %c0_163, %c0_164] : memref<16x16x4xbf16, #tpu.memory_space<vmem>>, vector<1x16x4xbf16>
    %173 = vector.shape_cast %172 : vector<1x16x4xbf16> to vector<16x4xbf16>
    %cst_165 = arith.constant dense<0.000000e+00> : vector<1x4xf32>
    %174 = tpu.matmul %171, %173, %cst_165 {dimension_numbers = #tpu.dot_dimension_numbers<[1], [0], [0], [1], [0, 0, 1, 1], [], []>} : vector<1x16xbf16>, vector<16x4xbf16>, vector<1x4xf32> -> vector<1x4xf32>
    %175 = arith.addf %168, %174 : vector<1x4xf32>
    %176 = vector.extract_strided_slice %167 {offsets = [0, 1, 0], sizes = [1, 1, 16], strides = [1, 1, 1]} : vector<4x4x16xf32> to vector<1x1x16xf32>
    %177 = vector.shape_cast %176 : vector<1x1x16xf32> to vector<1x16xf32>
    %178 = arith.truncf %177 : vector<1x16xf32> to vector<1x16xbf16>
    %c1_166 = arith.constant 1 : index
    %c0_167 = arith.constant 0 : index
    %c0_168 = arith.constant 0 : index
    %179 = vector.load %arg6[%c1_166, %c0_167, %c0_168] : memref<16x16x4xbf16, #tpu.memory_space<vmem>>, vector<1x16x4xbf16>
    %180 = vector.shape_cast %179 : vector<1x16x4xbf16> to vector<16x4xbf16>
    %cst_169 = arith.constant dense<0.000000e+00> : vector<1x4xf32>
    %181 = tpu.matmul %178, %180, %cst_169 {dimension_numbers = #tpu.dot_dimension_numbers<[1], [0], [0], [1], [0, 0, 1, 1], [], []>} : vector<1x16xbf16>, vector<16x4xbf16>, vector<1x4xf32> -> vector<1x4xf32>
    %182 = arith.addf %175, %181 : vector<1x4xf32>
    %183 = vector.extract_strided_slice %167 {offsets = [0, 2, 0], sizes = [1, 1, 16], strides = [1, 1, 1]} : vector<4x4x16xf32> to vector<1x1x16xf32>
    %184 = vector.shape_cast %183 : vector<1x1x16xf32> to vector<1x16xf32>
    %185 = arith.truncf %184 : vector<1x16xf32> to vector<1x16xbf16>
    %c2_170 = arith.constant 2 : index
    %c0_171 = arith.constant 0 : index
    %c0_172 = arith.constant 0 : index
    %186 = vector.load %arg6[%c2_170, %c0_171, %c0_172] : memref<16x16x4xbf16, #tpu.memory_space<vmem>>, vector<1x16x4xbf16>
    %187 = vector.shape_cast %186 : vector<1x16x4xbf16> to vector<16x4xbf16>
    %cst_173 = arith.constant dense<0.000000e+00> : vector<1x4xf32>
    %188 = tpu.matmul %185, %187, %cst_173 {dimension_numbers = #tpu.dot_dimension_numbers<[1], [0], [0], [1], [0, 0, 1, 1], [], []>} : vector<1x16xbf16>, vector<16x4xbf16>, vector<1x4xf32> -> vector<1x4xf32>
    %189 = arith.addf %182, %188 : vector<1x4xf32>
    %190 = vector.extract_strided_slice %167 {offsets = [0, 3, 0], sizes = [1, 1, 16], strides = [1, 1, 1]} : vector<4x4x16xf32> to vector<1x1x16xf32>
    %191 = vector.shape_cast %190 : vector<1x1x16xf32> to vector<1x16xf32>
    %192 = arith.truncf %191 : vector<1x16xf32> to vector<1x16xbf16>
    %c3_174 = arith.constant 3 : index
    %c0_175 = arith.constant 0 : index
    %c0_176 = arith.constant 0 : index
    %193 = vector.load %arg6[%c3_174, %c0_175, %c0_176] : memref<16x16x4xbf16, #tpu.memory_space<vmem>>, vector<1x16x4xbf16>
    %194 = vector.shape_cast %193 : vector<1x16x4xbf16> to vector<16x4xbf16>
    %cst_177 = arith.constant dense<0.000000e+00> : vector<1x4xf32>
    %195 = tpu.matmul %192, %194, %cst_177 {dimension_numbers = #tpu.dot_dimension_numbers<[1], [0], [0], [1], [0, 0, 1, 1], [], []>} : vector<1x16xbf16>, vector<16x4xbf16>, vector<1x4xf32> -> vector<1x4xf32>
    %196 = arith.addf %189, %195 : vector<1x4xf32>
    %197 = vector.extract_strided_slice %167 {offsets = [1, 0, 0], sizes = [1, 1, 16], strides = [1, 1, 1]} : vector<4x4x16xf32> to vector<1x1x16xf32>
    %198 = vector.shape_cast %197 : vector<1x1x16xf32> to vector<1x16xf32>
    %199 = arith.truncf %198 : vector<1x16xf32> to vector<1x16xbf16>
    %c4_178 = arith.constant 4 : index
    %c0_179 = arith.constant 0 : index
    %c0_180 = arith.constant 0 : index
    %200 = vector.load %arg6[%c4_178, %c0_179, %c0_180] : memref<16x16x4xbf16, #tpu.memory_space<vmem>>, vector<1x16x4xbf16>
    %201 = vector.shape_cast %200 : vector<1x16x4xbf16> to vector<16x4xbf16>
    %cst_181 = arith.constant dense<0.000000e+00> : vector<1x4xf32>
    %202 = tpu.matmul %199, %201, %cst_181 {dimension_numbers = #tpu.dot_dimension_numbers<[1], [0], [0], [1], [0, 0, 1, 1], [], []>} : vector<1x16xbf16>, vector<16x4xbf16>, vector<1x4xf32> -> vector<1x4xf32>
    %203 = arith.addf %196, %202 : vector<1x4xf32>
    %204 = vector.extract_strided_slice %167 {offsets = [1, 1, 0], sizes = [1, 1, 16], strides = [1, 1, 1]} : vector<4x4x16xf32> to vector<1x1x16xf32>
    %205 = vector.shape_cast %204 : vector<1x1x16xf32> to vector<1x16xf32>
    %206 = arith.truncf %205 : vector<1x16xf32> to vector<1x16xbf16>
    %c5_182 = arith.constant 5 : index
    %c0_183 = arith.constant 0 : index
    %c0_184 = arith.constant 0 : index
    %207 = vector.load %arg6[%c5_182, %c0_183, %c0_184] : memref<16x16x4xbf16, #tpu.memory_space<vmem>>, vector<1x16x4xbf16>
    %208 = vector.shape_cast %207 : vector<1x16x4xbf16> to vector<16x4xbf16>
    %cst_185 = arith.constant dense<0.000000e+00> : vector<1x4xf32>
    %209 = tpu.matmul %206, %208, %cst_185 {dimension_numbers = #tpu.dot_dimension_numbers<[1], [0], [0], [1], [0, 0, 1, 1], [], []>} : vector<1x16xbf16>, vector<16x4xbf16>, vector<1x4xf32> -> vector<1x4xf32>
    %210 = arith.addf %203, %209 : vector<1x4xf32>
    %211 = vector.extract_strided_slice %167 {offsets = [1, 2, 0], sizes = [1, 1, 16], strides = [1, 1, 1]} : vector<4x4x16xf32> to vector<1x1x16xf32>
    %212 = vector.shape_cast %211 : vector<1x1x16xf32> to vector<1x16xf32>
    %213 = arith.truncf %212 : vector<1x16xf32> to vector<1x16xbf16>
    %c6_186 = arith.constant 6 : index
    %c0_187 = arith.constant 0 : index
    %c0_188 = arith.constant 0 : index
    %214 = vector.load %arg6[%c6_186, %c0_187, %c0_188] : memref<16x16x4xbf16, #tpu.memory_space<vmem>>, vector<1x16x4xbf16>
    %215 = vector.shape_cast %214 : vector<1x16x4xbf16> to vector<16x4xbf16>
    %cst_189 = arith.constant dense<0.000000e+00> : vector<1x4xf32>
    %216 = tpu.matmul %213, %215, %cst_189 {dimension_numbers = #tpu.dot_dimension_numbers<[1], [0], [0], [1], [0, 0, 1, 1], [], []>} : vector<1x16xbf16>, vector<16x4xbf16>, vector<1x4xf32> -> vector<1x4xf32>
    %217 = arith.addf %210, %216 : vector<1x4xf32>
    %218 = vector.extract_strided_slice %167 {offsets = [1, 3, 0], sizes = [1, 1, 16], strides = [1, 1, 1]} : vector<4x4x16xf32> to vector<1x1x16xf32>
    %219 = vector.shape_cast %218 : vector<1x1x16xf32> to vector<1x16xf32>
    %220 = arith.truncf %219 : vector<1x16xf32> to vector<1x16xbf16>
    %c7_190 = arith.constant 7 : index
    %c0_191 = arith.constant 0 : index
    %c0_192 = arith.constant 0 : index
    %221 = vector.load %arg6[%c7_190, %c0_191, %c0_192] : memref<16x16x4xbf16, #tpu.memory_space<vmem>>, vector<1x16x4xbf16>
    %222 = vector.shape_cast %221 : vector<1x16x4xbf16> to vector<16x4xbf16>
    %cst_193 = arith.constant dense<0.000000e+00> : vector<1x4xf32>
    %223 = tpu.matmul %220, %222, %cst_193 {dimension_numbers = #tpu.dot_dimension_numbers<[1], [0], [0], [1], [0, 0, 1, 1], [], []>} : vector<1x16xbf16>, vector<16x4xbf16>, vector<1x4xf32> -> vector<1x4xf32>
    %224 = arith.addf %217, %223 : vector<1x4xf32>
    %225 = vector.extract_strided_slice %167 {offsets = [2, 0, 0], sizes = [1, 1, 16], strides = [1, 1, 1]} : vector<4x4x16xf32> to vector<1x1x16xf32>
    %226 = vector.shape_cast %225 : vector<1x1x16xf32> to vector<1x16xf32>
    %227 = arith.truncf %226 : vector<1x16xf32> to vector<1x16xbf16>
    %c8_194 = arith.constant 8 : index
    %c0_195 = arith.constant 0 : index
    %c0_196 = arith.constant 0 : index
    %228 = vector.load %arg6[%c8_194, %c0_195, %c0_196] : memref<16x16x4xbf16, #tpu.memory_space<vmem>>, vector<1x16x4xbf16>
    %229 = vector.shape_cast %228 : vector<1x16x4xbf16> to vector<16x4xbf16>
    %cst_197 = arith.constant dense<0.000000e+00> : vector<1x4xf32>
    %230 = tpu.matmul %227, %229, %cst_197 {dimension_numbers = #tpu.dot_dimension_numbers<[1], [0], [0], [1], [0, 0, 1, 1], [], []>} : vector<1x16xbf16>, vector<16x4xbf16>, vector<1x4xf32> -> vector<1x4xf32>
    %231 = arith.addf %224, %230 : vector<1x4xf32>
    %232 = vector.extract_strided_slice %167 {offsets = [2, 1, 0], sizes = [1, 1, 16], strides = [1, 1, 1]} : vector<4x4x16xf32> to vector<1x1x16xf32>
    %233 = vector.shape_cast %232 : vector<1x1x16xf32> to vector<1x16xf32>
    %234 = arith.truncf %233 : vector<1x16xf32> to vector<1x16xbf16>
    %c9 = arith.constant 9 : index
    %c0_198 = arith.constant 0 : index
    %c0_199 = arith.constant 0 : index
    %235 = vector.load %arg6[%c9, %c0_198, %c0_199] : memref<16x16x4xbf16, #tpu.memory_space<vmem>>, vector<1x16x4xbf16>
    %236 = vector.shape_cast %235 : vector<1x16x4xbf16> to vector<16x4xbf16>
    %cst_200 = arith.constant dense<0.000000e+00> : vector<1x4xf32>
    %237 = tpu.matmul %234, %236, %cst_200 {dimension_numbers = #tpu.dot_dimension_numbers<[1], [0], [0], [1], [0, 0, 1, 1], [], []>} : vector<1x16xbf16>, vector<16x4xbf16>, vector<1x4xf32> -> vector<1x4xf32>
    %238 = arith.addf %231, %237 : vector<1x4xf32>
    %239 = vector.extract_strided_slice %167 {offsets = [2, 2, 0], sizes = [1, 1, 16], strides = [1, 1, 1]} : vector<4x4x16xf32> to vector<1x1x16xf32>
    %240 = vector.shape_cast %239 : vector<1x1x16xf32> to vector<1x16xf32>
    %241 = arith.truncf %240 : vector<1x16xf32> to vector<1x16xbf16>
    %c10 = arith.constant 10 : index
    %c0_201 = arith.constant 0 : index
    %c0_202 = arith.constant 0 : index
    %242 = vector.load %arg6[%c10, %c0_201, %c0_202] : memref<16x16x4xbf16, #tpu.memory_space<vmem>>, vector<1x16x4xbf16>
    %243 = vector.shape_cast %242 : vector<1x16x4xbf16> to vector<16x4xbf16>
    %cst_203 = arith.constant dense<0.000000e+00> : vector<1x4xf32>
    %244 = tpu.matmul %241, %243, %cst_203 {dimension_numbers = #tpu.dot_dimension_numbers<[1], [0], [0], [1], [0, 0, 1, 1], [], []>} : vector<1x16xbf16>, vector<16x4xbf16>, vector<1x4xf32> -> vector<1x4xf32>
    %245 = arith.addf %238, %244 : vector<1x4xf32>
    %246 = vector.extract_strided_slice %167 {offsets = [2, 3, 0], sizes = [1, 1, 16], strides = [1, 1, 1]} : vector<4x4x16xf32> to vector<1x1x16xf32>
    %247 = vector.shape_cast %246 : vector<1x1x16xf32> to vector<1x16xf32>
    %248 = arith.truncf %247 : vector<1x16xf32> to vector<1x16xbf16>
    %c11 = arith.constant 11 : index
    %c0_204 = arith.constant 0 : index
    %c0_205 = arith.constant 0 : index
    %249 = vector.load %arg6[%c11, %c0_204, %c0_205] : memref<16x16x4xbf16, #tpu.memory_space<vmem>>, vector<1x16x4xbf16>
    %250 = vector.shape_cast %249 : vector<1x16x4xbf16> to vector<16x4xbf16>
    %cst_206 = arith.constant dense<0.000000e+00> : vector<1x4xf32>
    %251 = tpu.matmul %248, %250, %cst_206 {dimension_numbers = #tpu.dot_dimension_numbers<[1], [0], [0], [1], [0, 0, 1, 1], [], []>} : vector<1x16xbf16>, vector<16x4xbf16>, vector<1x4xf32> -> vector<1x4xf32>
    %252 = arith.addf %245, %251 : vector<1x4xf32>
    %253 = vector.extract_strided_slice %167 {offsets = [3, 0, 0], sizes = [1, 1, 16], strides = [1, 1, 1]} : vector<4x4x16xf32> to vector<1x1x16xf32>
    %254 = vector.shape_cast %253 : vector<1x1x16xf32> to vector<1x16xf32>
    %255 = arith.truncf %254 : vector<1x16xf32> to vector<1x16xbf16>
    %c12 = arith.constant 12 : index
    %c0_207 = arith.constant 0 : index
    %c0_208 = arith.constant 0 : index
    %256 = vector.load %arg6[%c12, %c0_207, %c0_208] : memref<16x16x4xbf16, #tpu.memory_space<vmem>>, vector<1x16x4xbf16>
    %257 = vector.shape_cast %256 : vector<1x16x4xbf16> to vector<16x4xbf16>
    %cst_209 = arith.constant dense<0.000000e+00> : vector<1x4xf32>
    %258 = tpu.matmul %255, %257, %cst_209 {dimension_numbers = #tpu.dot_dimension_numbers<[1], [0], [0], [1], [0, 0, 1, 1], [], []>} : vector<1x16xbf16>, vector<16x4xbf16>, vector<1x4xf32> -> vector<1x4xf32>
    %259 = arith.addf %252, %258 : vector<1x4xf32>
    %260 = vector.extract_strided_slice %167 {offsets = [3, 1, 0], sizes = [1, 1, 16], strides = [1, 1, 1]} : vector<4x4x16xf32> to vector<1x1x16xf32>
    %261 = vector.shape_cast %260 : vector<1x1x16xf32> to vector<1x16xf32>
    %262 = arith.truncf %261 : vector<1x16xf32> to vector<1x16xbf16>
    %c13 = arith.constant 13 : index
    %c0_210 = arith.constant 0 : index
    %c0_211 = arith.constant 0 : index
    %263 = vector.load %arg6[%c13, %c0_210, %c0_211] : memref<16x16x4xbf16, #tpu.memory_space<vmem>>, vector<1x16x4xbf16>
    %264 = vector.shape_cast %263 : vector<1x16x4xbf16> to vector<16x4xbf16>
    %cst_212 = arith.constant dense<0.000000e+00> : vector<1x4xf32>
    %265 = tpu.matmul %262, %264, %cst_212 {dimension_numbers = #tpu.dot_dimension_numbers<[1], [0], [0], [1], [0, 0, 1, 1], [], []>} : vector<1x16xbf16>, vector<16x4xbf16>, vector<1x4xf32> -> vector<1x4xf32>
    %266 = arith.addf %259, %265 : vector<1x4xf32>
    %267 = vector.extract_strided_slice %167 {offsets = [3, 2, 0], sizes = [1, 1, 16], strides = [1, 1, 1]} : vector<4x4x16xf32> to vector<1x1x16xf32>
    %268 = vector.shape_cast %267 : vector<1x1x16xf32> to vector<1x16xf32>
    %269 = arith.truncf %268 : vector<1x16xf32> to vector<1x16xbf16>
    %c14 = arith.constant 14 : index
    %c0_213 = arith.constant 0 : index
    %c0_214 = arith.constant 0 : index
    %270 = vector.load %arg6[%c14, %c0_213, %c0_214] : memref<16x16x4xbf16, #tpu.memory_space<vmem>>, vector<1x16x4xbf16>
    %271 = vector.shape_cast %270 : vector<1x16x4xbf16> to vector<16x4xbf16>
    %cst_215 = arith.constant dense<0.000000e+00> : vector<1x4xf32>
    %272 = tpu.matmul %269, %271, %cst_215 {dimension_numbers = #tpu.dot_dimension_numbers<[1], [0], [0], [1], [0, 0, 1, 1], [], []>} : vector<1x16xbf16>, vector<16x4xbf16>, vector<1x4xf32> -> vector<1x4xf32>
    %273 = arith.addf %266, %272 : vector<1x4xf32>
    %274 = vector.extract_strided_slice %167 {offsets = [3, 3, 0], sizes = [1, 1, 16], strides = [1, 1, 1]} : vector<4x4x16xf32> to vector<1x1x16xf32>
    %275 = vector.shape_cast %274 : vector<1x1x16xf32> to vector<1x16xf32>
    %276 = arith.truncf %275 : vector<1x16xf32> to vector<1x16xbf16>
    %c15 = arith.constant 15 : index
    %c0_216 = arith.constant 0 : index
    %c0_217 = arith.constant 0 : index
    %277 = vector.load %arg6[%c15, %c0_216, %c0_217] : memref<16x16x4xbf16, #tpu.memory_space<vmem>>, vector<1x16x4xbf16>
    %278 = vector.shape_cast %277 : vector<1x16x4xbf16> to vector<16x4xbf16>
    %cst_218 = arith.constant dense<0.000000e+00> : vector<1x4xf32>
    %279 = tpu.matmul %276, %278, %cst_218 {dimension_numbers = #tpu.dot_dimension_numbers<[1], [0], [0], [1], [0, 0, 1, 1], [], []>} : vector<1x16xbf16>, vector<16x4xbf16>, vector<1x4xf32> -> vector<1x4xf32>
    %280 = arith.addf %273, %279 : vector<1x4xf32>
    %cst_219 = arith.constant dense<0xFF800000> : vector<1xf32>
    %281 = vector.multi_reduction <maximumf>, %280, %cst_219 [1] : vector<1x4xf32> to vector<1xf32>
    %282 = vector.shape_cast %281 : vector<1xf32> to vector<1x1xf32>
    %283 = vector.broadcast %282 : vector<1x1xf32> to vector<1x4xf32>
    %284 = arith.subf %280, %283 : vector<1x4xf32>
    %285 = math.exp %284 : vector<1x4xf32>
    %cst_220 = arith.constant dense<0.000000e+00> : vector<1xf32>
    %286 = vector.multi_reduction <add>, %285, %cst_220 [1] : vector<1x4xf32> to vector<1xf32>
    %287 = vector.shape_cast %286 : vector<1xf32> to vector<1x1xf32>
    %288 = vector.broadcast %287 : vector<1x1xf32> to vector<1x4xf32>
    %289 = arith.divf %285, %288 : vector<1x4xf32>
    %290 = vector.shape_cast %289 : vector<1x4xf32> to vector<1x1x4xf32>
    %c0_221 = arith.constant 0 : index
    %c0_222 = arith.constant 0 : index
    %c0_223 = arith.constant 0 : index
    %291 = vector.load %arg8[%c0_221, %c0_222, %c0_223] : memref<1x1x4xf32, #tpu.memory_space<vmem>>, vector<1x1x4xf32>
    tpu.vector_store %arg8[%c0_221, %c0_222, %c0_223], %290 {strides = array<i32>} : memref<1x1x4xf32, #tpu.memory_space<vmem>>, vector<1x1x4xf32>,
    return
  }
  func.func @transform_0(%arg0: i32) -> (i32, i32, i32, i32) {
    %c0_i32 = arith.constant 0 : i32
    %c0_i32_0 = arith.constant 0 : i32
    %c0_i32_1 = arith.constant 0 : i32
    %c0_i32_2 = arith.constant 0 : i32
    return %arg0, %c0_i32, %c0_i32_0, %c0_i32_1 : i32, i32, i32, i32
  }
  func.func @transform_1(%arg0: i32) -> (i32, i32, i32) {
    %c0_i32 = arith.constant 0 : i32
    %c0_i32_0 = arith.constant 0 : i32
    %c0_i32_1 = arith.constant 0 : i32
    %c0_i32_2 = arith.constant 0 : i32
    return %c0_i32, %c0_i32_0, %c0_i32_1 : i32, i32, i32
  }
  func.func @transform_2(%arg0: i32) -> (i32, i32) {
    %c0_i32 = arith.constant 0 : i32
    %c0_i32_0 = arith.constant 0 : i32
    %c0_i32_1 = arith.constant 0 : i32
    return %c0_i32, %c0_i32_0 : i32, i32
  }
  func.func @transform_3(%arg0: i32) -> (i32, i32, i32) {
    %c0_i32 = arith.constant 0 : i32
    %c0_i32_0 = arith.constant 0 : i32
    %c0_i32_1 = arith.constant 0 : i32
    %c0_i32_2 = arith.constant 0 : i32
    return %c0_i32, %c0_i32_0, %c0_i32_1 : i32, i32, i32
  }
  func.func @transform_4(%arg0: i32) -> (i32, i32) {
    %c0_i32 = arith.constant 0 : i32
    %c0_i32_0 = arith.constant 0 : i32
    %c0_i32_1 = arith.constant 0 : i32
    return %c0_i32, %c0_i32_0 : i32, i32
  }
  func.func @transform_5(%arg0: i32) -> (i32, i32, i32) {
    %c0_i32 = arith.constant 0 : i32
    %c0_i32_0 = arith.constant 0 : i32
    %c0_i32_1 = arith.constant 0 : i32
    %c0_i32_2 = arith.constant 0 : i32
    return %c0_i32, %c0_i32_0, %c0_i32_1 : i32, i32, i32
  }
  func.func @transform_6(%arg0: i32) -> (i32, i32) {
    %c0_i32 = arith.constant 0 : i32
    %c0_i32_0 = arith.constant 0 : i32
    %c0_i32_1 = arith.constant 0 : i32
    return %c0_i32, %c0_i32_0 : i32, i32
  }
  func.func @transform_7(%arg0: i32) -> (i32, i32, i32) {
    %c0_i32 = arith.constant 0 : i32
    %c0_i32_0 = arith.constant 0 : i32
    %c0_i32_1 = arith.constant 0 : i32
    return %arg0, %c0_i32, %c0_i32_0 : i32, i32, i32
  }
}

</mosaic_0001>

<bundles_post_ra>
// kernel: conv2layers_forward.1
= control target key start
LH: loop header
LB: loop body
LE: loop exit
PB: predicated region body
PF: predicated region fallthrough
CT: control target
= control target key end

     0   :  { %12 = vsyncpa [#allocation7], 0  ;;  %s7878_s0 = inlined_call_operand.vmem [shape: f32[2,16,16,3], index: 0, kind: input, shape index: {}]   ;;  %s7879_s1 = inlined_call_operand.vmem [shape: bf16[9,3,8], index: 1, kind: input, shape index: {}]   ;;  %s7880_s2 = inlined_call_operand.vmem [shape: f32[1,8], index: 2, kind: input, shape index: {}]   ;;  %s7881_s3 = inlined_call_operand.vmem [shape: bf16[9,8,16], index: 3, kind: input, shape index: {}]   ;;  %s7882_s4 = inlined_call_operand.vmem [shape: f32[1,16], index: 4, kind: input, shape index: {}]   ;;  %s7883_s5 = inlined_call_operand.vmem [shape: bf16[16,16,4], index: 5, kind: input, shape index: {}]   ;;  %s7884_s6 = inlined_call_operand.vmem [shape: f32[1,4], index: 6, kind: input, shape index: {}]   ;;  %s7885_s7 = inlined_call_operand.hbm [shape: f32[2,1,4], index: 7, kind: output, shape index: {}]  }
   0x1   :  { %14 = vsyncpa [#allocation7 + $0x1], 0  ;;  %s6690_s24 = smov 0   ;;  %s6692_s25 = smov 0  }
   0x2   :  { %s6694_s26 = smov 0   ;;  %s6696_s27 = smov 0  }
   0x3 LB: > { %s6711_s28 = sadd.s32 4294967295, %s6644_s27   ;;  %s5136_s29 = sadd.s32 4294967294, %s6644_s27   ;;  %s6644_s27 = sphi %s6696_s27, %s7891_s27   ;;  %s6640_s26 = sphi %s6694_s26, %s7890_s26   ;;  %s6636_s25 = sphi %s6692_s25, %s7889_s25   ;;  %s6632_s24 = sphi %s6690_s24, %s7888_s24  }
   0x4   : > { %s6715_s30 = sadd.s32 1, %s6644_s27   ;;  %s179_s8 = sadd.s32 1, %s6640_s26 }
   0x5   : > { %s176_s9 = ssub.s32 %s6644_s27, %s6715_s30  ;;  %p189_p0 = scmp.ne.s32.totalorder %s6640_s26, %s6636_s25 }
   0x6   : > { %p177_p1 = scmp.eq.s32.totalorder %s176_s9, 0  ;;  %p190_p2 = scmp.eq.s32.totalorder %s6711_s28, 1 }
   0x7   : > { %p195_p3 = scmp.ne.s32.totalorder %s6636_s25, %s6632_s24  ;;  %p196_p4 = scmp.eq.s32.totalorder %s5136_s29, 1 }
   0x8   : > { %s6726_s10 = scalar_select %p177_p1, %s6640_s26, %s179_s8  }
   0x9   : > { %p6728_p5 = por %p190_p2, %p189_p0  ;;  %p6732_p6 = por %p196_p4, %p195_p3 }
   0xa   : > { %p5139_p7 = scmp.ge.s32.totalorder %s6644_s27, 1  ;;  %p240_p8 = scmp.lt.s32.totalorder %s6644_s27, 3 }
   0xc   : > { %p241_p9 = pnand %p5139_p7, %p240_p8 }
   0xd   : > { %vm545_vm0 = vcmask (!%p241_p9), 1040384   ;;  %vm546_vm1 = vcmask (!%p241_p9), 1041408   ;;  %v6741_v0 = vld [vmem:[%s7879_s1 + $0x4] sm:$0x3] (!%p241_p9)  ;;  %vm277_vm2 = vcmask (!%p241_p9), 23552   ;;  %v6646_v1 = vmov (!%p241_p9), 65535  }
   0xe   : > { %244 = sbr.rel (%p241_p9) target bundleno = 1781 (0x6f5), region = 48  ;;  %v547_v2 = vsel (!%p241_p9), %vm545_vm0, 4294967295, %v6646_v1  ;;  %vm280_vm3 = vcmask (!%p241_p9), 17408   ;;  %v5192_v3 = vld [vmem:[%s7879_s1 + $0x6] sm:$0x3] (!%p241_p9)  ;;  %p271_p10 = scmp.lt.s32.totalorder (!%p241_p9), %s6711_s28, 1 }
   0xf   : > { %v6747_v4 = vsel (!%p241_p9), %vm546_vm1, %v547_v2, 0  ;;  %v6647_v5 = vmov (!%p241_p9), 0.0   ;;  %v5209_v24 = vld [vmem:[%s7879_s1 + $0x8] sm:$0x3] (!%p241_p9)  ;;  %vm3055_vm4 = vcmask (!%p241_p9), 64512   ;;  %vm3176_vm5 = vcmask (!%p241_p9), 58368  }
  0x10   : > { %278 = vst.msk [vmem:[#allocation2] sm:$0xff] (!%p241_p9), %vm277_vm2, %v6647_v5  ;;  %279 = vst.msk [vmem:[#allocation2 + $0x8] sm:$0xff] (!%p241_p9), %vm277_vm2, %v6647_v5  ;;  %v6859_v6 = vand.u32 (!%p241_p9), %v6741_v0, %v6747_v4  ;;  %v6862_v7 = vand.u32 (!%p241_p9), %v5192_v3, %v6747_v4  ;;  %v6926_v39 = vand.u32 (!%p241_p9), %v5209_v24, %v6747_v4  ;;  %vm3244_vm6 = vcmask (!%p241_p9), 1043456   ;;  %s269_s22 = sand.u32 (!%p241_p9), 1, %s6636_s25   ;;  %s5402_s23 = sshll.u32 (!%p241_p9), %s6711_s28, 4 }
  0x11   : > { %281 = vst.msk [vmem:[#allocation2 + $0x10] sm:$0x3] (!%p241_p9), %vm280_vm3, %v6647_v5  ;;  %284 = vst.msk [vmem:[#allocation2 + $0x28] sm:$0x3] (!%p241_p9), %vm280_vm3, %v6647_v5  ;;  %vm6648_vm7 = vmmov (!%p241_p9), 0   ;;  %vm4131_vm8 = vcmask (!%p241_p9), 130048   ;;  %s7835_s14 = scalar_lea.hbm (!%p241_p9), %s7885_s7, %s5402_s23 }
  0x12   : > { %282 = vst.msk [vmem:[#allocation2 + $0x18] sm:$0xff] (!%p241_p9), %vm277_vm2, %v6647_v5  ;;  %283 = vst.msk [vmem:[#allocation2 + $0x20] sm:$0xff] (!%p241_p9), %vm277_vm2, %v6647_v5  ;;  %5704 = vmatprep.subr.bf16.mxu0 (!%p241_p9), %v6859_v6  ;;  %vm5055_vm9 = vcmask (!%p241_p9), 24576   ;;  %s270_s29 = scalar_lea.vmem (!%p241_p9), [#allocation6], %s269_s22  ;;  %s5069_s15 = scalar_lea.sflag (!%p241_p9), [#allocation7], %s269_s22 }
  0x13   : > { %285 = vst.msk [vmem:[#allocation2 + $0x30] sm:$0xff] (!%p241_p9), %vm277_vm2, %v6647_v5  ;;  %286 = vst.msk [vmem:[#allocation2 + $0x38] sm:$0xff] (!%p241_p9), %vm277_vm2, %v6647_v5  ;;  %5705 = vmatpush3.bf16.msra.mxu0 (!%p241_p9), %v6859_v6  ;;  %s5081_s8 = sshll.u32 (!%p241_p9), %s270_s29, 4  ;;  %s7837_s8 = int_to_ptr.vmem [resolvable:$true] %s5081_s8 }
  0x14   : > { %287 = vst.msk [vmem:[#allocation2 + $0x40] sm:$0x3] (!%p241_p9), %vm280_vm3, %v6647_v5  ;;  %290 = vst.msk [vmem:[#allocation2 + $0x58] sm:$0x3] (!%p241_p9), %vm280_vm3, %v6647_v5  ;;  %5738 = vmatprep.subr.bf16.mxu0 (!%p241_p9), %v6862_v7  ;;  %s6582_s16 = scalar_lea.vmem (!%p241_p9), %s7837_s8, 16 }
  0x15   : > { %288 = vst.msk [vmem:[#allocation2 + $0x48] sm:$0xff] %vm277_vm2, %v6647_v5  ;;  %289 = vst.msk [vmem:[#allocation2 + $0x50] sm:$0xff] %vm277_vm2, %v6647_v5  ;;  %s272_s17 = scalar_select %p271_p10, %s6711_s28, 1 }
  0x16   : > { %291 = vst.msk [vmem:[#allocation2 + $0x60] sm:$0xff] %vm277_vm2, %v6647_v5  ;;  %292 = vst.msk [vmem:[#allocation2 + $0x68] sm:$0xff] %vm277_vm2, %v6647_v5  ;;  %p6583_p11 = scmp.ne.s32.totalorder %s7837_s8, %s6582_s16  ;;  %s6649_s28 = smov [#allocation6]  }
  0x17   : > { %293 = vst.msk [vmem:[#allocation2 + $0x70] sm:$0x3] %vm280_vm3, %v6647_v5  ;;  %296 = vst.msk [vmem:[#allocation2 + $0x88] sm:$0x3] %vm280_vm3, %v6647_v5  ;;  %s5405_s18 = sshll.u32 %s272_s17, 8  ;;  %v925_v14 = vld [vmem:[#allocation2 + $0x2] sm:$0xff] }
  0x18   : > { %294 = vst.msk [vmem:[#allocation2 + $0x78] sm:$0xff] %vm277_vm2, %v6647_v5  ;;  %295 = vst.msk [vmem:[#allocation2 + $0x80] sm:$0xff] %vm277_vm2, %v6647_v5  ;;  %s6872_s21 = scalar_lea.vmem %s7878_s0, %s5405_s18  ;;  %v926_v15 = vld [vmem:[#allocation2 + $0xa] sm:$0xff]  ;;  %p6584_p12 = pnand %p6583_p11, %p6728_p5 }
  0x19   : > { %297 = vst.msk [vmem:[#allocation2 + $0x90] sm:$0xff] %vm277_vm2, %v6647_v5  ;;  %298 = vst.msk [vmem:[#allocation2 + $0x98] sm:$0xff] %vm277_vm2, %v6647_v5  ;;  %v333_v8 = vld [vmem:[%s6872_s21] sm:$0xff]  ;;  %v334_v9 = vld [vmem:[%s6872_s21 + $0x8] sm:$0xff]  ;;  %v957_v17 = vpack.c.bf16 %v926_v15, %v925_v14  ;;  %s6586_s17 = sshll.u32 %s6649_s28, 4  ;;  %s6587_s17 = int_to_ptr.vmem [resolvable:$false] %s6586_s17 }
  0x1a   : > { %299 = vst.msk [vmem:[#allocation2 + $0xa0] sm:$0x3] %vm280_vm3, %v6647_v5  ;;  %302 = vst.msk [vmem:[#allocation2 + $0xb8] sm:$0x3] %vm280_vm3, %v6647_v5  ;;  %v335_v10 = vld [vmem:[%s6872_s21 + $0x10] sm:$0xff]  ;;  %v336_v11 = vld [vmem:[%s6872_s21 + $0x18] sm:$0xff]  ;;  %p6585_p13 = pneg %p6584_p12  ;;  %p6589_p0 = scmp.lt.s32.totalorder %s7837_s8, %s6587_s17 }
  0x1b   : > { %300 = vst.msk [vmem:[#allocation2 + $0xa8] sm:$0xff] %vm277_vm2, %v6647_v5  ;;  %301 = vst.msk [vmem:[#allocation2 + $0xb0] sm:$0xff] %vm277_vm2, %v6647_v5  ;;  %v337_v12 = vld [vmem:[%s6872_s21 + $0x20] sm:$0xff]  ;;  %v338_v13 = vld [vmem:[%s6872_s21 + $0x28] sm:$0xff]  ;;  %5706 = vmatprep.mubr.msk.bf16.mxu0 %vm277_vm2, %v957_v17  ;;  %s6588_s18 = scalar_lea.vmem %s6587_s17, 32 }
  0x1c   : > { %303 = vst.msk [vmem:[#allocation2 + $0xc0] sm:$0xff] %vm277_vm2, %v6647_v5  ;;  %304 = vst.msk [vmem:[#allocation2 + $0xc8] sm:$0xff] %vm277_vm2, %v6647_v5  ;;  %v339_v16 = vld [vmem:[%s6872_s21 + $0x30] sm:$0xff]  ;;  %v340_v18 = vld [vmem:[%s6872_s21 + $0x38] sm:$0xff]  ;;  %p6590_p1 = scmp.lt.s32.totalorder %s6588_s18, %s6582_s16 }
  0x1d   : > { %305 = vst.msk [vmem:[#allocation2 + $0xd0] sm:$0x3] %vm280_vm3, %v6647_v5  ;;  %308 = vst.msk [vmem:[#allocation2 + $0xe8] sm:$0x3] %vm280_vm3, %v6647_v5  ;;  %v341_v19 = vld [vmem:[%s6872_s21 + $0x40] sm:$0xff]  ;;  %v342_v20 = vld [vmem:[%s6872_s21 + $0x48] sm:$0xff] }
  0x1e   : > { %306 = vst.msk [vmem:[#allocation2 + $0xd8] sm:$0xff] %vm277_vm2, %v6647_v5  ;;  %307 = vst.msk [vmem:[#allocation2 + $0xe0] sm:$0xff] %vm277_vm2, %v6647_v5  ;;  %v343_v21 = vld [vmem:[%s6872_s21 + $0x50] sm:$0xff]  ;;  %v344_v22 = vld [vmem:[%s6872_s21 + $0x58] sm:$0xff]  ;;  %p6591_p2 = por %p6590_p1, %p6589_p0 }
  0x1f   : > { %309 = vst.msk [vmem:[#allocation2 + $0xf0] sm:$0xff] %vm277_vm2, %v6647_v5  ;;  %310 = vst.msk [vmem:[#allocation2 + $0xf8] sm:$0xff] %vm277_vm2, %v6647_v5  ;;  %v345_v23 = vld [vmem:[%s6872_s21 + $0x60] sm:$0xff]  ;;  %v346_v25 = vld [vmem:[%s6872_s21 + $0x68] sm:$0xff] }
  0x20   : > { %311 = vst.msk [vmem:[#allocation2 + $0x100] sm:$0x3] %vm280_vm3, %v6647_v5  ;;  %314 = vst.msk [vmem:[#allocation2 + $0x118] sm:$0x3] %vm280_vm3, %v6647_v5  ;;  %v347_v26 = vld [vmem:[%s6872_s21 + $0x70] sm:$0xff]  ;;  %v348_v27 = vld [vmem:[%s6872_s21 + $0x78] sm:$0xff]  ;;  %p6592_p3 = pnand %p6591_p2, %p6585_p13 }
  0x21   : > { %312 = vst.msk [vmem:[#allocation2 + $0x108] sm:$0xff] %vm277_vm2, %v6647_v5  ;;  %313 = vst.msk [vmem:[#allocation2 + $0x110] sm:$0xff] %vm277_vm2, %v6647_v5  ;;  %v349_v28 = vld [vmem:[%s6872_s21 + $0x80] sm:$0xff]  ;;  %v350_v29 = vld [vmem:[%s6872_s21 + $0x88] sm:$0xff] }
  0x22   : > { %315 = vst.msk [vmem:[#allocation2 + $0x120] sm:$0xff] %vm277_vm2, %v6647_v5  ;;  %316 = vst.msk [vmem:[#allocation2 + $0x128] sm:$0xff] %vm277_vm2, %v6647_v5  ;;  %v351_v30 = vld [vmem:[%s6872_s21 + $0x90] sm:$0xff]  ;;  %v352_v31 = vld [vmem:[%s6872_s21 + $0x98] sm:$0xff] }
  0x23   : > { %317 = vst.msk [vmem:[#allocation2 + $0x130] sm:$0x3] %vm280_vm3, %v6647_v5  ;;  %320 = vst.msk [vmem:[#allocation2 + $0x148] sm:$0x3] %vm280_vm3, %v6647_v5  ;;  %v353_v32 = vld [vmem:[%s6872_s21 + $0xa0] sm:$0xff]  ;;  %v354_v33 = vld [vmem:[%s6872_s21 + $0xa8] sm:$0xff] }
  0x24   : > { %318 = vst.msk [vmem:[#allocation2 + $0x138] sm:$0xff] %vm277_vm2, %v6647_v5  ;;  %319 = vst.msk [vmem:[#allocation2 + $0x140] sm:$0xff] %vm277_vm2, %v6647_v5  ;;  %v355_v51 = vld [vmem:[%s6872_s21 + $0xb0] sm:$0xff]  ;;  %v356_v52 = vld [vmem:[%s6872_s21 + $0xb8] sm:$0xff] }
  0x25   : > { %321 = vst.msk [vmem:[#allocation2 + $0x150] sm:$0xff] %vm277_vm2, %v6647_v5  ;;  %322 = vst.msk [vmem:[#allocation2 + $0x158] sm:$0xff] %vm277_vm2, %v6647_v5  ;;  %v357_v53 = vld [vmem:[%s6872_s21 + $0xc0] sm:$0xff]  ;;  %v358_v54 = vld [vmem:[%s6872_s21 + $0xc8] sm:$0xff] }
  0x26   : > { %323 = vst.msk [vmem:[#allocation2 + $0x160] sm:$0x3] %vm280_vm3, %v6647_v5  ;;  %326 = vst.msk [vmem:[#allocation2 + $0x178] sm:$0x3] %vm280_vm3, %v6647_v5  ;;  %v359_v55 = vld [vmem:[%s6872_s21 + $0xd0] sm:$0xff]  ;;  %v360_v57 = vld [vmem:[%s6872_s21 + $0xd8] sm:$0xff] }
  0x27   : > { %324 = vst.msk [vmem:[#allocation2 + $0x168] sm:$0xff] %vm277_vm2, %v6647_v5  ;;  %325 = vst.msk [vmem:[#allocation2 + $0x170] sm:$0xff] %vm277_vm2, %v6647_v5  ;;  %v361_v58 = vld [vmem:[%s6872_s21 + $0xe0] sm:$0xff]  ;;  %v362_v59 = vld [vmem:[%s6872_s21 + $0xe8] sm:$0xff] }
  0x28   : > { %327 = vst.msk [vmem:[#allocation2 + $0x180] sm:$0xff] %vm277_vm2, %v6647_v5  ;;  %328 = vst.msk [vmem:[#allocation2 + $0x188] sm:$0xff] %vm277_vm2, %v6647_v5  ;;  %v363_v61 = vld [vmem:[%s6872_s21 + $0xf0] sm:$0xff]  ;;  %v364_v62 = vld [vmem:[%s6872_s21 + $0xf8] sm:$0xff] }
  0x29   : > { %329 = vst.msk [vmem:[#allocation2 + $0x190] sm:$0x3] %vm280_vm3, %v6647_v5  ;;  %332 = vst.msk [vmem:[#allocation2 + $0x1a8] sm:$0x3] %vm280_vm3, %v6647_v5 }
  0x2a   : > { %330 = vst.msk [vmem:[#allocation2 + $0x198] sm:$0xff] %vm277_vm2, %v6647_v5  ;;  %331 = vst.msk [vmem:[#allocation2 + $0x1a0] sm:$0xff] %vm277_vm2, %v6647_v5 }
  0x2b   : > { %366 = vst.msk [vmem:[#allocation2 + $0x19] sm:$0xff] %vm277_vm2, %v333_v8  ;;  %367 = vst.msk [vmem:[#allocation2 + $0x21] sm:$0xff] %vm277_vm2, %v334_v9 }
  0x2c   : > { %368 = vst.msk [vmem:[#allocation2 + $0x31] sm:$0xff] %vm277_vm2, %v335_v10  ;;  %369 = vst.msk [vmem:[#allocation2 + $0x39] sm:$0xff] %vm277_vm2, %v336_v11 }
  0x2d   : > { %370 = vst.msk [vmem:[#allocation2 + $0x49] sm:$0xff] %vm277_vm2, %v337_v12  ;;  %371 = vst.msk [vmem:[#allocation2 + $0x51] sm:$0xff] %vm277_vm2, %v338_v13 }
  0x2e   : > { %372 = vst.msk [vmem:[#allocation2 + $0x61] sm:$0xff] %vm277_vm2, %v339_v16  ;;  %373 = vst.msk [vmem:[#allocation2 + $0x69] sm:$0xff] %vm277_vm2, %v340_v18  ;;  %v5226_v18 = vld [vmem:[%s7879_s1 + $0xa] sm:$0x3] }
  0x2f   : > { %374 = vst.msk [vmem:[#allocation2 + $0x79] sm:$0xff] %vm277_vm2, %v341_v19  ;;  %375 = vst.msk [vmem:[#allocation2 + $0x81] sm:$0xff] %vm277_vm2, %v342_v20 }
  0x30   : > { %376 = vst.msk [vmem:[#allocation2 + $0x91] sm:$0xff] %vm277_vm2, %v343_v21  ;;  %377 = vst.msk [vmem:[#allocation2 + $0x99] sm:$0xff] %vm277_vm2, %v344_v22  ;;  %v6996_v21 = vand.u32 %v5226_v18, %v6747_v4 }
  0x31   : > { %378 = vst.msk [vmem:[#allocation2 + $0xa9] sm:$0xff] %vm277_vm2, %v345_v23  ;;  %379 = vst.msk [vmem:[#allocation2 + $0xb1] sm:$0xff] %vm277_vm2, %v346_v25 }
  0x32   : > { %380 = vst.msk [vmem:[#allocation2 + $0xc1] sm:$0xff] %vm277_vm2, %v347_v26  ;;  %381 = vst.msk [vmem:[#allocation2 + $0xc9] sm:$0xff] %vm277_vm2, %v348_v27  ;;  %v927_v34 = vld [vmem:[#allocation2 + $0x1a] sm:$0xff]  ;;  %v928_v35 = vld [vmem:[#allocation2 + $0x22] sm:$0xff] }
  0x33   : > { %382 = vst.msk [vmem:[#allocation2 + $0xd9] sm:$0xff] %vm277_vm2, %v349_v28  ;;  %383 = vst.msk [vmem:[#allocation2 + $0xe1] sm:$0xff] %vm277_vm2, %v350_v29  ;;  %v6923_v36 = vpack.c.bf16 %v928_v35, %v927_v34  ;;  %v929_v37 = vld [vmem:[#allocation2 + $0x32] sm:$0xff]  ;;  %v930_v38 = vld [vmem:[#allocation2 + $0x3a] sm:$0xff] }
  0x34   : > { %384 = vst.msk [vmem:[#allocation2 + $0xf1] sm:$0xff] %vm277_vm2, %v351_v30  ;;  %385 = vst.msk [vmem:[#allocation2 + $0xf9] sm:$0xff] %vm277_vm2, %v352_v31  ;;  %v6928_v40 = vpack.c.bf16 %v930_v38, %v929_v37  ;;  %v931_v41 = vld [vmem:[#allocation2 + $0x4a] sm:$0xff]  ;;  %v932_v42 = vld [vmem:[#allocation2 + $0x52] sm:$0xff] }
  0x35   : > { %386 = vst.msk [vmem:[#allocation2 + $0x109] sm:$0xff] %vm277_vm2, %v353_v32  ;;  %387 = vst.msk [vmem:[#allocation2 + $0x111] sm:$0xff] %vm277_vm2, %v354_v33  ;;  %5707 = vmatmul.mubr.msk.bf16.vlgmr.msra.gmra.mrb[0].mxu0 %vm277_vm2, %v6923_v36  ;;  %v933_v43 = vld [vmem:[#allocation2 + $0x62] sm:$0xff]  ;;  %v934_v44 = vld [vmem:[#allocation2 + $0x6a] sm:$0xff]  ;;  %v6936_v45 = vpack.c.bf16 %v932_v42, %v931_v41 }
  0x36   : > { %5739 = vmatpush3.bf16.msra.mxu0 %v6862_v7  ;;  %5710 = vmatprep.mubr.msk.bf16.mxu0 %vm277_vm2, %v6928_v40  ;;  %v6938_v46 = vpack.c.bf16 %v934_v44, %v933_v43  ;;  %v935_v47 = vld [vmem:[#allocation2 + $0x7a] sm:$0xff]  ;;  %v936_v48 = vld [vmem:[#allocation2 + $0x82] sm:$0xff]  ;;  %388 = vst.msk [vmem:[#allocation2 + $0x121] sm:$0xff] %vm277_vm2, %v355_v51  ;;  %389 = vst.msk [vmem:[#allocation2 + $0x129] sm:$0xff] %vm277_vm2, %v356_v52 }
  0x37   : > { %5772 = vmatprep.subr.bf16.mxu0 %v6926_v39  ;;  %v937_v49 = vld [vmem:[#allocation2 + $0x92] sm:$0xff]  ;;  %v938_v50 = vld [vmem:[#allocation2 + $0x9a] sm:$0xff]  ;;  %v6951_v56 = vpack.c.bf16 %v936_v48, %v935_v47  ;;  %390 = vst.msk [vmem:[#allocation2 + $0x139] sm:$0xff] %vm277_vm2, %v357_v53  ;;  %391 = vst.msk [vmem:[#allocation2 + $0x141] sm:$0xff] %vm277_vm2, %v358_v54 }
  0x38   : > { %392 = vst.msk [vmem:[#allocation2 + $0x151] sm:$0xff] %vm277_vm2, %v359_v55  ;;  %v6959_v60 = vpack.c.bf16 %v938_v50, %v937_v49  ;;  %393 = vst.msk [vmem:[#allocation2 + $0x159] sm:$0xff] %vm277_vm2, %v360_v57  ;;  %v939_v63 = vld [vmem:[#allocation2 + $0xaa] sm:$0xff]  ;;  %v940_v0 = vld [vmem:[#allocation2 + $0xb2] sm:$0xff] }
  0x39   : > { %394 = vst.msk [vmem:[#allocation2 + $0x169] sm:$0xff] %vm277_vm2, %v361_v58  ;;  %395 = vst.msk [vmem:[#allocation2 + $0x171] sm:$0xff] %vm277_vm2, %v362_v59  ;;  %v941_v1 = vld [vmem:[#allocation2 + $0xc2] sm:$0xff]  ;;  %v942_v2 = vld [vmem:[#allocation2 + $0xca] sm:$0xff]  ;;  %v6972_v3 = vpack.c.bf16 %v940_v0, %v939_v63 }
  0x3a   : > { %396 = vst.msk [vmem:[#allocation2 + $0x181] sm:$0xff] %vm277_vm2, %v363_v61  ;;  %397 = vst.msk [vmem:[#allocation2 + $0x189] sm:$0xff] %vm277_vm2, %v364_v62  ;;  %v6974_v7 = vpack.c.bf16 %v942_v2, %v941_v1  ;;  %v943_v8 = vld [vmem:[#allocation2 + $0xda] sm:$0xff]  ;;  %v944_v9 = vld [vmem:[#allocation2 + $0xe2] sm:$0xff] }
  0x3b   : > { %v1219_v10 = vld [vmem:[#allocation2 + $0x18] sm:$0xff]  ;;  %v1220_v11 = vld [vmem:[#allocation2 + $0x20] sm:$0xff]  ;;  %v6980_v12 = vpack.c.bf16 %v944_v9, %v943_v8  ;;  %v1221_v14 = vld [vmem:[#allocation2 + $0x30] sm:$0xff]  ;;  %3175 = vst.msk [vmem:[#allocation4] sm:$0xff] %vm3055_vm4, %v6647_v5 }
  0x3c   : > { %v6982_v13 = vpack.c.bf16 %v1220_v11, %v1219_v10  ;;  %v1222_v15 = vld [vmem:[#allocation2 + $0x38] sm:$0xff]  ;;  %v1223_v16 = vld [vmem:[#allocation2 + $0x48] sm:$0xff]  ;;  %v1224_v17 = vld [vmem:[#allocation2 + $0x50] sm:$0xff]  ;;  %3178 = vst.msk [vmem:[#allocation4 + $0x10] sm:$0xff] %vm3055_vm4, %v6647_v5 }
  0x3d   : > { %5711 = vmatmul.mubr.msk.bf16.gmra.mrb[4].mxu0 %vm277_vm2, %v6936_v45  ;;  %v6991_v19 = vpack.c.bf16 %v1222_v15, %v1221_v14  ;;  %v6993_v20 = vpack.c.bf16 %v1224_v17, %v1223_v16  ;;  %v1225_v22 = vld [vmem:[#allocation2 + $0x60] sm:$0xff]  ;;  %v1226_v23 = vld [vmem:[#allocation2 + $0x68] sm:$0xff]  ;;  %v1227_v24 = vld [vmem:[#allocation2 + $0x78] sm:$0xff]  ;;  %3180 = vst.msk [vmem:[#allocation4 + $0x20] sm:$0xff] %vm3055_vm4, %v6647_v5 }
  0x3e   : > { %5714 = vmatprep.mubr.msk.bf16.mxu0 %vm277_vm2, %v6938_v46  ;;  %v1228_v25 = vld [vmem:[#allocation2 + $0x80] sm:$0xff]  ;;  %v7004_v26 = vpack.c.bf16 %v1226_v23, %v1225_v22  ;;  %v1229_v29 = vld [vmem:[#allocation2 + $0x90] sm:$0xff]  ;;  %v1230_v35 = vld [vmem:[#allocation2 + $0x98] sm:$0xff]  ;;  %3182 = vst.msk [vmem:[#allocation4 + $0x30] sm:$0xff] %vm3055_vm4, %v6647_v5 }
  0x3f   : > { %v7006_v27 = vpack.c.bf16 %v1228_v25, %v1227_v24  ;;  %v5142_v28 = vld [vmem:[%s7879_s1 + $0x2] sm:$0x3]  ;;  %v1513_v30 = vld [vmem:[#allocation2 + $0x19] sm:$0xff]  ;;  %v448_v34 = vld [vmem:[#allocation2 + $0x9] sm:$0xff]  ;;  %v7019_v44 = vpack.c.bf16 %v1230_v35, %v1229_v29  ;;  %3184 = vst.msk [vmem:[#allocation4 + $0x40] sm:$0xff] %vm3055_vm4, %v6647_v5 }
  0x40   : > { %v550_v31 = vand.u32 %v5142_v28, %v6747_v4  ;;  %v1514_v32 = vld [vmem:[#allocation2 + $0x21] sm:$0xff]  ;;  %v1515_v37 = vld [vmem:[#allocation2 + $0x31] sm:$0xff]  ;;  %v1516_v38 = vld [vmem:[#allocation2 + $0x39] sm:$0xff]  ;;  %3186 = vst.msk [vmem:[#allocation4 + $0x50] sm:$0xff] %vm3055_vm4, %v6647_v5 }
  0x41   : > { %v447_v33 = vld [vmem:[#allocation2 + $0x1] sm:$0xff]  ;;  %v1232_v42 = vld [vmem:[#allocation2 + $0xb0] sm:$0xff]  ;;  %v7016_v43 = vpack.c.bf16 %v1514_v32, %v1513_v30  ;;  %v7021_v47 = vpack.c.bf16 %v1516_v38, %v1515_v37  ;;  %v1235_v55 = vld [vmem:[#allocation2 + $0xd8] sm:$0xff]  ;;  %3188 = vst.msk [vmem:[#allocation4 + $0x60] sm:$0xff] %vm3055_vm4, %v6647_v5 }
  0x42   : > { %5636 = vmatprep.subr.bf16.mxu1 %v550_v31  ;;  %v1231_v41 = vld [vmem:[#allocation2 + $0xa8] sm:$0xff]  ;;  %v1233_v49 = vld [vmem:[#allocation2 + $0xc0] sm:$0xff]  ;;  %v1518_v51 = vld [vmem:[#allocation2 + $0x51] sm:$0xff]  ;;  %3190 = vst.msk [vmem:[#allocation4 + $0x70] sm:$0xff] %vm3055_vm4, %v6647_v5 }
  0x43   : > { %5637 = vmatpush3.bf16.msra.mxu1 %v550_v31  ;;  %v7023_v48 = vpack.c.bf16 %v1232_v42, %v1231_v41  ;;  %v1517_v50 = vld [vmem:[#allocation2 + $0x49] sm:$0xff]  ;;  %v1519_v53 = vld [vmem:[#allocation2 + $0x61] sm:$0xff]  ;;  %v1521_v0 = vld [vmem:[#allocation2 + $0x79] sm:$0xff]  ;;  %3192 = vst.msk [vmem:[#allocation4 + $0x80] sm:$0xff] %vm3055_vm4, %v6647_v5 }
  0x44   : > { %v1234_v52 = vld [vmem:[#allocation2 + $0xc8] sm:$0xff]  ;;  %v1236_v57 = vld [vmem:[#allocation2 + $0xe0] sm:$0xff]  ;;  %v7033_v58 = vpack.c.bf16 %v1518_v51, %v1517_v50  ;;  %v1237_v63 = vld [vmem:[#allocation2 + $0xf0] sm:$0xff]  ;;  %3194 = vst.msk [vmem:[#allocation4 + $0x90] sm:$0xff] %vm3055_vm4, %v6647_v5 }
  0x45   : > { %5715 = vmatmul.mubr.msk.bf16.gmra.mrb[8].mxu0 %vm277_vm2, %v6951_v56  ;;  %v1520_v54 = vld [vmem:[#allocation2 + $0x69] sm:$0xff]  ;;  %v7035_v59 = vpack.c.bf16 %v1234_v52, %v1233_v49  ;;  %v7039_v62 = vpack.c.bf16 %v1236_v57, %v1235_v55  ;;  %v1522_v1 = vld [vmem:[#allocation2 + $0x81] sm:$0xff]  ;;  %v1238_v2 = vld [vmem:[#allocation2 + $0xf8] sm:$0xff]  ;;  %3181 = vst.msk [vmem:[#allocation4 + $0x28] sm:$0x3] %vm3176_vm5, %v6647_v5 }
  0x46   : > { %5718 = vmatprep.mubr.msk.bf16.mxu0 %vm277_vm2, %v6959_v60  ;;  %v7037_v61 = vpack.c.bf16 %v1520_v54, %v1519_v53  ;;  %v1523_v8 = vld [vmem:[#allocation2 + $0x91] sm:$0xff]  ;;  %v1524_v9 = vld [vmem:[#allocation2 + $0x99] sm:$0xff]  ;;  %v1239_v10 = vld [vmem:[#allocation2 + $0x108] sm:$0xff]  ;;  %v7049_v14 = vpack.c.bf16 %v1522_v1, %v1521_v0  ;;  %v7051_v15 = vpack.c.bf16 %v1238_v2, %v1237_v63  ;;  %3177 = vst.msk [vmem:[#allocation4 + $0x8] sm:$0x3] %vm3176_vm5, %v6647_v5 }
  0x47   : > { %v1240_v11 = vld [vmem:[#allocation2 + $0x110] sm:$0xff]  ;;  %v7053_v16 = vpack.c.bf16 %v1524_v9, %v1523_v8  ;;  %v1241_v18 = vld [vmem:[#allocation2 + $0x120] sm:$0xff]  ;;  %v1242_v24 = vld [vmem:[#allocation2 + $0x128] sm:$0xff]  ;;  %3179 = vst.msk [vmem:[#allocation4 + $0x18] sm:$0x3] %vm3176_vm5, %v6647_v5 }
  0x48   : > { %v7055_v17 = vpack.c.bf16 %v1240_v11, %v1239_v10  ;;  %v1525_v22 = vld [vmem:[#allocation2 + $0xa9] sm:$0xff]  ;;  %v1526_v23 = vld [vmem:[#allocation2 + $0xb1] sm:$0xff]  ;;  %v1527_v25 = vld [vmem:[#allocation2 + $0xc1] sm:$0xff]  ;;  %v7067_v32 = vpack.c.bf16 %v1242_v24, %v1241_v18  ;;  %3183 = vst.msk [vmem:[#allocation4 + $0x38] sm:$0x3] %vm3176_vm5, %v6647_v5 }
  0x49   : > { %v1528_v28 = vld [vmem:[#allocation2 + $0xc9] sm:$0xff]  ;;  %v1243_v29 = vld [vmem:[#allocation2 + $0x138] sm:$0xff]  ;;  %v1244_v30 = vld [vmem:[#allocation2 + $0x140] sm:$0xff]  ;;  %v7065_v31 = vpack.c.bf16 %v1526_v23, %v1525_v22  ;;  %3185 = vst.msk [vmem:[#allocation4 + $0x48] sm:$0x3] %vm3176_vm5, %v6647_v5 }
  0x4a   : > { %v1245_v35 = vld [vmem:[#allocation2 + $0x150] sm:$0xff]  ;;  %v1529_v37 = vld [vmem:[#allocation2 + $0xd9] sm:$0xff]  ;;  %v1530_v38 = vld [vmem:[#allocation2 + $0xe1] sm:$0xff]  ;;  %3187 = vst.msk [vmem:[#allocation4 + $0x58] sm:$0x3] %vm3176_vm5, %v6647_v5 }
  0x4b   : > { %v1531_v41 = vld [vmem:[#allocation2 + $0xf1] sm:$0xff]  ;;  %v1532_v42 = vld [vmem:[#allocation2 + $0xf9] sm:$0xff]  ;;  %v1247_v49 = vld [vmem:[#allocation2 + $0x168] sm:$0xff]  ;;  %v7081_v51 = vpack.c.bf16 %v1530_v38, %v1529_v37  ;;  %3189 = vst.msk [vmem:[#allocation4 + $0x68] sm:$0x3] %vm3176_vm5, %v6647_v5 }
  0x4c   : > { %v1248_v50 = vld [vmem:[#allocation2 + $0x170] sm:$0xff]  ;;  %v7085_v53 = vpack.c.bf16 %v1532_v42, %v1531_v41  ;;  %v1249_v55 = vld [vmem:[#allocation2 + $0x180] sm:$0xff]  ;;  %v1250_v0 = vld [vmem:[#allocation2 + $0x188] sm:$0xff]  ;;  %3191 = vst.msk [vmem:[#allocation4 + $0x78] sm:$0x3] %vm3176_vm5, %v6647_v5 }
  0x4d   : > { %5719 = vmatmul.mubr.msk.bf16.gmra.mrb[12].mxu0 %vm277_vm2, %v6972_v3  ;;  %v7087_v54 = vpack.c.bf16 %v1248_v50, %v1247_v49  ;;  %v1533_v57 = vld [vmem:[#allocation2 + $0x109] sm:$0xff]  ;;  %v1534_v63 = vld [vmem:[#allocation2 + $0x111] sm:$0xff]  ;;  %v1535_v1 = vld [vmem:[#allocation2 + $0x121] sm:$0xff]  ;;  %v7099_v9 = vpack.c.bf16 %v1250_v0, %v1249_v55  ;;  %3193 = vst.msk [vmem:[#allocation4 + $0x88] sm:$0x3] %vm3176_vm5, %v6647_v5 }
  0x4e   : > { %5722 = vmatprep.mubr.msk.bf16.mxu0 %vm277_vm2, %v6974_v7  ;;  %v1536_v2 = vld [vmem:[#allocation2 + $0x129] sm:$0xff]  ;;  %v7097_v8 = vpack.c.bf16 %v1534_v63, %v1533_v57  ;;  %v1537_v11 = vld [vmem:[#allocation2 + $0x139] sm:$0xff]  ;;  %v1538_v18 = vld [vmem:[#allocation2 + $0x141] sm:$0xff]  ;;  %3195 = vst.msk [vmem:[#allocation4 + $0x98] sm:$0x3] %vm3176_vm5, %v6647_v5 }
  0x4f   : > { %v7101_v10 = vpack.c.bf16 %v1536_v2, %v1535_v1  ;;  %v1539_v22 = vld [vmem:[#allocation2 + $0x151] sm:$0xff]  ;;  %v1540_v23 = vld [vmem:[#allocation2 + $0x159] sm:$0xff]  ;;  %v7111_v24 = vpack.c.bf16 %v1538_v18, %v1537_v11  ;;  %v5260_v49 = vld [vmem:[%s7879_s1 + $0xe] sm:$0x3] }
  0x50   : > { %v446_v37 = vld [vmem:[%s7879_s1] sm:$0x3]  ;;  %v2495_v50 = vand.u32 %v5260_v49, %v6747_v4  ;;  %v1827_v63 = vld [vmem:[#allocation2 + $0x10a] sm:$0xff]  ;;  %v1832_v11 = vld [vmem:[#allocation2 + $0x142] sm:$0xff] }
  0x51   : > { %v762_v38 = vand.u32 %v6747_v4, %v446_v37  ;;  %v1826_v55 = vld [vmem:[#allocation2 + $0xfa] sm:$0xff]  ;;  %v1830_v0 = vld [vmem:[#allocation2 + $0x12a] sm:$0xff] }
  0x52   : > { %v1834_v18 = vld [vmem:[#allocation2 + $0x15a] sm:$0xff] }
  0x53   : > { %5670 = vmatprep.subr.bf16.mxu1 %v762_v38 }
  0x55   : > { %5723 = vmatmul.mubr.msk.bf16.gmra.mrb[16].mxu0 %vm277_vm2, %v6980_v12 }
  0x56   : > { %5740 = vmatprep.mubr.msk.bf16.mxu0 %vm277_vm2, %v6982_v13 }
  0x5d   : > { %5741 = vmatmul.mubr.msk.bf16.vlgmr.msra.gmra.mrb[0].mxu0 %vm277_vm2, %v6991_v19 }
  0x5e   : > { %5773 = vmatpush3.bf16.msra.mxu0 %v6926_v39  ;;  %5744 = vmatprep.mubr.msk.bf16.mxu0 %vm277_vm2, %v6993_v20  ;;  %v479_v39 = vpack.c.bf16 %v448_v34, %v447_v33  ;;  %v7069_v33 = vpack.c.bf16 %v1528_v28, %v1527_v25  ;;  %v7071_v34 = vpack.c.bf16 %v1244_v30, %v1243_v29  ;;  %v5243_v25 = vld [vmem:[%s7879_s1 + $0xc] sm:$0x3]  ;;  %v1542_v30 = vld [vmem:[#allocation2 + $0x171] sm:$0xff] }
  0x5f   : > { %5806 = vmatprep.subr.bf16.mxu0 %v6996_v21  ;;  %v7116_v28 = vpack.c.bf16 %v1540_v23, %v1539_v22  ;;  %v2201_v29 = vand.u32 %v5243_v25, %v6747_v4  ;;  %v1836_v25 = vld [vmem:[#allocation2 + $0x172] sm:$0xff] }
  0x60   : > { %5638 = vmatprep.mubr.msk.bf16.mxu1 %vm277_vm2, %v479_v39  ;;  %v1246_v39 = vld [vmem:[#allocation2 + $0x158] sm:$0xff] }
  0x61   : > { %5639 = vmatmul.mubr.msk.bf16.vlgmr.msra.gmra.mrb[0].mxu1 %vm277_vm2, %v7016_v43  ;;  %v7083_v52 = vpack.c.bf16 %v1246_v39, %v1245_v35  ;;  %v398_v39 = vld [vmem:[#allocation2] sm:$0xff] }
  0x62   : > { %5642 = vmatprep.mubr.msk.bf16.mxu1 %vm277_vm2, %v7021_v47  ;;  %5671 = vmatpush3.bf16.msra.mxu1 %v762_v38 }
  0x63   : > { %6128 = vmatprep.subr.bf16.mxu1 %v6859_v6 }
  0x65   : > { %5745 = vmatmul.mubr.msk.bf16.gmra.mrb[4].mxu0 %vm277_vm2, %v7004_v26 }
  0x66   : > { %5748 = vmatprep.mubr.msk.bf16.mxu0 %vm277_vm2, %v7006_v27 }
  0x69   : > { %5643 = vmatmul.mubr.msk.bf16.gmra.mrb[4].mxu1 %vm277_vm2, %v7033_v58 }
  0x6a   : > { %5646 = vmatprep.mubr.msk.bf16.mxu1 %vm277_vm2, %v7037_v61 }
  0x6d   : > { %5749 = vmatmul.mubr.msk.bf16.gmra.mrb[8].mxu0 %vm277_vm2, %v7019_v44 }
  0x6e   : > { %5752 = vmatprep.mubr.msk.bf16.mxu0 %vm277_vm2, %v7023_v48 }
  0x71   : > { %5647 = vmatmul.mubr.msk.bf16.gmra.mrb[8].mxu1 %vm277_vm2, %v7049_v14 }
  0x72   : > { %5650 = vmatprep.mubr.msk.bf16.mxu1 %vm277_vm2, %v7053_v16 }
  0x75   : > { %5753 = vmatmul.mubr.msk.bf16.gmra.mrb[12].mxu0 %vm277_vm2, %v7035_v59 }
  0x76   : > { %5756 = vmatprep.mubr.msk.bf16.mxu0 %vm277_vm2, %v7039_v62 }
  0x79   : > { %5651 = vmatmul.mubr.msk.bf16.gmra.mrb[12].mxu1 %vm277_vm2, %v7065_v31 }
  0x7a   : > { %5654 = vmatprep.mubr.msk.bf16.mxu1 %vm277_vm2, %v7069_v33 }
  0x7d   : > { %5757 = vmatmul.mubr.msk.bf16.gmra.mrb[16].mxu0 %vm277_vm2, %v7051_v15 }
  0x7e   : > { %5760 = vmatprep.mubr.msk.bf16.mxu0 %vm277_vm2, %v7055_v17 }
  0x81   : > { %5655 = vmatmul.mubr.msk.bf16.gmra.mrb[16].mxu1 %vm277_vm2, %v7081_v51 }
  0x82   : > { %5658 = vmatprep.mubr.msk.bf16.mxu1 %vm277_vm2, %v7085_v53 }
  0x85   : > { %5761 = vmatmul.mubr.msk.bf16.gmra.mrb[20].mxu0 %vm277_vm2, %v7067_v32 }
  0x86   : > { %5764 = vmatprep.mubr.msk.bf16.mxu0 %vm277_vm2, %v7071_v34 }
  0x89   : > { %5659 = vmatmul.mubr.msk.bf16.gmra.mrb[20].mxu1 %vm277_vm2, %v7097_v8 }
  0x8a   : > { %5662 = vmatprep.mubr.msk.bf16.mxu1 %vm277_vm2, %v7101_v10 }
  0x8d   : > { %5765 = vmatmul.mubr.msk.bf16.gmra.mrb[24].mxu0 %vm277_vm2, %v7083_v52 }
  0x8e   : > { %5768 = vmatprep.mubr.msk.bf16.mxu0 %vm277_vm2, %v7087_v54 }
  0x91   : > { %5663 = vmatmul.mubr.msk.bf16.gmra.mrb[24].mxu1 %vm277_vm2, %v7111_v24 }
  0x92   : > { %5666 = vmatprep.mubr.msk.bf16.mxu1 %vm277_vm2, %v7116_v28 }
  0x95   : > { %5769 = vmatmul.mubr.msk.bf16.gmra.mrb[28].mxu0 %vm277_vm2, %v7099_v9 }
  0x96   : > { %5774 = vmatprep.mubr.msk.bf16.mxu0 %vm277_vm2, %v7016_v43  ;;  %v1541_v43 = vld [vmem:[#allocation2 + $0x169] sm:$0xff] }
  0x97   : > { %v7128_v35 = vpack.c.bf16 %v1542_v30, %v1541_v43  ;;  %v5277_v43 = vld [vmem:[%s7879_s1 + $0x10] sm:$0x3] }
  0x98   : > { %v2789_v30 = vand.u32 %v5277_v43, %v6747_v4  ;;  %v2132_v4 = vld [vmem:[#allocation2 + $0x198] sm:$0xff] }
  0x99   : > { %5667 = vmatmul.mubr.msk.bf16.gmra.mrb[28].mxu1 %vm277_vm2, %v7128_v35 }
  0x9d   : > { %5775 = vmatmul.mubr.msk.bf16.vlgmr.msra.gmra.mrb[0].mxu0 %vm277_vm2, %v7021_v47 }
  0x9e   : > { %5807 = vmatpush3.bf16.msra.mxu0 %v6996_v21  ;;  %5778 = vmatprep.mubr.msk.bf16.mxu0 %vm277_vm2, %v7033_v58  ;;  %v399_v21 = vld [vmem:[#allocation2 + $0x8] sm:$0xff] }
  0x9f   : > { %5840 = vmatprep.subr.bf16.mxu0 %v2201_v29  ;;  %v430_v41 = vpack.c.bf16 %v399_v21, %v398_v39  ;;  %v2696_v39 = vld [vmem:[#allocation2 + $0x7a] sm:$0xff]  ;;  %v2697_v21 = vld [vmem:[#allocation2 + $0x82] sm:$0xff] }
  0xa1   : > { %5672 = vmatprep.mubr.msk.bf16.mxu1 %vm277_vm2, %v430_v41 }
  0xa2   : > { %5673 = vmatmul.mubr.msk.bf16.vlgmr.msra.gmra.mrb[0].mxu1 %vm277_vm2, %v6982_v13  ;;  %v1544_v13 = vld [vmem:[#allocation2 + $0x189] sm:$0xff] }
  0xa3   : > { %5676 = vmatprep.mubr.msk.bf16.mxu1 %vm277_vm2, %v6991_v19  ;;  %6129 = vmatpush3.bf16.msra.mxu1 %v6859_v6  ;;  %v1543_v6 = vld [vmem:[#allocation2 + $0x181] sm:$0xff] }
  0xa4   : > { %v7183_v42 = vpack.c.bf16 %v1544_v13, %v1543_v6  ;;  %v2698_v6 = vld [vmem:[#allocation2 + $0x92] sm:$0xff]  ;;  %v2699_v13 = vld [vmem:[#allocation2 + $0x9a] sm:$0xff] }
  0xa5   : > { %5779 = vmatmul.mubr.msk.bf16.gmra.mrb[4].mxu0 %vm277_vm2, %v7037_v61 }
  0xa6   : > { %5782 = vmatprep.mubr.msk.bf16.mxu0 %vm277_vm2, %v7049_v14 }
  0xaa   : > { %5677 = vmatmul.mubr.msk.bf16.gmra.mrb[4].mxu1 %vm277_vm2, %v6993_v20 }
  0xab   : > { %5680 = vmatprep.mubr.msk.bf16.mxu1 %vm277_vm2, %v7004_v26 }
  0xad   : > { %5783 = vmatmul.mubr.msk.bf16.gmra.mrb[8].mxu0 %vm277_vm2, %v7053_v16 }
  0xae   : > { %5786 = vmatprep.mubr.msk.bf16.mxu0 %vm277_vm2, %v7065_v31 }
  0xb2   : > { %5681 = vmatmul.mubr.msk.bf16.gmra.mrb[8].mxu1 %vm277_vm2, %v7006_v27 }
  0xb3   : > { %5684 = vmatprep.mubr.msk.bf16.mxu1 %vm277_vm2, %v7019_v44 }
  0xb5   : > { %5787 = vmatmul.mubr.msk.bf16.gmra.mrb[12].mxu0 %vm277_vm2, %v7069_v33 }
  0xb6   : > { %5790 = vmatprep.mubr.msk.bf16.mxu0 %vm277_vm2, %v7081_v51 }
  0xba   : > { %5685 = vmatmul.mubr.msk.bf16.gmra.mrb[12].mxu1 %vm277_vm2, %v7023_v48 }
  0xbb   : > { %5688 = vmatprep.mubr.msk.bf16.mxu1 %vm277_vm2, %v7035_v59 }
  0xbd   : > { %5791 = vmatmul.mubr.msk.bf16.gmra.mrb[16].mxu0 %vm277_vm2, %v7085_v53 }
  0xbe   : > { %5794 = vmatprep.mubr.msk.bf16.mxu0 %vm277_vm2, %v7097_v8 }
  0xc2   : > { %5689 = vmatmul.mubr.msk.bf16.gmra.mrb[16].mxu1 %vm277_vm2, %v7039_v62 }
  0xc3   : > { %5692 = vmatprep.mubr.msk.bf16.mxu1 %vm277_vm2, %v7051_v15 }
  0xc5   : > { %5795 = vmatmul.mubr.msk.bf16.gmra.mrb[20].mxu0 %vm277_vm2, %v7101_v10 }
  0xc6   : > { %5798 = vmatprep.mubr.msk.bf16.mxu0 %vm277_vm2, %v7111_v24 }
  0xca   : > { %5693 = vmatmul.mubr.msk.bf16.gmra.mrb[20].mxu1 %vm277_vm2, %v7055_v17 }
  0xcb   : > { %5696 = vmatprep.mubr.msk.bf16.mxu1 %vm277_vm2, %v7067_v32 }
  0xcd   : > { %5799 = vmatmul.mubr.msk.bf16.gmra.mrb[24].mxu0 %vm277_vm2, %v7116_v28 }
  0xce   : > { %5802 = vmatprep.mubr.msk.bf16.mxu0 %vm277_vm2, %v7128_v35 }
  0xd2   : > { %5697 = vmatmul.mubr.msk.bf16.gmra.mrb[24].mxu1 %vm277_vm2, %v7071_v34 }
  0xd3   : > { %5700 = vmatprep.mubr.msk.bf16.mxu1 %vm277_vm2, %v7083_v52 }
  0xd5   : > { %5803 = vmatmul.mubr.msk.bf16.gmra.mrb[28].mxu0 %vm277_vm2, %v7183_v42 }
  0xd6   : > { %5808 = vmatprep.mubr.msk.bf16.mxu0 %vm277_vm2, %v6923_v36  ;;  %v1825_v36 = vld [vmem:[#allocation2 + $0xf2] sm:$0xff] }
  0xd7   : > { %v7205_v57 = vpack.c.bf16 %v1826_v55, %v1825_v36  ;;  %v2726_v36 = vpack.c.bf16 %v2699_v13, %v2698_v6  ;;  %v2700_v55 = vld [vmem:[#allocation2 + $0xaa] sm:$0xff] }
  0xda   : > { %5701 = vmatmul.mubr.msk.bf16.gmra.mrb[28].mxu1 %vm277_vm2, %v7087_v54 }
  0xdb   : > { %5726 = vmatprep.mubr.msk.bf16.mxu1 %vm277_vm2, %v7205_v57 }
  0xdd   : > { %5809 = vmatmul.mubr.msk.bf16.vlgmr.msra.gmra.mrb[0].mxu0 %vm277_vm2, %v6928_v40  ;;  %v1828_v40 = vld [vmem:[#allocation2 + $0x112] sm:$0xff] }
  0xde   : > { %5841 = vmatpush3.bf16.msra.mxu0 %v2201_v29  ;;  %5812 = vmatprep.mubr.msk.bf16.mxu0 %vm277_vm2, %v6936_v45  ;;  %v1829_v45 = vld [vmem:[#allocation2 + $0x122] sm:$0xff]  ;;  %v7215_v1 = vpack.c.bf16 %v1828_v40, %v1827_v63  ;;  %v2701_v63 = vld [vmem:[#allocation2 + $0xb2] sm:$0xff] }
  0xdf   : > { %5874 = vmatprep.subr.bf16.mxu0 %v2495_v50  ;;  %v7217_v2 = vpack.c.bf16 %v1830_v0, %v1829_v45  ;;  %v2702_v40 = vld [vmem:[#allocation2 + $0xc2] sm:$0xff]  ;;  %v2703_v45 = vld [vmem:[#allocation2 + $0xca] sm:$0xff]  ;;  %v2727_v0 = vpack.c.bf16 %v2701_v63, %v2700_v55 }
  0xe2   : > { %5727 = vmatmul.mubr.msk.bf16.vlgmr.msra.gmra.mrb[20].mxu1 %vm277_vm2, %v7215_v1 }
  0xe3   : > { %5730 = vmatprep.mubr.msk.bf16.mxu1 %vm277_vm2, %v7217_v2 }
  0xe5   : > { %5813 = vmatmul.mubr.msk.bf16.gmra.mrb[4].mxu0 %vm277_vm2, %v6938_v46  ;;  %v1831_v46 = vld [vmem:[#allocation2 + $0x13a] sm:$0xff] }
  0xe6   : > { %5816 = vmatprep.mubr.msk.bf16.mxu0 %vm277_vm2, %v6951_v56  ;;  %v1833_v56 = vld [vmem:[#allocation2 + $0x152] sm:$0xff]  ;;  %v7227_v22 = vpack.c.bf16 %v1832_v11, %v1831_v46  ;;  %v2728_v46 = vpack.c.bf16 %v2703_v45, %v2702_v40  ;;  %v2704_v11 = vld [vmem:[#allocation2 + $0xda] sm:$0xff] }
  0xe7   : > { %v7229_v23 = vpack.c.bf16 %v1834_v18, %v1833_v56  ;;  %v2705_v56 = vld [vmem:[#allocation2 + $0xe2] sm:$0xff] }
  0xe8   : > { %v2729_v18 = vpack.c.bf16 %v2705_v56, %v2704_v11 }
  0xea   : > { %5731 = vmatmul.mubr.msk.bf16.gmra.mrb[24].mxu1 %vm277_vm2, %v7227_v22 }
  0xeb   : > { %5734 = vmatprep.mubr.msk.bf16.mxu1 %vm277_vm2, %v7229_v23 }
  0xed   : > { %5817 = vmatmul.mubr.msk.bf16.gmra.mrb[8].mxu0 %vm277_vm2, %v6959_v60  ;;  %v1835_v60 = vld [vmem:[#allocation2 + $0x16a] sm:$0xff] }
  0xee   : > { %5820 = vmatprep.mubr.msk.bf16.mxu0 %vm277_vm2, %v6972_v3  ;;  %v7239_v3 = vpack.c.bf16 %v1836_v25, %v1835_v60 }
  0xf2   : > { %5735 = vmatmul.mubr.msk.bf16.gmra.mrb[28].mxu1 %vm277_vm2, %v7239_v3 }
  0xf5   : > { %5821 = vmatmul.mubr.msk.bf16.gmra.mrb[12].mxu0 %vm277_vm2, %v6974_v7  ;;  %v1837_v7 = vld [vmem:[#allocation2 + $0x182] sm:$0xff] }
  0xf6   : > { %5824 = vmatprep.mubr.msk.bf16.mxu0 %vm277_vm2, %v6980_v12  ;;  %v1838_v12 = vld [vmem:[#allocation2 + $0x18a] sm:$0xff] }
  0xf7   : > { %v7255_v29 = vpack.c.bf16 %v1838_v12, %v1837_v7 }
  0xfd   : > { %5825 = vmatmul.mubr.msk.bf16.gmra.mrb[16].mxu0 %vm277_vm2, %v7205_v57 }
  0xfe   : > { %5828 = vmatprep.mubr.msk.bf16.mxu0 %vm277_vm2, %v7215_v1 }
 0x105   : > { %5829 = vmatmul.mubr.msk.bf16.gmra.mrb[20].mxu0 %vm277_vm2, %v7217_v2 }
 0x106   : > { %5832 = vmatprep.mubr.msk.bf16.mxu0 %vm277_vm2, %v7227_v22 }
 0x10d   : > { %5833 = vmatmul.mubr.msk.bf16.gmra.mrb[24].mxu0 %vm277_vm2, %v7229_v23 }
 0x10e   : > { %5836 = vmatprep.mubr.msk.bf16.mxu0 %vm277_vm2, %v7239_v3 }
 0x115   : > { %5837 = vmatmul.mubr.msk.bf16.gmra.mrb[28].mxu0 %vm277_vm2, %v7255_v29 }
 0x116   : > { %5842 = vmatprep.mubr.msk.bf16.mxu0 %vm277_vm2, %v6991_v19  ;;  %v2133_v19 = vld [vmem:[#allocation2 + $0x1a0] sm:$0xff] }
 0x11d   : > { %5843 = vmatmul.mubr.msk.bf16.vlgmr.msra.gmra.mrb[0].mxu0 %vm277_vm2, %v6993_v20  ;;  %v2149_v20 = vpack.c.bf16 %v2133_v19, %v2132_v4  ;;  %v2721_v4 = vld [vmem:[#allocation2 + $0x1a2] sm:$0xff] }
 0x11e   : > { %5875 = vmatpush3.bf16.msra.mxu0 %v2495_v50  ;;  %5846 = vmatprep.mubr.msk.bf16.mxu0 %vm277_vm2, %v7004_v26  ;;  %v2725_v50 = vpack.c.bf16 %v2697_v21, %v2696_v39 }
 0x11f   : > { %5908 = vmatprep.subr.bf16.mxu0 %v2789_v30 }
 0x125   : > { %5847 = vmatmul.mubr.msk.bf16.gmra.mrb[4].mxu0 %vm277_vm2, %v7006_v27 }
 0x126   : > { %5850 = vmatprep.mubr.msk.bf16.mxu0 %vm277_vm2, %v7019_v44 }
 0x12d   : > { %5851 = vmatmul.mubr.msk.bf16.gmra.mrb[8].mxu0 %vm277_vm2, %v7023_v48 }
 0x12e   : > { %5854 = vmatprep.mubr.msk.bf16.mxu0 %vm277_vm2, %v7035_v59 }
 0x135   : > { %5855 = vmatmul.mubr.msk.bf16.gmra.mrb[12].mxu0 %vm277_vm2, %v7039_v62 }
 0x136   : > { %5858 = vmatprep.mubr.msk.bf16.mxu0 %vm277_vm2, %v7051_v15  ;;  %v2427_v15 = vld [vmem:[#allocation2 + $0x1a1] sm:$0xff] }
 0x13d   : > { %5859 = vmatmul.mubr.msk.bf16.gmra.mrb[16].mxu0 %vm277_vm2, %v7055_v17  ;;  %v2690_v17 = vld [vmem:[#allocation2 + $0x32] sm:$0xff] }
 0x13e   : > { %5862 = vmatprep.mubr.msk.bf16.mxu0 %vm277_vm2, %v7067_v32 }
 0x145   : > { %5863 = vmatmul.mubr.msk.bf16.gmra.mrb[20].mxu0 %vm277_vm2, %v7071_v34 }
 0x146   : > { %5866 = vmatprep.mubr.msk.bf16.mxu0 %vm277_vm2, %v7083_v52 }
 0x14d   : > { %5867 = vmatmul.mubr.msk.bf16.gmra.mrb[24].mxu0 %vm277_vm2, %v7087_v54  ;;  %v2693_v54 = vld [vmem:[#allocation2 + $0x52] sm:$0xff] }
 0x14e   : > { %5870 = vmatprep.mubr.msk.bf16.mxu0 %vm277_vm2, %v7099_v9  ;;  %v2694_v9 = vld [vmem:[#allocation2 + $0x62] sm:$0xff] }
 0x155   : > { %5871 = vmatmul.mubr.msk.bf16.gmra.mrb[28].mxu0 %vm277_vm2, %v2149_v20 }
 0x156   : > { %5876 = vmatprep.mubr.msk.bf16.mxu0 %vm277_vm2, %v7021_v47 }
 0x15d   : > { %5877 = vmatmul.mubr.msk.bf16.vlgmr.msra.gmra.mrb[0].mxu0 %vm277_vm2, %v7033_v58 }
 0x15e   : > { %5909 = vmatpush3.bf16.msra.mxu0 %v2789_v30  ;;  %5880 = vmatprep.mubr.msk.bf16.mxu0 %vm277_vm2, %v7037_v61 }
 0x165   : > { %5881 = vmatmul.mubr.msk.bf16.gmra.mrb[4].mxu0 %vm277_vm2, %v7049_v14  ;;  %v2426_v14 = vld [vmem:[#allocation2 + $0x199] sm:$0xff] }
 0x166   : > { %5884 = vmatprep.mubr.msk.bf16.mxu0 %vm277_vm2, %v7053_v16  ;;  %v2443_v34 = vpack.c.bf16 %v2427_v15, %v2426_v14  ;;  %v7450_v15 = vld [vmem:[%s7881_s3] sm:$0xf] }
 0x16d   : > { %5885 = vmatmul.mubr.msk.bf16.gmra.mrb[8].mxu0 %vm277_vm2, %v7065_v31  ;;  %v2691_v31 = vld [vmem:[#allocation2 + $0x3a] sm:$0xff] }
 0x16e   : > { %5888 = vmatprep.mubr.msk.bf16.mxu0 %vm277_vm2, %v7069_v33 }
 0x175   : > { %5889 = vmatmul.mubr.msk.bf16.gmra.mrb[12].mxu0 %vm277_vm2, %v7081_v51  ;;  %v7314_v26 = vpop.f32.mrb[0].mxu1  ;;  %v2722_v51 = vpack.c.bf16 %v2691_v31, %v2690_v17  ;;  %v7457_v31 = vld [vmem:[%s7880_s2] ss:$0 sm:$0xff] }
 0x176   : > { %5892 = vmatprep.mubr.msk.bf16.mxu0 %vm277_vm2, %v7085_v53  ;;  %v7318_v27 = vpop.f32.mrb[1].mxu1  ;;  %v2692_v53 = vld [vmem:[#allocation2 + $0x4a] sm:$0xff] }
 0x177   : > { %v7320_v44 = vpop.f32.mrb[2].mxu1 }
 0x178   : > { %v7322_v47 = vpop.f32.mrb[3].mxu1 }
 0x17d   : > { %5893 = vmatmul.mubr.msk.bf16.gmra.mrb[16].mxu0 %vm277_vm2, %v7097_v8  ;;  %v7326_v48 = vpop.f32.mrb[4].mxu1 }
 0x17e   : > { %5896 = vmatprep.mubr.msk.bf16.mxu0 %vm277_vm2, %v7101_v10  ;;  %v7330_v58 = vpop.f32.mrb[5].mxu1  ;;  %v2695_v10 = vld [vmem:[#allocation2 + $0x6a] sm:$0xff] }
 0x17f   : > { %v7332_v59 = vpop.f32.mrb[6].mxu1  ;;  %v2724_v37 = vpack.c.bf16 %v2695_v10, %v2694_v9 }
 0x180   : > { %v7334_v61 = vpop.f32.mrb[7].mxu1 }
 0x185   : > { %5897 = vmatmul.mubr.msk.bf16.gmra.mrb[20].mxu0 %vm277_vm2, %v7111_v24  ;;  %v7338_v62 = vpop.f32.mrb[8].mxu1 }
 0x186   : > { %5900 = vmatprep.mubr.msk.bf16.mxu0 %vm277_vm2, %v7116_v28  ;;  %v7342_v16 = vpop.f32.mrb[9].mxu1 }
 0x187   : > { %v7344_v32 = vpop.f32.mrb[10].mxu1 }
 0x188   : > { %v7346_v33 = vpop.f32.mrb[11].mxu1 }
 0x18d   : > { %5901 = vmatmul.mubr.msk.bf16.gmra.mrb[24].mxu0 %vm277_vm2, %v7128_v35  ;;  %v7349_v52 = vpop.f32.mrb[12].mxu1  ;;  %v2723_v35 = vpack.c.bf16 %v2693_v54, %v2692_v53 }
 0x18e   : > { %5904 = vmatprep.mubr.msk.bf16.mxu0 %vm277_vm2, %v7183_v42  ;;  %v7352_v8 = vpop.f32.mrb[13].mxu1 }
 0x18f   : > { %v7354_v24 = vpop.f32.mrb[14].mxu1 }
 0x190   : > { %v7356_v28 = vpop.f32.mrb[15].mxu1 }
 0x195   : > { %5905 = vmatmul.mubr.msk.bf16.gmra.mrb[28].mxu0 %vm277_vm2, %v2443_v34  ;;  %v7359_v38 = vpop.f32.mrb[16].mxu1 }
 0x196   : > { %5910 = vmatprep.mubr.msk.bf16.mxu0 %vm277_vm2, %v2722_v51  ;;  %v7362_v41 = vpop.f32.mrb[17].mxu1 }
 0x197   : > { %v7364_v42 = vpop.f32.mrb[18].mxu1 }
 0x198   : > { %v7366_v49 = vpop.f32.mrb[19].mxu1 }
 0x19d   : > { %5911 = vmatmul.mubr.msk.bf16.vlgmr.msra.gmra.mrb[0].mxu0 %vm277_vm2, %v2723_v35 }
 0x19e   : > { %5914 = vmatprep.mubr.msk.bf16.mxu0 %vm277_vm2, %v2724_v37 }
 0x1a5   : > { %5915 = vmatmul.mubr.msk.bf16.gmra.mrb[4].mxu0 %vm277_vm2, %v2725_v50 }
 0x1a6   : > { %5918 = vmatprep.mubr.msk.bf16.mxu0 %vm277_vm2, %v2726_v36 }
 0x1ad   : > { %5919 = vmatmul.mubr.msk.bf16.gmra.mrb[8].mxu0 %vm277_vm2, %v2727_v0 }
 0x1ae   : > { %5922 = vmatprep.mubr.msk.bf16.mxu0 %vm277_vm2, %v2728_v46 }
 0x1b5   : > { %5923 = vmatmul.mubr.msk.bf16.gmra.mrb[12].mxu0 %vm277_vm2, %v2729_v18  ;;  %v7377_v60 = vpop.f32.mrb[20].mxu1 }
 0x1b6   : > { %5926 = vmatprep.mubr.msk.bf16.mxu0 %vm277_vm2, %v7205_v57  ;;  %v7381_v25 = vpop.f32.mrb[21].mxu1 }
 0x1b7   : > { %v7383_v7 = vpop.f32.mrb[22].mxu1 }
 0x1b8   : > { %v7385_v12 = vpop.f32.mrb[23].mxu1 }
 0x1bd   : > { %5927 = vmatmul.mubr.msk.bf16.gmra.mrb[16].mxu0 %vm277_vm2, %v7215_v1  ;;  %v7389_v43 = vpop.f32.mrb[24].mxu1 }
 0x1be   : > { %5930 = vmatprep.mubr.msk.bf16.mxu0 %vm277_vm2, %v7217_v2  ;;  %v7393_v57 = vpop.f32.mrb[25].mxu1 }
 0x1bf   : > { %v7395_v1 = vpop.f32.mrb[26].mxu1 }
 0x1c0   : > { %v7397_v30 = vpop.f32.mrb[27].mxu1 }
 0x1c5   : > { %5931 = vmatmul.mubr.msk.bf16.gmra.mrb[20].mxu0 %vm277_vm2, %v7227_v22  ;;  %v7401_v2 = vpop.f32.mrb[28].mxu1  ;;  %v2720_v22 = vld [vmem:[#allocation2 + $0x19a] sm:$0xff] }
 0x1c6   : > { %5934 = vmatprep.mubr.msk.bf16.mxu0 %vm277_vm2, %v7229_v23  ;;  %v7405_v19 = vpop.f32.mrb[29].mxu1  ;;  %v2737_v14 = vpack.c.bf16 %v2721_v4, %v2720_v22 }
 0x1c7   : > { %v7407_v20 = vpop.f32.mrb[30].mxu1 }
 0x1c8   : > { %v7409_v23 = vpop.f32.mrb[31].mxu1 }
 0x1cd   : > { %5935 = vmatmul.mubr.msk.bf16.gmra.mrb[24].mxu0 %vm277_vm2, %v7239_v3  ;;  %v5295_v3 = vld [vmem:[%s7881_s3 + $0x4] sm:$0xf] }
 0x1ce   : > { %5938 = vmatprep.mubr.msk.bf16.mxu0 %vm277_vm2, %v7255_v29  ;;  %6511 = vmatprep.subr.msk.bf16.mxu1 %vm3244_vm6, %v5295_v3  ;;  %v3246_v29 = vsel %vm3244_vm6, %v5295_v3, 0 }
 0x1cf   : > { %5943 = vmatpush3.bf16.msra.mxu1 %v3246_v29 }
 0x1d0   : > { %6512 = vmatprep.subr.msk.bf16.mxu1 %vm3244_vm6, %v7450_v15 }
 0x1d5   : > { %5939 = vmatmul.mubr.msk.bf16.gmra.mrb[28].mxu0 %vm277_vm2, %v2737_v14 }
 0x270   : > { %v5912_v17 = vpop.f32.mrb[0].mxu0 }
 0x271   : > { %v6130_v34 = vadd.f32 %v5912_v17, %v7314_v26  ;;  %v2825_v51 = vpop.f32.mrb[1].mxu0 }
 0x272   : > { %v6131_v53 = vadd.f32 %v2825_v51, %v7318_v27  ;;  %v5913_v54 = vpop.f32.mrb[2].mxu0 }
 0x273   : > { %v2993_v9 = vadd.f32 %v6130_v34, %v7457_v31  ;;  %v6132_v10 = vadd.f32 %v5913_v54, %v7320_v44  ;;  %v2828_v35 = vpop.f32.mrb[3].mxu0 }
 0x274   : > { %v2991_v37 = vadd.f32 %v6131_v53, %v7457_v31  ;;  %v6133_v39 = vadd.f32 %v2828_v35, %v7322_v47 }
 0x275   : > { %v3025_v21 = vmax.f32 %v2993_v9, 0.0  ;;  %v2994_v6 = vadd.f32 %v6132_v10, %v7457_v31 }
 0x276   : > { %v3023_v13 = vmax.f32 %v2991_v37, 0.0  ;;  %v2992_v50 = vadd.f32 %v6133_v39, %v7457_v31 }
 0x277   : > { %3058 = vst.msk [vmem:[#allocation3 + $0x10] sm:$0xff] %vm3055_vm4, %v3025_v21  ;;  %v3026_v26 = vmax.f32 %v2994_v6, 0.0 }
 0x278   : > { %3056 = vst.msk [vmem:[#allocation3] sm:$0xff] %vm3055_vm4, %v3023_v13  ;;  %v3024_v27 = vmax.f32 %v2992_v50, 0.0  ;;  %v5916_v36 = vpop.f32.mrb[4].mxu0 }
 0x279   : > { %3059 = vst.msk [vmem:[#allocation3 + $0x18] sm:$0xff] %vm3055_vm4, %v3026_v26  ;;  %v6134_v44 = vadd.f32 %v5916_v36, %v7326_v48  ;;  %v2841_v55 = vpop.f32.mrb[5].mxu0 }
 0x27a   : > { %3057 = vst.msk [vmem:[#allocation3 + $0x8] sm:$0xff] %vm3055_vm4, %v3024_v27  ;;  %v6135_v47 = vadd.f32 %v2841_v55, %v7330_v58  ;;  %v5917_v63 = vpop.f32.mrb[6].mxu0 }
 0x27b   : > { %v2997_v40 = vadd.f32 %v6134_v44, %v7457_v31  ;;  %v6136_v45 = vadd.f32 %v5917_v63, %v7332_v59  ;;  %v2844_v0 = vpop.f32.mrb[7].mxu0 }
 0x27c   : > { %v2995_v46 = vadd.f32 %v6135_v47, %v7457_v31  ;;  %v6137_v11 = vadd.f32 %v2844_v0, %v7334_v61 }
 0x27d   : > { %v3029_v56 = vmax.f32 %v2997_v40, 0.0  ;;  %v2998_v18 = vadd.f32 %v6136_v45, %v7457_v31 }
 0x27e   : > { %v3027_v22 = vmax.f32 %v2995_v46, 0.0  ;;  %v2996_v48 = vadd.f32 %v6137_v11, %v7457_v31 }
 0x27f   : > { %3062 = vst.msk [vmem:[#allocation3 + $0x30] sm:$0xff] %vm3055_vm4, %v3029_v56  ;;  %v3030_v4 = vmax.f32 %v2998_v18, 0.0 }
 0x280   : > { %v3090_v58 = vld [vmem:[#allocation3 + $0x10] ss:$2 sm:$0xff]  ;;  %v3122_v14 = vld [vmem:[#allocation3 + $0x11] ss:$2 sm:$0xff]  ;;  %3060 = vst.msk [vmem:[#allocation3 + $0x20] sm:$0xff] %vm3055_vm4, %v3027_v22  ;;  %v3028_v3 = vmax.f32 %v2996_v48, 0.0 }
 0x281   : > { %v5920_v59 = vpop.f32.mrb[8].mxu0  ;;  %v3152_v29 = vmax.f32 %v3090_v58, %v3122_v14  ;;  %v3088_v17 = vld [vmem:[#allocation3] ss:$2 sm:$0xff]  ;;  %v3120_v34 = vld [vmem:[#allocation3 + $0x1] ss:$2 sm:$0xff]  ;;  %3063 = vst.msk [vmem:[#allocation3 + $0x38] sm:$0xff] %vm3055_vm4, %v3030_v4 }
 0x282   : > { %v6138_v61 = vadd.f32 %v5920_v59, %v7338_v62  ;;  %v2857_v51 = vpop.f32.mrb[9].mxu0  ;;  %v3151_v53 = vmax.f32 %v3088_v17, %v3120_v34  ;;  %3061 = vst.msk [vmem:[#allocation3 + $0x28] sm:$0xff] %vm3055_vm4, %v3028_v3  ;;  %v3218_v22 = vld [vmem:[#allocation4 + $0x1] sm:$0xff] }
 0x283   : > { %v6139_v54 = vadd.f32 %v2857_v51, %v7342_v16  ;;  %v5921_v9 = vpop.f32.mrb[10].mxu0 }
 0x284   : > { %v3001_v10 = vadd.f32 %v6138_v61, %v7457_v31  ;;  %v6140_v35 = vadd.f32 %v5921_v9, %v7344_v32  ;;  %v2860_v37 = vpop.f32.mrb[11].mxu0  ;;  %v3167_v39 = vmax.f32 %v3151_v53, %v3152_v29 }
 0x285   : > { %v2999_v21 = vadd.f32 %v6139_v54, %v7457_v31  ;;  %v6141_v6 = vadd.f32 %v2860_v37, %v7346_v33 }
 0x286   : > { %v3033_v13 = vmax.f32 %v3001_v10, 0.0  ;;  %v3002_v62 = vadd.f32 %v6140_v35, %v7457_v31  ;;  %3197 = vst.msk [vmem:[#allocation4 + $0x11] sm:$0xff] %vm3055_vm4, %v3167_v39 }
 0x287   : > { %v3031_v50 = vmax.f32 %v2999_v21, 0.0  ;;  %v3000_v26 = vadd.f32 %v6141_v6, %v7457_v31 }
 0x288   : > { %3066 = vst.msk [vmem:[#allocation3 + $0x50] sm:$0xff] %vm3055_vm4, %v3033_v13  ;;  %v3034_v16 = vmax.f32 %v3002_v62, 0.0  ;;  %v3094_v27 = vld [vmem:[#allocation3 + $0x30] ss:$2 sm:$0xff]  ;;  %v3126_v36 = vld [vmem:[#allocation3 + $0x31] ss:$2 sm:$0xff] }
 0x289   : > { %3064 = vst.msk [vmem:[#allocation3 + $0x40] sm:$0xff] %vm3055_vm4, %v3031_v50  ;;  %v3032_v32 = vmax.f32 %v3000_v26, 0.0  ;;  %v5924_v44 = vpop.f32.mrb[12].mxu0  ;;  %v3154_v55 = vmax.f32 %v3094_v27, %v3126_v36  ;;  %v3092_v47 = vld [vmem:[#allocation3 + $0x20] ss:$2 sm:$0xff] }
 0x28a   : > { %v3124_v33 = vld [vmem:[#allocation3 + $0x21] ss:$2 sm:$0xff]  ;;  %3067 = vst.msk [vmem:[#allocation3 + $0x58] sm:$0xff] %vm3055_vm4, %v3034_v16  ;;  %v6142_v63 = vadd.f32 %v5924_v44, %v7349_v52  ;;  %v2873_v40 = vpop.f32.mrb[13].mxu0 }
 0x28b   : > { %v3153_v45 = vmax.f32 %v3092_v47, %v3124_v33  ;;  %3065 = vst.msk [vmem:[#allocation3 + $0x48] sm:$0xff] %vm3055_vm4, %v3032_v32  ;;  %v6143_v0 = vadd.f32 %v2873_v40, %v7352_v8  ;;  %v5925_v46 = vpop.f32.mrb[14].mxu0 }
 0x28c   : > { %v3005_v11 = vadd.f32 %v6142_v63, %v7457_v31  ;;  %v6144_v56 = vadd.f32 %v5925_v46, %v7354_v24  ;;  %v2876_v18 = vpop.f32.mrb[15].mxu0 }
 0x28d   : > { %v3168_v48 = vmax.f32 %v3153_v45, %v3154_v55  ;;  %v3003_v4 = vadd.f32 %v6143_v0, %v7457_v31  ;;  %v6145_v58 = vadd.f32 %v2876_v18, %v7356_v28  ;;  %v7503_v3 = vld [vmem:[#allocation4 + $0x11] sm:$0xff] }
 0x28e   : > { %v3037_v14 = vmax.f32 %v3005_v11, 0.0  ;;  %v3006_v52 = vadd.f32 %v6144_v56, %v7457_v31  ;;  %v3226_v29 = vpack.c.bf16 %v7503_v3, %v3218_v22 }
 0x28f   : > { %3198 = vst.msk [vmem:[#allocation4 + $0x21] sm:$0xff] %vm3055_vm4, %v3168_v48  ;;  %v3035_v8 = vmax.f32 %v3003_v4, 0.0  ;;  %v3004_v59 = vadd.f32 %v6145_v58, %v7457_v31 }
 0x290   : > { %3070 = vst.msk [vmem:[#allocation3 + $0x70] sm:$0xff] %vm3055_vm4, %v3037_v14  ;;  %v3038_v24 = vmax.f32 %v3006_v52, 0.0  ;;  %v5928_v61 = vpop.f32.mrb[16].mxu0  ;;  %5944 = vmatprep.mubr.msk.bf16.mxu1 %vm3055_vm4, %v3226_v29 }
 0x291   : > { %v3098_v17 = vld [vmem:[#allocation3 + $0x50] ss:$2 sm:$0xff]  ;;  %v3130_v34 = vld [vmem:[#allocation3 + $0x51] ss:$2 sm:$0xff]  ;;  %3068 = vst.msk [vmem:[#allocation3 + $0x60] sm:$0xff] %vm3055_vm4, %v3035_v8  ;;  %v3036_v28 = vmax.f32 %v3004_v59, 0.0  ;;  %v6146_v9 = vadd.f32 %v5928_v61, %v7359_v38 }
 0x292   : > { %v3156_v51 = vmax.f32 %v3098_v17, %v3130_v34  ;;  %v3096_v53 = vld [vmem:[#allocation3 + $0x40] ss:$2 sm:$0xff]  ;;  %v3128_v54 = vld [vmem:[#allocation3 + $0x41] ss:$2 sm:$0xff]  ;;  %3071 = vst.msk [vmem:[#allocation3 + $0x78] sm:$0xff] %vm3055_vm4, %v3038_v24  ;;  %v2889_v10 = vpop.f32.mrb[17].mxu0 }
 0x293   : > { %v3155_v35 = vmax.f32 %v3096_v53, %v3128_v54  ;;  %3069 = vst.msk [vmem:[#allocation3 + $0x68] sm:$0xff] %vm3055_vm4, %v3036_v28  ;;  %v6147_v37 = vadd.f32 %v2889_v10, %v7362_v41  ;;  %v5929_v39 = vpop.f32.mrb[18].mxu0  ;;  %v3009_v21 = vadd.f32 %v6146_v9, %v7457_v31  ;;  %v7551_v24 = vld [vmem:[%s7881_s3 + $0x8] sm:$0xf] }
 0x294   : > { %v6148_v6 = vadd.f32 %v5929_v39, %v7364_v42  ;;  %v2892_v13 = vpop.f32.mrb[19].mxu0 }
 0x295   : > { %v3169_v62 = vmax.f32 %v3155_v35, %v3156_v51  ;;  %v3007_v50 = vadd.f32 %v6147_v37, %v7457_v31  ;;  %v6149_v26 = vadd.f32 %v2892_v13, %v7366_v49  ;;  %v3041_v16 = vmax.f32 %v3009_v21, 0.0 }
 0x296   : > { %v3010_v38 = vadd.f32 %v6148_v6, %v7457_v31  ;;  %v7520_v27 = vld [vmem:[#allocation4 + $0x21] sm:$0xff] }
 0x297   : > { %3199 = vst.msk [vmem:[#allocation4 + $0x31] sm:$0xff] %vm3055_vm4, %v3169_v62  ;;  %v3039_v36 = vmax.f32 %v3007_v50, 0.0  ;;  %v3008_v41 = vadd.f32 %v6149_v26, %v7457_v31  ;;  %v3605_v32 = vpack.c.bf16 %v7520_v27, %v7503_v3  ;;  %3074 = vst.msk [vmem:[#allocation3 + $0x90] sm:$0xff] %vm3055_vm4, %v3041_v16 }
 0x298   : > { %v3042_v42 = vmax.f32 %v3010_v38, 0.0  ;;  %v5932_v47 = vpop.f32.mrb[20].mxu0 }
 0x299   : > { %v3102_v44 = vld [vmem:[#allocation3 + $0x70] ss:$2 sm:$0xff]  ;;  %v3134_v55 = vld [vmem:[#allocation3 + $0x71] ss:$2 sm:$0xff]  ;;  %3072 = vst.msk [vmem:[#allocation3 + $0x80] sm:$0xff] %vm3055_vm4, %v3039_v36  ;;  %v3040_v49 = vmax.f32 %v3008_v41, 0.0  ;;  %v6150_v45 = vadd.f32 %v5932_v47, %v7377_v60 }
 0x29a   : > { %v3158_v33 = vmax.f32 %v3102_v44, %v3134_v55  ;;  %v3100_v63 = vld [vmem:[#allocation3 + $0x60] ss:$2 sm:$0xff]  ;;  %v3132_v40 = vld [vmem:[#allocation3 + $0x61] ss:$2 sm:$0xff]  ;;  %3075 = vst.msk [vmem:[#allocation3 + $0x98] sm:$0xff] %vm3055_vm4, %v3042_v42  ;;  %v2905_v0 = vpop.f32.mrb[21].mxu0 }
 0x29b   : > { %v3157_v46 = vmax.f32 %v3100_v63, %v3132_v40  ;;  %3073 = vst.msk [vmem:[#allocation3 + $0x88] sm:$0xff] %vm3055_vm4, %v3040_v49  ;;  %v6151_v11 = vadd.f32 %v2905_v0, %v7381_v25  ;;  %v5933_v56 = vpop.f32.mrb[22].mxu0  ;;  %v3013_v18 = vadd.f32 %v6150_v45, %v7457_v31 }
 0x29c   : > { %v6152_v22 = vadd.f32 %v5933_v56, %v7383_v7  ;;  %v2908_v48 = vpop.f32.mrb[23].mxu0  ;;  %v3326_v7 = vsel %vm3244_vm6, %v7450_v15, 0 }
 0x29d   : > { %v3170_v4 = vmax.f32 %v3157_v46, %v3158_v33  ;;  %v3011_v58 = vadd.f32 %v6151_v11, %v7457_v31  ;;  %v6153_v14 = vadd.f32 %v2908_v48, %v7385_v12  ;;  %v3045_v52 = vmax.f32 %v3013_v18, 0.0 }
 0x29e   : > { %v3014_v60 = vadd.f32 %v6152_v22, %v7457_v31  ;;  %v7537_v8 = vld [vmem:[#allocation4 + $0x31] sm:$0xff] }
 0x29f   : > { %3200 = vst.msk [vmem:[#allocation4 + $0x41] sm:$0xff] %vm3055_vm4, %v3170_v4  ;;  %v3043_v59 = vmax.f32 %v3011_v58, 0.0  ;;  %v3012_v25 = vadd.f32 %v6153_v14, %v7457_v31  ;;  %v7543_v29 = vpack.c.bf16 %v7537_v8, %v7520_v27  ;;  %3078 = vst.msk [vmem:[#allocation3 + $0xb0] sm:$0xff] %vm3055_vm4, %v3045_v52 }
 0x2a0   : > { %v3046_v12 = vmax.f32 %v3014_v60, 0.0  ;;  %v5936_v61 = vpop.f32.mrb[24].mxu0 }
 0x2a1   : > { %v3106_v17 = vld [vmem:[#allocation3 + $0x90] ss:$2 sm:$0xff]  ;;  %v3138_v34 = vld [vmem:[#allocation3 + $0x91] ss:$2 sm:$0xff]  ;;  %3076 = vst.msk [vmem:[#allocation3 + $0xa0] sm:$0xff] %vm3055_vm4, %v3043_v59  ;;  %v3044_v28 = vmax.f32 %v3012_v25, 0.0  ;;  %5945 = vmatmul.mubr.msk.bf16.vlgmr.msra.gmra.mrb[32].mxu1 %vm3055_vm4, %v7543_v29  ;;  %v6154_v54 = vadd.f32 %v5936_v61, %v7389_v43 }
 0x2a2   : > { %v3160_v51 = vmax.f32 %v3106_v17, %v3138_v34  ;;  %v3104_v53 = vld [vmem:[#allocation3 + $0x80] ss:$2 sm:$0xff]  ;;  %v3136_v15 = vld [vmem:[#allocation3 + $0x81] ss:$2 sm:$0xff]  ;;  %3079 = vst.msk [vmem:[#allocation3 + $0xb8] sm:$0xff] %vm3055_vm4, %v3046_v12  ;;  %v2921_v9 = vpop.f32.mrb[25].mxu0  ;;  %5953 = vmatpush3.bf16.msra.mxu1 %v3326_v7 }
 0x2a3   : > { %v3159_v10 = vmax.f32 %v3104_v53, %v3136_v15  ;;  %3077 = vst.msk [vmem:[#allocation3 + $0xa8] sm:$0xff] %vm3055_vm4, %v3044_v28  ;;  %v6155_v35 = vadd.f32 %v2921_v9, %v7393_v57  ;;  %v5937_v37 = vpop.f32.mrb[26].mxu0  ;;  %6513 = vmatprep.subr.msk.bf16.mxu1 %vm3244_vm6, %v7551_v24  ;;  %v3017_v39 = vadd.f32 %v6154_v54, %v7457_v31  ;;  %v3205_v9 = vld [vmem:[#allocation4] sm:$0xff] }
 0x2a4   : > { %v6156_v21 = vadd.f32 %v5937_v37, %v7395_v1  ;;  %v2924_v6 = vpop.f32.mrb[27].mxu0 }
 0x2a5   : > { %v3171_v13 = vmax.f32 %v3159_v10, %v3160_v51  ;;  %v3015_v62 = vadd.f32 %v6155_v35, %v7457_v31  ;;  %v6157_v43 = vadd.f32 %v2924_v6, %v7397_v30  ;;  %v3049_v50 = vmax.f32 %v3017_v39, 0.0  ;;  %v3206_v10 = vld [vmem:[#allocation4 + $0x10] sm:$0xff] }
 0x2a6   : > { %v3018_v26 = vadd.f32 %v6156_v21, %v7457_v31  ;;  %v7567_v16 = vld [vmem:[#allocation4 + $0x41] sm:$0xff]  ;;  %v3213_v21 = vpack.c.bf16 %v3206_v10, %v3205_v9  ;;  %v3208_v6 = vld [vmem:[#allocation4 + $0x30] sm:$0xff] }
 0x2a7   : > { %3201 = vst.msk [vmem:[#allocation4 + $0x51] sm:$0xff] %vm3055_vm4, %v3171_v13  ;;  %v3047_v57 = vmax.f32 %v3015_v62, 0.0  ;;  %v3016_v38 = vadd.f32 %v6157_v43, %v7457_v31  ;;  %v3606_v36 = vpack.c.bf16 %v7567_v16, %v7537_v8  ;;  %3082 = vst.msk [vmem:[#allocation3 + $0xd0] sm:$0xff] %vm3055_vm4, %v3049_v50  ;;  %v3207_v62 = vld [vmem:[#allocation4 + $0x20] sm:$0xff]  ;;  %v3420_v50 = vsel %vm3244_vm6, %v7551_v24, 0 }
 0x2a8   : > { %v3050_v1 = vmax.f32 %v3018_v26, 0.0  ;;  %v5940_v44 = vpop.f32.mrb[28].mxu0  ;;  %v7611_v43 = vpack.c.bf16 %v3208_v6, %v3207_v62  ;;  %v3209_v26 = vld [vmem:[#allocation4 + $0x40] sm:$0xff]  ;;  %v5329_v8 = vld [vmem:[%s7881_s3 + $0x1c] sm:$0xf] }
 0x2a9   : > { %v3110_v41 = vld [vmem:[#allocation3 + $0xb0] ss:$2 sm:$0xff]  ;;  %v3142_v42 = vld [vmem:[#allocation3 + $0xb1] ss:$2 sm:$0xff]  ;;  %3080 = vst.msk [vmem:[#allocation3 + $0xc0] sm:$0xff] %vm3055_vm4, %v3047_v57  ;;  %v3048_v30 = vmax.f32 %v3016_v38, 0.0  ;;  %v6158_v33 = vadd.f32 %v5940_v44, %v7401_v2 }
 0x2aa   : > { %v3162_v55 = vmax.f32 %v3110_v41, %v3142_v42  ;;  %v3108_v49 = vld [vmem:[#allocation3 + $0xa0] ss:$2 sm:$0xff]  ;;  %v3140_v47 = vld [vmem:[#allocation3 + $0xa1] ss:$2 sm:$0xff]  ;;  %3083 = vst.msk [vmem:[#allocation3 + $0xd8] sm:$0xff] %vm3055_vm4, %v3050_v1  ;;  %v2937_v63 = vpop.f32.mrb[29].mxu0 }
 0x2ab   : > { %v3161_v40 = vmax.f32 %v3108_v49, %v3140_v47  ;;  %3081 = vst.msk [vmem:[#allocation3 + $0xc8] sm:$0xff] %vm3055_vm4, %v3048_v30  ;;  %v6159_v45 = vadd.f32 %v2937_v63, %v7405_v19  ;;  %v5941_v0 = vpop.f32.mrb[30].mxu0  ;;  %v3021_v46 = vadd.f32 %v6158_v33, %v7457_v31  ;;  %v5309_v38 = vld [vmem:[%s7881_s3 + $0xc] sm:$0xf]  ;;  %v3393_v41 = vld [vmem:[#allocation4 + $0x2] sm:$0xff]  ;;  %v3394_v42 = vld [vmem:[#allocation4 + $0x12] sm:$0xff] }
 0x2ac   : > { %v6160_v11 = vadd.f32 %v5941_v0, %v7407_v20  ;;  %v2940_v56 = vpop.f32.mrb[31].mxu0  ;;  %v3401_v44 = vpack.c.bf16 %v3394_v42, %v3393_v41  ;;  %v3395_v47 = vld [vmem:[#allocation4 + $0x22] sm:$0xff]  ;;  %v3522_v63 = vsel %vm3244_vm6, %v5309_v38, 0 }
 0x2ad   : > { %v3172_v18 = vmax.f32 %v3161_v40, %v3162_v55  ;;  %v3019_v22 = vadd.f32 %v6159_v45, %v7457_v31  ;;  %v6161_v48 = vadd.f32 %v2940_v56, %v7409_v23  ;;  %v3053_v4 = vmax.f32 %v3021_v46, 0.0  ;;  %v3396_v55 = vld [vmem:[#allocation4 + $0x32] sm:$0xff]  ;;  %v3397_v40 = vld [vmem:[#allocation4 + $0x42] sm:$0xff] }
 0x2ae   : > { %v3022_v2 = vadd.f32 %v6160_v11, %v7457_v31  ;;  %v7584_v58 = vld [vmem:[#allocation4 + $0x51] sm:$0xff]  ;;  %v7627_v33 = vpack.c.bf16 %v3396_v55, %v3395_v47  ;;  %v5314_v0 = vld [vmem:[%s7881_s3 + $0x10] sm:$0xf] }
 0x2af   : > { %3202 = vst.msk [vmem:[#allocation4 + $0x61] sm:$0xff] %vm3055_vm4, %v3172_v18  ;;  %v3051_v14 = vmax.f32 %v3019_v22, 0.0  ;;  %v3020_v19 = vadd.f32 %v6161_v48, %v7457_v31  ;;  %v7590_v52 = vpack.c.bf16 %v7584_v58, %v7567_v16  ;;  %3086 = vst.msk [vmem:[#allocation3 + $0xf0] sm:$0xff] %vm3055_vm4, %v3053_v4  ;;  %v3210_v13 = vld [vmem:[#allocation4 + $0x50] sm:$0xff]  ;;  %v3503_v18 = vpack.c.bf16 %v3207_v62, %v3206_v10 }
 0x2b0   : > { %v3054_v20 = vmax.f32 %v3022_v2, 0.0  ;;  %v7615_v57 = vpack.c.bf16 %v3210_v13, %v3209_v26  ;;  %v3398_v49 = vld [vmem:[#allocation4 + $0x52] sm:$0xff]  ;;  %v3504_v22 = vpack.c.bf16 %v3209_v26, %v3208_v6  ;;  %v3624_v48 = vsel %vm3244_vm6, %v5314_v0, 0  ;;  %v5319_v2 = vld [vmem:[%s7881_s3 + $0x14] sm:$0xf] }
 0x2b1   : > { %v3114_v60 = vld [vmem:[#allocation3 + $0xd0] ss:$2 sm:$0xff]  ;;  %v3146_v59 = vld [vmem:[#allocation3 + $0xd1] ss:$2 sm:$0xff]  ;;  %3084 = vst.msk [vmem:[#allocation3 + $0xe0] sm:$0xff] %vm3055_vm4, %v3051_v14  ;;  %v3052_v23 = vmax.f32 %v3020_v19, 0.0  ;;  %5948 = vmatprep.mubr.msk.bf16.mxu1 %vm3055_vm4, %v7590_v52  ;;  %v7630_v45 = vpack.c.bf16 %v3398_v49, %v3397_v40 }
 0x2b2   : > { %v3164_v25 = vmax.f32 %v3114_v60, %v3146_v59  ;;  %v3112_v7 = vld [vmem:[#allocation3 + $0xc0] ss:$2 sm:$0xff]  ;;  %v3144_v12 = vld [vmem:[#allocation3 + $0xc1] ss:$2 sm:$0xff]  ;;  %3087 = vst.msk [vmem:[#allocation3 + $0xf8] sm:$0xff] %vm3055_vm4, %v3054_v20  ;;  %v3726_v20 = vsel %vm3244_vm6, %v5319_v2, 0 }
 0x2b3   : > { %v3163_v31 = vmax.f32 %v3112_v7, %v3144_v12  ;;  %3085 = vst.msk [vmem:[#allocation3 + $0xe8] sm:$0xff] %vm3055_vm4, %v3052_v23  ;;  %v5324_v59 = vld [vmem:[%s7881_s3 + $0x18] sm:$0xf]  ;;  %v3931_v7 = vsel %vm3244_vm6, %v5329_v8, 0  ;;  %v5334_v12 = vld [vmem:[%s7881_s3 + $0x20] sm:$0xf] }
 0x2b4   : > { %v3829_v23 = vsel %vm3244_vm6, %v5324_v59, 0 }
 0x2b5   : > { %v3173_v17 = vmax.f32 %v3163_v31, %v3164_v25  ;;  %v3809_v31 = vld [vmem:[#allocation4 + $0x90] sm:$0xff] }
 0x2b6   : > { %v7599_v35 = vld [vmem:[#allocation4 + $0x61] sm:$0xff] }
 0x2b7   : > { %3203 = vst.msk [vmem:[#allocation4 + $0x71] sm:$0xff] %vm3055_vm4, %v3173_v17  ;;  %v3211_v24 = vld [vmem:[#allocation4 + $0x60] sm:$0xff]  ;;  %v3607_v60 = vpack.c.bf16 %v7599_v35, %v7584_v58  ;;  %v3708_v58 = vpack.c.bf16 %v3397_v40, %v3396_v55 }
 0x2b8   : > { %v3399_v11 = vld [vmem:[#allocation4 + $0x62] sm:$0xff]  ;;  %v3505_v4 = vpack.c.bf16 %v3211_v24, %v3210_v13 }
 0x2b9   : > { %v3118_v34 = vld [vmem:[#allocation3 + $0xf0] ss:$2 sm:$0xff]  ;;  %v3150_v28 = vld [vmem:[#allocation3 + $0xf1] ss:$2 sm:$0xff]  ;;  %v3709_v25 = vpack.c.bf16 %v3399_v11, %v3398_v49 }
 0x2ba   : > { %v3166_v61 = vmax.f32 %v3118_v34, %v3150_v28  ;;  %v3116_v51 = vld [vmem:[#allocation3 + $0xe0] ss:$2 sm:$0xff]  ;;  %v3148_v53 = vld [vmem:[#allocation3 + $0xe1] ss:$2 sm:$0xff]  ;;  %v4033_v34 = vsel %vm3244_vm6, %v5334_v12, 0  ;;  %v3911_v28 = vld [vmem:[#allocation4 + $0x91] sm:$0xff] }
 0x2bb   : > { %v3165_v15 = vmax.f32 %v3116_v51, %v3148_v53  ;;  %v6562_v51 = vld [vmem:[%s7883_s5] sm:$0xff]  }
 0x2bc   : > { %v5339_v53 = vld [vmem:[%s7882_s4] ss:$0 sm:$0xff] }
 0x2bd   : > { %v3174_v54 = vmax.f32 %v3165_v15, %v3166_v61 }
 0x2be   : > { %v7601_v37 = vld [vmem:[#allocation4 + $0x71] sm:$0xff] }
 0x2bf   : > { %3204 = vst.msk [vmem:[#allocation4 + $0x81] sm:$0xff] %vm3055_vm4, %v3174_v54  ;;  %v7606_v39 = vpack.c.bf16 %v7601_v37, %v7599_v35  ;;  %v3212_v1 = vld [vmem:[#allocation4 + $0x70] sm:$0xff] }
 0x2c0   : > { %v3216_v30 = vpack.c.bf16 %v3212_v1, %v3211_v24  ;;  %v3400_v46 = vld [vmem:[#allocation4 + $0x72] sm:$0xff] }
 0x2c1   : > { %5949 = vmatmul.mubr.msk.bf16.gmra.mrb[36].mxu1 %vm3055_vm4, %v7606_v39  ;;  %v3404_v56 = vpack.c.bf16 %v3400_v46, %v3399_v11  ;;  %v6563_v11 = vld [vmem:[%s7883_s5 + $0x8] sm:$0xff]  }
 0x2c2   : > { %5954 = vmatprep.mubr.msk.bf16.mxu1 %vm3055_vm4, %v3213_v21 }
 0x2c6   : > { %v3502_v14 = vld [vmem:[#allocation4 + $0x80] sm:$0xff] }
 0x2c7   : > { %v3506_v19 = vpack.c.bf16 %v3502_v14, %v3212_v1  ;;  %v3604_v3 = vld [vmem:[#allocation4 + $0x81] sm:$0xff]  ;;  %v3813_v17 = vpack.c.bf16 %v3809_v31, %v3502_v14 }
 0x2c8   : > { %v3608_v27 = vpack.c.bf16 %v3604_v3, %v7601_v37  ;;  %v3706_v16 = vld [vmem:[#allocation4 + $0x82] sm:$0xff]  ;;  %v3915_v61 = vpack.c.bf16 %v3911_v28, %v3604_v3 }
 0x2c9   : > { %5955 = vmatmul.mubr.msk.bf16.vlgmr.msra.gmra.mrb[32].mxu1 %vm3055_vm4, %v7611_v43 }
 0x2ca   : > { %5963 = vmatpush3.bf16.msra.mxu1 %v3420_v50  ;;  %5958 = vmatprep.mubr.msk.bf16.mxu1 %vm3055_vm4, %v7615_v57 }
 0x2cb   : > { %6514 = vmatprep.subr.msk.bf16.mxu1 %vm3244_vm6, %v5309_v38 }
 0x2d1   : > { %5959 = vmatmul.mubr.msk.bf16.gmra.mrb[36].mxu1 %vm3055_vm4, %v3216_v30 }
 0x2d2   : > { %5964 = vmatprep.mubr.msk.bf16.mxu1 %vm3055_vm4, %v3401_v44 }
 0x2d9   : > { %5965 = vmatmul.mubr.msk.bf16.vlgmr.msra.gmra.mrb[32].mxu1 %vm3055_vm4, %v7627_v33 }
 0x2da   : > { %5973 = vmatpush3.bf16.msra.mxu1 %v3522_v63  ;;  %5968 = vmatprep.mubr.msk.bf16.mxu1 %vm3055_vm4, %v7630_v45 }
 0x2db   : > { %6515 = vmatprep.subr.msk.bf16.mxu1 %vm3244_vm6, %v5314_v0 }
 0x2e1   : > { %5969 = vmatmul.mubr.msk.bf16.gmra.mrb[36].mxu1 %vm3055_vm4, %v3404_v56 }
 0x2e2   : > { %5974 = vmatprep.mubr.msk.bf16.mxu1 %vm3055_vm4, %v3503_v18  ;;  %v6564_v18 = vld [vmem:[%s7883_s5 + $0x10] sm:$0xff]  }
 0x2e9   : > { %5975 = vmatmul.mubr.msk.bf16.vlgmr.msra.gmra.mrb[32].mxu1 %vm3055_vm4, %v3504_v22 }
 0x2ea   : > { %5983 = vmatpush3.bf16.msra.mxu1 %v3624_v48  ;;  %5978 = vmatprep.mubr.msk.bf16.mxu1 %vm3055_vm4, %v3505_v4  ;;  %v6565_v48 = vld [vmem:[%s7883_s5 + $0x18] sm:$0xff]  }
 0x2eb   : > { %6516 = vmatprep.subr.msk.bf16.mxu1 %vm3244_vm6, %v5319_v2  ;;  %v6566_v2 = vld [vmem:[%s7883_s5 + $0x20] sm:$0xff]  }
 0x2f1   : > { %5979 = vmatmul.mubr.msk.bf16.gmra.mrb[36].mxu1 %vm3055_vm4, %v3506_v19 }
 0x2f2   : > { %5984 = vmatprep.mubr.msk.bf16.mxu1 %vm3055_vm4, %v3605_v32  ;;  %v3707_v32 = vpack.c.bf16 %v3395_v47, %v3394_v42 }
 0x2f9   : > { %5985 = vmatmul.mubr.msk.bf16.vlgmr.msra.gmra.mrb[32].mxu1 %vm3055_vm4, %v3606_v36  ;;  %v3710_v36 = vpack.c.bf16 %v3706_v16, %v3400_v46 }
 0x2fa   : > { %5993 = vmatpush3.bf16.msra.mxu1 %v3726_v20  ;;  %5988 = vmatprep.mubr.msk.bf16.mxu1 %vm3055_vm4, %v3607_v60 }
 0x2fb   : > { %6517 = vmatprep.subr.msk.bf16.mxu1 %vm3244_vm6, %v5324_v59 }
 0x301   : > { %5989 = vmatmul.mubr.msk.bf16.gmra.mrb[36].mxu1 %vm3055_vm4, %v3608_v27 }
 0x302   : > { %5994 = vmatprep.mubr.msk.bf16.mxu1 %vm3055_vm4, %v3707_v32 }
 0x309   : > { %5995 = vmatmul.mubr.msk.bf16.vlgmr.msra.gmra.mrb[32].mxu1 %vm3055_vm4, %v3708_v58  ;;  %v6567_v58 = vld [vmem:[%s7883_s5 + $0x28] sm:$0xff]  }
 0x30a   : > { %6003 = vmatpush3.bf16.msra.mxu1 %v3829_v23  ;;  %5998 = vmatprep.mubr.msk.bf16.mxu1 %vm3055_vm4, %v3709_v25  ;;  %v6568_v25 = vld [vmem:[%s7883_s5 + $0x30] sm:$0xff]  }
 0x30b   : > { %6518 = vmatprep.subr.msk.bf16.mxu1 %vm3244_vm6, %v5329_v8 }
 0x311   : > { %5999 = vmatmul.mubr.msk.bf16.gmra.mrb[36].mxu1 %vm3055_vm4, %v3710_v36 }
 0x312   : > { %6004 = vmatprep.mubr.msk.bf16.mxu1 %vm3055_vm4, %v7611_v43 }
 0x319   : > { %6005 = vmatmul.mubr.msk.bf16.vlgmr.msra.gmra.mrb[32].mxu1 %vm3055_vm4, %v7615_v57 }
 0x31a   : > { %6013 = vmatpush3.bf16.msra.mxu1 %v3931_v7  ;;  %6008 = vmatprep.mubr.msk.bf16.mxu1 %vm3055_vm4, %v3216_v30  ;;  %v6570_v7 = vld [vmem:[%s7883_s5 + $0x40] sm:$0xff]  }
 0x31b   : > { %6519 = vmatprep.subr.msk.bf16.mxu1 %vm3244_vm6, %v5334_v12 }
 0x321   : > { %6009 = vmatmul.mubr.msk.bf16.gmra.mrb[36].mxu1 %vm3055_vm4, %v3813_v17 }
 0x322   : > { %6014 = vmatprep.mubr.msk.bf16.mxu1 %vm3055_vm4, %v7543_v29  ;;  %v4013_v29 = vld [vmem:[#allocation4 + $0x92] sm:$0xff] }
 0x329   : > { %6015 = vmatmul.mubr.msk.bf16.vlgmr.msra.gmra.mrb[32].mxu1 %vm3055_vm4, %v7590_v52  ;;  %v4017_v52 = vpack.c.bf16 %v4013_v29, %v3706_v16  ;;  %v6569_v16 = vld [vmem:[%s7883_s5 + $0x38] sm:$0xff]  }
 0x32a   : > { %6023 = vmatpush3.bf16.msra.mxu1 %v4033_v34  ;;  %6018 = vmatprep.mubr.msk.bf16.mxu1 %vm3055_vm4, %v7606_v39 }
 0x32b   : > { %6032 = vmatprep.subr.bf16.mxu1 %v6647_v5 }
 0x331   : > { %6019 = vmatmul.mubr.msk.bf16.gmra.mrb[36].mxu1 %vm3055_vm4, %v3915_v61 }
 0x332   : > { %6024 = vmatprep.mubr.msk.bf16.mxu1 %vm3055_vm4, %v7627_v33 }
 0x339   : > { %6025 = vmatmul.mubr.msk.bf16.vlgmr.msra.gmra.mrb[32].mxu1 %vm3055_vm4, %v7630_v45 }
 0x33a   : > { %6028 = vmatprep.mubr.msk.bf16.mxu1 %vm3055_vm4, %v3404_v56  ;;  %6033 = vmatpush3.bf16.msra.mxu1 %v6562_v51  ;;  %v6571_v51 = vld [vmem:[%s7883_s5 + $0x48] sm:$0xff]  }
 0x33b   : > { %6038 = vmatprep.subr.bf16.mxu1 %v6647_v5 }
 0x341   : > { %6029 = vmatmul.mubr.msk.bf16.gmra.mrb[36].mxu1 %vm3055_vm4, %v4017_v52 }
 0x342   : > { %6034 = vmatprep.mubr.msk.bf16.mxu1 %vm6648_vm7, %v6647_v5 }
 0x40c   : > { %v6026_v15 = vpop.f32.mrb[32].mxu1 }
 0x40d   : > { %v4117_v54 = vadd.f32 %v6026_v15, %v5339_v53  ;;  %v4069_v9 = vpop.f32.mrb[33].mxu1  ;;  %v6572_v15 = vld [vmem:[%s7883_s5 + $0x50] sm:$0xff]  }
 0x40e   : > { %v4115_v10 = vadd.f32 %v5339_v53, %v4069_v9  ;;  %v6027_v35 = vpop.f32.mrb[34].mxu1  ;;  %v6573_v9 = vld [vmem:[%s7883_s5 + $0x58] sm:$0xff]  }
 0x40f   : > { %v4125_v37 = vmax.f32 %v4117_v54, 0.0  ;;  %v4118_v39 = vadd.f32 %v6027_v35, %v5339_v53  ;;  %v4072_v21 = vpop.f32.mrb[35].mxu1  ;;  %v6574_v35 = vld [vmem:[%s7883_s5 + $0x60] sm:$0xff]  }
 0x410   : > { %v4123_v6 = vmax.f32 %v4115_v10, 0.0  ;;  %v4116_v13 = vadd.f32 %v5339_v53, %v4072_v21 }
 0x411   : > { %4134 = vst.msk [vmem:[#allocation5 + $0x10] sm:$0xff] %vm4131_vm8, %v4125_v37  ;;  %v4126_v62 = vmax.f32 %v4118_v39, 0.0 }
 0x412   : > { %4132 = vst.msk [vmem:[#allocation5] sm:$0xff] %vm4131_vm8, %v4123_v6  ;;  %v4124_v43 = vmax.f32 %v4116_v13, 0.0 }
 0x413   : > { %4135 = vst.msk [vmem:[#allocation5 + $0x18] sm:$0xff] %vm4131_vm8, %v4126_v62 }
 0x414   : > { %4133 = vst.msk [vmem:[#allocation5 + $0x8] sm:$0xff] %vm4131_vm8, %v4124_v43  ;;  %v6030_v50 = vpop.f32.mrb[36].mxu1 }
 0x415   : > { %v4121_v26 = vadd.f32 %v6030_v50, %v5339_v53  ;;  %v4085_v57 = vpop.f32.mrb[37].mxu1 }
 0x416   : > { %v4119_v38 = vadd.f32 %v5339_v53, %v4085_v57  ;;  %v6031_v1 = vpop.f32.mrb[38].mxu1 }
 0x417   : > { %v4129_v41 = vmax.f32 %v4121_v26, 0.0  ;;  %v4122_v42 = vadd.f32 %v6031_v1, %v5339_v53  ;;  %v4088_v24 = vpop.f32.mrb[39].mxu1  ;;  %v6575_v26 = vld [vmem:[%s7883_s5 + $0x68] sm:$0xff]  }
 0x418   : > { %v4127_v30 = vmax.f32 %v4119_v38, 0.0  ;;  %v4120_v44 = vadd.f32 %v5339_v53, %v4088_v24  ;;  %v4144_v60 = vld [vmem:[#allocation5 + $0x10] ss:$2 sm:$0xf]  ;;  %v6576_v38 = vld [vmem:[%s7883_s5 + $0x70] sm:$0xff]  }
 0x419   : > { %4138 = vst.msk [vmem:[#allocation5 + $0x30] sm:$0xff] %vm4131_vm8, %v4129_v41  ;;  %v4130_v55 = vmax.f32 %v4122_v42, 0.0  ;;  %v4140_v49 = vld [vmem:[#allocation5] ss:$2 sm:$0xf]  ;;  %v6577_v41 = vld [vmem:[%s7883_s5 + $0x78] sm:$0xff]  }
 0x41a   : > { %4136 = vst.msk [vmem:[#allocation5 + $0x20] sm:$0xff] %vm4131_vm8, %v4127_v30  ;;  %v4128_v47 = vmax.f32 %v4120_v44, 0.0  ;;  %v4156_v33 = vld [vmem:[#allocation5 + $0x1] ss:$2 sm:$0xf] }
 0x41b   : > { %4139 = vst.msk [vmem:[#allocation5 + $0x38] sm:$0xff] %vm4131_vm8, %v4130_v55  ;;  %v4142_v63 = vld [vmem:[#allocation5 + $0x8] ss:$2 sm:$0xf]  ;;  %v4171_v45 = vmax.f32 %v4140_v49, %v4156_v33  ;;  %v4183_v30 = vld [vmem:[%s7884_s6] sm:$0x1] }
 0x41c   : > { %v4158_v40 = vld [vmem:[#allocation5 + $0x9] ss:$2 sm:$0xf]  ;;  %4137 = vst.msk [vmem:[#allocation5 + $0x28] sm:$0xff] %vm4131_vm8, %v4128_v47 }
 0x41d   : > { %v4172_v0 = vmax.f32 %v4142_v63, %v4158_v40  ;;  %v4146_v19 = vld [vmem:[#allocation5 + $0x18] ss:$2 sm:$0xf]  ;;  %v4162_v20 = vld [vmem:[#allocation5 + $0x19] ss:$2 sm:$0xf] }
 0x41e   : > { %v4160_v59 = vld [vmem:[#allocation5 + $0x11] ss:$2 sm:$0xf]  ;;  %v4174_v3 = vmax.f32 %v4146_v19, %v4162_v20 }
 0x41f   : > { %v4179_v46 = vmax.f32 %v4171_v45, %v4172_v0  ;;  %v4173_v27 = vmax.f32 %v4144_v60, %v4160_v59 }
 0x420   : > { %v4152_v6 = vld [vmem:[#allocation5 + $0x30] ss:$2 sm:$0xf]  ;;  %v4168_v13 = vld [vmem:[#allocation5 + $0x31] ss:$2 sm:$0xf] }
 0x421   : > { %v4184_v56 = vpack.c.bf16 %v4179_v46, %v4179_v46  ;;  %v4180_v32 = vmax.f32 %v4173_v27, %v4174_v3  ;;  %v4148_v34 = vld [vmem:[#allocation5 + $0x20] ss:$2 sm:$0xf]  ;;  %v4164_v28 = vld [vmem:[#allocation5 + $0x21] ss:$2 sm:$0xf]  ;;  %v4177_v43 = vmax.f32 %v4152_v6, %v4168_v13 }
 0x422   : > { %v4175_v29 = vmax.f32 %v4148_v34, %v4164_v28  ;;  %v4154_v39 = vld [vmem:[#allocation5 + $0x38] ss:$2 sm:$0xf]  ;;  %v4170_v21 = vld [vmem:[#allocation5 + $0x39] ss:$2 sm:$0xf] }
 0x423   : > { %6035 = vmatmul.mubr.msk.bf16.vlgmr.msra.gmra.mrb[40].mxu1 %vm4131_vm8, %v4184_v56  ;;  %v4240_v22 = vshrl.u32 %v4184_v56, 16  ;;  %v4296_v4 = vrot.slane %v4184_v56, 1  ;;  %v4401_v23 = vpack.c.bf16 %v4180_v32, %v4180_v32  ;;  %v4150_v31 = vld [vmem:[#allocation5 + $0x28] ss:$2 sm:$0xf]  ;;  %v4178_v62 = vmax.f32 %v4154_v39, %v4170_v21 }
 0x424   : > { %6039 = vmatpush3.bf16.msra.mxu1 %v6563_v11  ;;  %6040 = vmatprep.mubr.msk.bf16.mxu1 %vm6648_vm7, %v6647_v5  ;;  %v4166_v17 = vld [vmem:[#allocation5 + $0x29] ss:$2 sm:$0xf] }
 0x425   : > { %6044 = vmatprep.subr.bf16.mxu1 %v6647_v5  ;;  %v4350_v14 = vrot.slane %v4240_v22, 1  ;;  %v4458_v8 = vshrl.u32 %v4401_v23, 16  ;;  %v4514_v36 = vrot.slane %v4401_v23, 1  ;;  %v4176_v61 = vmax.f32 %v4150_v31, %v4166_v17 }
 0x426   : > { %v4182_v50 = vmax.f32 %v4177_v43, %v4178_v62 }
 0x427   : > { %v4568_v12 = vrot.slane %v4458_v8, 1  ;;  %v4181_v52 = vmax.f32 %v4175_v29, %v4176_v61 }
 0x428   : > { %v4837_v57 = vpack.c.bf16 %v4182_v50, %v4182_v50 }
 0x429   : > { %v4619_v53 = vpack.c.bf16 %v4181_v52, %v4181_v52 }
 0x42a   : > { %v4894_v1 = vshrl.u32 %v4837_v57, 16  ;;  %v4950_v42 = vrot.slane %v4837_v57, 1 }
 0x42b   : > { %v4676_v54 = vshrl.u32 %v4619_v53, 16  ;;  %v4732_v10 = vrot.slane %v4619_v53, 1 }
 0x42c   : > { %v5004_v24 = vrot.slane %v4894_v1, 1 }
 0x42d   : > { %v4786_v37 = vrot.slane %v4676_v54, 1 }
 0x42f   : > { %6041 = vmatmul.mubr.msk.bf16.vlgmr.msra.gmra.mrb[40].mxu1 %vm4131_vm8, %v4240_v22 }
 0x430   : > { %6045 = vmatpush3.bf16.msra.mxu1 %v6564_v18  ;;  %6046 = vmatprep.mubr.msk.bf16.mxu1 %vm6648_vm7, %v6647_v5 }
 0x431   : > { %6050 = vmatprep.subr.bf16.mxu1 %v6647_v5 }
 0x43b   : > { %6047 = vmatmul.mubr.msk.bf16.vlgmr.msra.gmra.mrb[40].mxu1 %vm4131_vm8, %v4296_v4 }
 0x43c   : > { %6051 = vmatpush3.bf16.msra.mxu1 %v6565_v48  ;;  %6052 = vmatprep.mubr.msk.bf16.mxu1 %vm6648_vm7, %v6647_v5 }
 0x43d   : > { %6056 = vmatprep.subr.bf16.mxu1 %v6647_v5 }
 0x447   : > { %6053 = vmatmul.mubr.msk.bf16.vlgmr.msra.gmra.mrb[40].mxu1 %vm4131_vm8, %v4350_v14 }
 0x448   : > { %6057 = vmatpush3.bf16.msra.mxu1 %v6566_v2  ;;  %6058 = vmatprep.mubr.msk.bf16.mxu1 %vm6648_vm7, %v6647_v5 }
 0x449   : > { %6062 = vmatprep.subr.bf16.mxu1 %v6647_v5 }
 0x453   : > { %6059 = vmatmul.mubr.msk.bf16.vlgmr.msra.gmra.mrb[40].mxu1 %vm4131_vm8, %v4401_v23 }
 0x454   : > { %6063 = vmatpush3.bf16.msra.mxu1 %v6567_v58  ;;  %6064 = vmatprep.mubr.msk.bf16.mxu1 %vm6648_vm7, %v6647_v5 }
 0x455   : > { %6068 = vmatprep.subr.bf16.mxu1 %v6647_v5 }
 0x45f   : > { %6065 = vmatmul.mubr.msk.bf16.vlgmr.msra.gmra.mrb[40].mxu1 %vm4131_vm8, %v4458_v8 }
 0x460   : > { %6069 = vmatpush3.bf16.msra.mxu1 %v6568_v25  ;;  %6070 = vmatprep.mubr.msk.bf16.mxu1 %vm6648_vm7, %v6647_v5 }
 0x461   : > { %6074 = vmatprep.subr.bf16.mxu1 %v6647_v5 }
 0x46b   : > { %6071 = vmatmul.mubr.msk.bf16.vlgmr.msra.gmra.mrb[40].mxu1 %vm4131_vm8, %v4514_v36 }
 0x46c   : > { %6075 = vmatpush3.bf16.msra.mxu1 %v6569_v16  ;;  %6076 = vmatprep.mubr.msk.bf16.mxu1 %vm6648_vm7, %v6647_v5 }
 0x46d   : > { %6080 = vmatprep.subr.bf16.mxu1 %v6647_v5 }
 0x477   : > { %6077 = vmatmul.mubr.msk.bf16.vlgmr.msra.gmra.mrb[40].mxu1 %vm4131_vm8, %v4568_v12 }
 0x478   : > { %6081 = vmatpush3.bf16.msra.mxu1 %v6570_v7  ;;  %6082 = vmatprep.mubr.msk.bf16.mxu1 %vm6648_vm7, %v6647_v5 }
 0x479   : > { %6086 = vmatprep.subr.bf16.mxu1 %v6647_v5 }
 0x483   : > { %6083 = vmatmul.mubr.msk.bf16.vlgmr.msra.gmra.mrb[40].mxu1 %vm4131_vm8, %v4619_v53 }
 0x484   : > { %6087 = vmatpush3.bf16.msra.mxu1 %v6571_v51  ;;  %6088 = vmatprep.mubr.msk.bf16.mxu1 %vm6648_vm7, %v6647_v5 }
 0x485   : > { %6092 = vmatprep.subr.bf16.mxu1 %v6647_v5 }
 0x48f   : > { %6089 = vmatmul.mubr.msk.bf16.vlgmr.msra.gmra.mrb[40].mxu1 %vm4131_vm8, %v4676_v54 }
 0x490   : > { %6093 = vmatpush3.bf16.msra.mxu1 %v6572_v15  ;;  %6094 = vmatprep.mubr.msk.bf16.mxu1 %vm6648_vm7, %v6647_v5 }
 0x491   : > { %6098 = vmatprep.subr.bf16.mxu1 %v6647_v5 }
 0x49b   : > { %6095 = vmatmul.mubr.msk.bf16.vlgmr.msra.gmra.mrb[40].mxu1 %vm4131_vm8, %v4732_v10 }
 0x49c   : > { %6099 = vmatpush3.bf16.msra.mxu1 %v6573_v9  ;;  %6100 = vmatprep.mubr.msk.bf16.mxu1 %vm6648_vm7, %v6647_v5 }
 0x49d   : > { %6104 = vmatprep.subr.bf16.mxu1 %v6647_v5 }
 0x4a7   : > { %6101 = vmatmul.mubr.msk.bf16.vlgmr.msra.gmra.mrb[40].mxu1 %vm4131_vm8, %v4786_v37 }
 0x4a8   : > { %6105 = vmatpush3.bf16.msra.mxu1 %v6574_v35  ;;  %6106 = vmatprep.mubr.msk.bf16.mxu1 %vm6648_vm7, %v6647_v5 }
 0x4a9   : > { %6110 = vmatprep.subr.bf16.mxu1 %v6647_v5 }
 0x4b3   : > { %6107 = vmatmul.mubr.msk.bf16.vlgmr.msra.gmra.mrb[40].mxu1 %vm4131_vm8, %v4837_v57 }
 0x4b4   : > { %6111 = vmatpush3.bf16.msra.mxu1 %v6575_v26  ;;  %6112 = vmatprep.mubr.msk.bf16.mxu1 %vm6648_vm7, %v6647_v5 }
 0x4b5   : > { %6116 = vmatprep.subr.bf16.mxu1 %v6647_v5 }
 0x4bf   : > { %6113 = vmatmul.mubr.msk.bf16.vlgmr.msra.gmra.mrb[40].mxu1 %vm4131_vm8, %v4894_v1 }
 0x4c0   : > { %6117 = vmatpush3.bf16.msra.mxu1 %v6576_v38  ;;  %6118 = vmatprep.mubr.msk.bf16.mxu1 %vm6648_vm7, %v6647_v5 }
 0x4c1   : > { %6122 = vmatprep.subr.bf16.mxu1 %v6647_v5 }
 0x4cb   : > { %6119 = vmatmul.mubr.msk.bf16.vlgmr.msra.gmra.mrb[40].mxu1 %vm4131_vm8, %v4950_v42 }
 0x4cc   : > { %6123 = vmatpush3.bf16.msra.mxu1 %v6577_v41  ;;  %6124 = vmatprep.mubr.msk.bf16.mxu1 %vm6648_vm7, %v6647_v5 }
 0x4d7   : > { %6125 = vmatmul.mubr.msk.bf16.vlgmr.msra.gmra.mrb[40].mxu1 %vm4131_vm8, %v5004_v24 }
 0x5aa   : > { %v5048_v44 = vpop.f32.mrb[40].mxu1 }
 0x5ab   : > { %v6162_v55 = vadd.f32 %v5048_v44, %v4183_v30  ;;  %v6126_v49 = vpop.f32.mrb[41].mxu1 }
 0x5ac   : > { %v5051_v47 = vpop.f32.mrb[42].mxu1 }
 0x5ad   : > { %v6127_v33 = vpop.f32.mrb[43].mxu1  ;;  %v5056_v63 = vsel %vm5055_vm9, %v6162_v55, -inf }
 0x5ae   : > { %5057 = vmax.xlane.f32.xlu0 %v5056_v63 }
 0x63b   : > { %v5058_v40 = vpop.xlane.xlu0 %5057 }
 0x63c   : > { %v5059_v5 = vsub.f32 %v6162_v55, %v5058_v40 }
 0x63e   : > { %v5060_v45 = vmul.f32 1.442695, %v5059_v5 }
 0x640   : > { %6578 = vpow2.f32 %v5060_v45 }
 0x64a   : > { %v6579_v0 = vpop.eup %6578 }
 0x64b   : > { %v5062_v46 = vsel %vm5055_vm9, %v6579_v0, 0.0 }
 0x64c   : > { %5063 = vadd.xlane.f32.xlu0 %v5062_v46 }
 0x6d9   : > { %v5064_v11 = vpop.xlane.xlu0 %5063 }
 0x6da   : > { %6580 = vrcp.f32 %v5064_v11 }
 0x6e4   : > { %v6581_v56 = vpop.eup %6580 }
 0x6e5   : > { %v5066_v18 = vmul.f32 %v6581_v56, %v6579_v0 }
 0x6e7   : > { %5067 = vst.msk [vmem:[%s270_s29] sm:$0x1] %vm5055_vm9, %v5066_v18 }
 0x6e8   : > { %6595 = shalt.err (!%p6592_p3)
}
 0x6e9   : > { %s6596_s19 = scalar_lea.hbm %s7835_s14, 16  ;;  %s6600_s22 = scalar_lea.hbm %s7885_s7, 32 }
 0x6ea   : > { %p6597_p4 = scmp.ne.s32.totalorder %s7835_s14, %s6596_s19  ;;  %p6601_p9 = scmp.lt.u32.totalorder %s7835_s14, %s7885_s7 }
 0x6eb   : > { %p6602_p10 = scmp.lt.u32.totalorder %s6600_s22, %s6596_s19  ;;  %p6604_p12 = scmp.lt.u32.totalorder %s6596_s19, %s7835_s14 }
 0x6ec   : > { %p6598_p7 = pnand %p6597_p4, %p6728_p5 }
 0x6ed   : > { %p6603_p11 = por %p6602_p10, %p6601_p9 }
 0x6ee   : > { %p6599_p8 = pneg %p6598_p7 }
 0x6ef   : > { %p6605_p13 = por %p6604_p12, %p6603_p11 }
 0x6f1   : > { %p6606_p0 = pnand %p6605_p13, %p6599_p8 }
 0x6f3   : > { %6609 = shalt.err (!%p6606_p0)
}
 0x6f4   : > { %6520 = dma.vmem_to_hbm [thread:$0]  (%p6728_p5), %s7837_s8, 16, %s7835_s14, %s5069_s15  }
 0x6f5 PF: > { %p6526_p1 = scmp.ge.s32.totalorder %s6644_s27, 2  ;;  %s5093_s9 = sand.u32 1, %s6632_s24  }
 0x6f6   : > { %s5094_s13 = scalar_lea.sflag [#allocation7], %s5093_s9 }
 0x6f7   : > { %p6523_p2 = pnand %p6526_p1, %p6732_p6 }
 0x6f9   : > { %6627 = dma.done.wait (!%p6523_p2), %s5094_s13, 16  }
 0x6fa   : > { %6629 = vsyncadd (!%p6523_p2), %s5094_s13, 4294967280  ;;  %p17_p3 = scmp.ge.s32.totalorder %s6715_s30, 4   ;;  %s7888_s24 = smov %s6636_s25 }
 0x6fb   : > { %s7889_s25 = smov %s6640_s26  ;;  %s7890_s26 = smov %s6726_s10 }
 0x6fc   : > { %s7891_s27 = smov %s6715_s30  ;;  %19 = sbr.rel (!%p17_p3) target bundleno = 3 (0x3), region = 164 }
 0x703   :  { %5098 = vsyncpa [#allocation7], 1 }
 0x704   :  { %5100 = vsyncpa [#allocation7 + $0x1], 1 }

</bundles_post_ra>
